<compile_context>
chip_gen: v5e
topology: v5e:2x2
jax: 0.10.0
libtpu: 0.0.40
codegen_flags: <defaults>
</compile_context>

<pallas_src>
import jax
import jax.numpy as jnp
from jax import lax
from jax.experimental import pallas as pl
from jax.experimental.pallas import tpu as pltpu

# ---- CNNModel constructor arguments (small, consistent with the module) ----
IN_CH = 4          # input_channels
HID = 32           # hidden_units
KS = 3             # kernel_size (padding = KS // 2 = 1)
SEQ = 64           # input_length
OUT = 1            # output_size
FC1 = 64

L1 = SEQ           # length after conv1 (same padding)
L2 = L1 // 2       # after first maxpool(2)
L3 = L2 // 2       # after second maxpool(2)
FLAT = HID * L3    # flattened (channel-major) feature size fed to fc1
OUT_PAD = 128      # lane-dense output width (column 0 holds the real output)


def _make_kernel(tb):
    rows1 = tb * L1
    rows2 = tb * L2

    def kernel(p1_ref, wc1_ref, bc1_ref, wc2_ref, bc2_ref,
               mprev_ref, mnext_ref, w1f_ref, b1_ref, w2_ref, b2_ref,
               out_ref, s1_ref, s2_ref):
        # ---- conv1 (im2col precomputed in wrapper) + bias + ReLU ----
        act1 = jnp.dot(p1_ref[...], wc1_ref[...],
                       preferred_element_type=jnp.float32)
        act1 = jnp.maximum(act1 + bc1_ref[...], 0.0)            # (rows1, HID)
        s1_ref[...] = act1

        # ---- maxpool(2): stride-2 sublane reads (no selection matmul) ----
        h1 = jnp.maximum(s1_ref[pl.ds(0, rows2, stride=2), :],
                         s1_ref[pl.ds(1, rows2, stride=2), :])  # (rows2, HID)

        # ---- conv2: 3 accumulating K=HID matmuls, rolls + precomputed masks ----
        # Rolls wrap across batch segments / tile ends; the per-row masks
        # (built at trace time) zero exactly those contributions.
        hp = pltpu.roll(h1, 1, axis=0) * mprev_ref[...]         # h1[r-1] or 0
        hn = pltpu.roll(h1, rows2 - 1, axis=0) * mnext_ref[...] # h1[r+1] or 0
        act2 = jnp.dot(hp, wc2_ref[0], preferred_element_type=jnp.float32)
        act2 = act2 + jnp.dot(h1, wc2_ref[1], preferred_element_type=jnp.float32)
        act2 = act2 + jnp.dot(hn, wc2_ref[2], preferred_element_type=jnp.float32)
        act2 = jnp.maximum(act2 + bc2_ref[...], 0.0)            # (rows2, HID)
        s2_ref[...] = act2

        # ---- maxpool(2) fused into fc1 (PyTorch channel-major flatten folded
        #      into w1f at trace time: w1f[l, c, f] = w1[f, c*L3 + l]) ----
        def pooled(l):
            # rows t*L2 + 2l and t*L2 + 2l + 1 for every batch element t.
            e = s2_ref[pl.ds(2 * l, tb, stride=L2), :]
            o = s2_ref[pl.ds(2 * l + 1, tb, stride=L2), :]
            return jnp.maximum(e, o)                            # (tb, HID)

        acc = jnp.dot(pooled(0), w1f_ref[0], preferred_element_type=jnp.float32)
        for l in range(1, L3):                                  # unrolled at trace
            acc = acc + jnp.dot(pooled(l), w1f_ref[l],
                                preferred_element_type=jnp.float32)
        z = jnp.maximum(acc + b1_ref[...], 0.0)                 # (tb, FC1)

        # ---- fc2, padded to a lane-dense (tb, OUT_PAD) store ----
        out_ref[...] = (jnp.dot(z, w2_ref[...], preferred_element_type=jnp.float32)
                        + b2_ref[...])

    return kernel


def _pick_tb(b_pad):
    """b_pad is a multiple of 8; prefer big multiples of 8 but keep >=2 steps."""
    for t in (64, 32, 16, 8):
        if b_pad % t == 0 and b_pad // t >= 2:
            return t
    return 8 if b_pad >= 8 else b_pad


@jax.jit
def cnn_forward(x, params):
    """x: (B, SEQ, IN_CH) float32  ->  (B, OUT) float32."""
    B = x.shape[0]
    b_pad = ((B + 7) // 8) * 8
    if b_pad != B:
        x = jnp.concatenate(
            [x, jnp.zeros((b_pad - B, SEQ, IN_CH), x.dtype)], axis=0)
    TB = _pick_tb(b_pad)

    # --- trace-time weight preparation (folds every layout permutation) ---
    wc1 = jnp.transpose(params["cw1"], (2, 1, 0)).reshape(KS * IN_CH, HID)
    bc1 = params["cb1"].reshape(1, HID)
    wc2 = jnp.transpose(params["cw2"], (2, 1, 0))               # (KS, HID, HID)
    bc2 = params["cb2"].reshape(1, HID)
    # fc1: w1[f, c*L3 + l] -> W1f[l, c, f]
    w1f = jnp.transpose(params["w1"].reshape(FC1, HID, L3), (2, 1, 0))
    b1 = params["b1"].reshape(1, FC1)
    # fc2 padded to 128 lanes so the output store is dense.
    w2 = jnp.zeros((FC1, OUT_PAD), jnp.float32).at[:, :OUT].set(params["w2"].T)
    b2 = jnp.zeros((1, OUT_PAD), jnp.float32).at[:, :OUT].set(
        params["b2"].reshape(1, OUT))

    # --- conv1 im2col hoisted to XLA: (b_pad*L1, KS*IN_CH) patches ---
    zrow = jnp.zeros((b_pad, 1, IN_CH), x.dtype)
    x_prev = jnp.concatenate([zrow, x[:, :-1, :]], axis=1)
    x_next = jnp.concatenate([x[:, 1:, :], zrow], axis=1)
    patches = jnp.concatenate([x_prev, x, x_next], axis=2)
    patches = patches.reshape(b_pad * L1, KS * IN_CH)

    # --- grid-invariant conv2 boundary masks (built once, constant index_map) ---
    pos = jnp.arange(TB * L2, dtype=jnp.int32) % L2
    mask_prev = (pos != 0).astype(jnp.float32).reshape(TB * L2, 1)
    mask_next = (pos != L2 - 1).astype(jnp.float32).reshape(TB * L2, 1)

    out = pl.pallas_call(
        _make_kernel(TB),
        out_shape=jax.ShapeDtypeStruct((b_pad, OUT_PAD), jnp.float32),
        grid=(b_pad // TB,),
        in_specs=[
            pl.BlockSpec((TB * L1, KS * IN_CH), lambda i: (i, 0)),
            pl.BlockSpec((KS * IN_CH, HID), lambda i: (0, 0)),
            pl.BlockSpec((1, HID), lambda i: (0, 0)),
            pl.BlockSpec((KS, HID, HID), lambda i: (0, 0, 0)),
            pl.BlockSpec((1, HID), lambda i: (0, 0)),
            pl.BlockSpec((TB * L2, 1), lambda i: (0, 0)),
            pl.BlockSpec((TB * L2, 1), lambda i: (0, 0)),
            pl.BlockSpec((L3, HID, FC1), lambda i: (0, 0, 0)),
            pl.BlockSpec((1, FC1), lambda i: (0, 0)),
            pl.BlockSpec((FC1, OUT_PAD), lambda i: (0, 0)),
            pl.BlockSpec((1, OUT_PAD), lambda i: (0, 0)),
        ],
        out_specs=pl.BlockSpec((TB, OUT_PAD), lambda i: (i, 0)),
        scratch_shapes=[pltpu.VMEM((TB * L1, HID), jnp.float32),
                        pltpu.VMEM((TB * L2, HID), jnp.float32)],
        compiler_params=pltpu.CompilerParams(dimension_semantics=("parallel",)),
    )(patches, wc1, bc1, wc2, bc2, mask_prev, mask_next, w1f, b1, w2, b2)

    return out[:B, :OUT]


def ref_forward(x, params):
    """Pure-JAX reference mirroring the PyTorch forward."""
    h = jnp.transpose(x, (0, 2, 1))                      # (B, C, L) = x.permute(0,2,1)
    for w, b in ((params["cw1"], params["cb1"]), (params["cw2"], params["cb2"])):
        h = lax.conv_general_dilated(
            h, w, window_strides=(1,), padding=[(KS // 2, KS // 2)],
            dimension_numbers=("NCH", "OIH", "NCH"),
            precision=lax.Precision.HIGHEST)
        h = jnp.maximum(h + b[None, :, None], 0.0)
        lc = h.shape[-1]
        h = h[..., :(lc // 2) * 2].reshape(h.shape[0], h.shape[1], lc // 2, 2)
        h = jnp.max(h, axis=-1)
    flat = h.reshape(h.shape[0], -1)
    z = jnp.maximum(flat @ params["w1"].T + params["b1"], 0.0)
    return z @ params["w2"].T + params["b2"]


if __name__ == "__main__":
    key = jax.random.PRNGKey(0)
    ks = jax.random.split(key, 9)
    params = {
        "cw1": 0.2 * jax.random.normal(ks[0], (HID, IN_CH, KS), jnp.float32),
        "cb1": 0.1 * jax.random.normal(ks[1], (HID,), jnp.float32),
        "cw2": 0.2 * jax.random.normal(ks[2], (HID, HID, KS), jnp.float32),
        "cb2": 0.1 * jax.random.normal(ks[3], (HID,), jnp.float32),
        "w1": 0.1 * jax.random.normal(ks[4], (FC1, FLAT), jnp.float32),
        "b1": 0.1 * jax.random.normal(ks[5], (FC1,), jnp.float32),
        "w2": 0.1 * jax.random.normal(ks[6], (OUT, FC1), jnp.float32),
        "b2": 0.1 * jax.random.normal(ks[7], (OUT,), jnp.float32),
    }
    B = 2
    x = jax.random.normal(ks[8], (B, SEQ, IN_CH), jnp.float32)

    out = jax.block_until_ready(cnn_forward(x, params))
    ref = jax.block_until_ready(ref_forward(x, params))

    assert out.shape == (B, OUT), out.shape
    assert jnp.allclose(out, ref, rtol=2e-2, atol=2e-2), (out, ref)
    print("KERNEL_OK")
</pallas_src>

<mosaic_0001>
module attributes {stable_mosaic.version = 11 : i64} {
  func.func @kernel(%arg0: i32, %arg1: memref<512x12xf32, #tpu.memory_space<vmem>>, %arg2: memref<12x32xf32, #tpu.memory_space<vmem>>, %arg3: memref<1x32xf32, #tpu.memory_space<vmem>>, %arg4: memref<3x32x32xf32, #tpu.memory_space<vmem>>, %arg5: memref<1x32xf32, #tpu.memory_space<vmem>>, %arg6: memref<256x1xf32, #tpu.memory_space<vmem>>, %arg7: memref<256x1xf32, #tpu.memory_space<vmem>>, %arg8: memref<16x32x64xf32, #tpu.memory_space<vmem>>, %arg9: memref<1x64xf32, #tpu.memory_space<vmem>>, %arg10: memref<64x128xf32, #tpu.memory_space<vmem>>, %arg11: memref<1x128xf32, #tpu.memory_space<vmem>>, %arg12: memref<8x128xf32, #tpu.memory_space<vmem>>, %arg13: memref<512x32xf32, #tpu.memory_space<vmem>>, %arg14: memref<256x32xf32, #tpu.memory_space<vmem>>) attributes {dimension_semantics = [#tpu.dimension_semantics<parallel>], iteration_bounds = array<i64: 1>, scalar_prefetch = 0 : i64, scratch_operands = 2 : i64, tpu.core_type = #tpu.core_type<tc>, window_params = [{transform_indices = @transform_0, window_bounds = array<i64: 512, 12>}, {pipeline_mode = #tpu.pipeline_mode<synchronous>, transform_indices = @transform_1, window_bounds = array<i64: 12, 32>}, {pipeline_mode = #tpu.pipeline_mode<synchronous>, transform_indices = @transform_2, window_bounds = array<i64: 1, 32>}, {pipeline_mode = #tpu.pipeline_mode<synchronous>, transform_indices = @transform_3, window_bounds = array<i64: 3, 32, 32>}, {pipeline_mode = #tpu.pipeline_mode<synchronous>, transform_indices = @transform_4, window_bounds = array<i64: 1, 32>}, {pipeline_mode = #tpu.pipeline_mode<synchronous>, transform_indices = @transform_5, window_bounds = array<i64: 256, 1>}, {pipeline_mode = #tpu.pipeline_mode<synchronous>, transform_indices = @transform_6, window_bounds = array<i64: 256, 1>}, {pipeline_mode = #tpu.pipeline_mode<synchronous>, transform_indices = @transform_7, window_bounds = array<i64: 16, 32, 64>}, {pipeline_mode = #tpu.pipeline_mode<synchronous>, transform_indices = @transform_8, window_bounds = array<i64: 1, 64>}, {pipeline_mode = #tpu.pipeline_mode<synchronous>, transform_indices = @transform_9, window_bounds = array<i64: 64, 128>}, {pipeline_mode = #tpu.pipeline_mode<synchronous>, transform_indices = @transform_10, window_bounds = array<i64: 1, 128>}, {transform_indices = @transform_11, window_bounds = array<i64: 8, 128>}]} {
    %c0 = arith.constant 0 : index
    %c0_0 = arith.constant 0 : index
    %0 = vector.load %arg1[%c0, %c0_0] : memref<512x12xf32, #tpu.memory_space<vmem>>, vector<512x12xf32>
    %c0_1 = arith.constant 0 : index
    %c0_2 = arith.constant 0 : index
    %1 = vector.load %arg2[%c0_1, %c0_2] : memref<12x32xf32, #tpu.memory_space<vmem>>, vector<12x32xf32>
    %cst = arith.constant dense<0.000000e+00> : vector<512x32xf32>
    %2 = tpu.matmul %0, %1, %cst {dimension_numbers = #tpu.dot_dimension_numbers<[1], [0], [0], [1], [0, 0, 1, 1], [], []>} : vector<512x12xf32>, vector<12x32xf32>, vector<512x32xf32> -> vector<512x32xf32>
    %c0_3 = arith.constant 0 : index
    %c0_4 = arith.constant 0 : index
    %3 = vector.load %arg3[%c0_3, %c0_4] : memref<1x32xf32, #tpu.memory_space<vmem>>, vector<1x32xf32>
    %4 = vector.broadcast %3 : vector<1x32xf32> to vector<512x32xf32>
    %5 = arith.addf %2, %4 : vector<512x32xf32>
    %cst_5 = arith.constant 0.000000e+00 : f32
    %6 = vector.broadcast %cst_5 : f32 to vector<512x32xf32>
    %7 = arith.maximumf %5, %6 : vector<512x32xf32>
    %c0_6 = arith.constant 0 : index
    %c0_7 = arith.constant 0 : index
    %8 = vector.load %arg13[%c0_6, %c0_7] : memref<512x32xf32, #tpu.memory_space<vmem>>, vector<512x32xf32>
    tpu.vector_store %arg13[%c0_6, %c0_7], %7 {strides = array<i32>} : memref<512x32xf32, #tpu.memory_space<vmem>>, vector<512x32xf32>,
    %c0_8 = arith.constant 0 : index
    %c0_9 = arith.constant 0 : index
    %9 = tpu.strided_load %arg13[%c0_8, %c0_9] {strides = array<i32: 2, 1>} : memref<512x32xf32, #tpu.memory_space<vmem>>, vector<256x32xf32>
    %c1 = arith.constant 1 : index
    %c0_10 = arith.constant 0 : index
    %10 = tpu.strided_load %arg13[%c1, %c0_10] {strides = array<i32: 2, 1>} : memref<512x32xf32, #tpu.memory_space<vmem>>, vector<256x32xf32>
    %11 = arith.maximumf %9, %10 : vector<256x32xf32>
    %c1_i32 = arith.constant 1 : i32
    %12 = tpu.dynamic_rotate %11 by %c1_i32 dim 0 : vector<256x32xf32>, i32 -> vector<256x32xf32>
    %c0_11 = arith.constant 0 : index
    %c0_12 = arith.constant 0 : index
    %13 = vector.load %arg6[%c0_11, %c0_12] : memref<256x1xf32, #tpu.memory_space<vmem>>, vector<256x1xf32>
    %14 = vector.broadcast %13 : vector<256x1xf32> to vector<256x32xf32>
    %15 = arith.mulf %12, %14 : vector<256x32xf32>
    %c255_i32 = arith.constant 255 : i32
    %16 = tpu.dynamic_rotate %11 by %c255_i32 dim 0 : vector<256x32xf32>, i32 -> vector<256x32xf32>
    %c0_13 = arith.constant 0 : index
    %c0_14 = arith.constant 0 : index
    %17 = vector.load %arg7[%c0_13, %c0_14] : memref<256x1xf32, #tpu.memory_space<vmem>>, vector<256x1xf32>
    %18 = vector.broadcast %17 : vector<256x1xf32> to vector<256x32xf32>
    %19 = arith.mulf %16, %18 : vector<256x32xf32>
    %c0_15 = arith.constant 0 : index
    %c0_16 = arith.constant 0 : index
    %c0_17 = arith.constant 0 : index
    %20 = vector.load %arg4[%c0_15, %c0_16, %c0_17] : memref<3x32x32xf32, #tpu.memory_space<vmem>>, vector<1x32x32xf32>
    %21 = vector.shape_cast %20 : vector<1x32x32xf32> to vector<32x32xf32>
    %cst_18 = arith.constant dense<0.000000e+00> : vector<256x32xf32>
    %22 = tpu.matmul %15, %21, %cst_18 {dimension_numbers = #tpu.dot_dimension_numbers<[1], [0], [0], [1], [0, 0, 1, 1], [], []>} : vector<256x32xf32>, vector<32x32xf32>, vector<256x32xf32> -> vector<256x32xf32>
    %c1_19 = arith.constant 1 : index
    %c0_20 = arith.constant 0 : index
    %c0_21 = arith.constant 0 : index
    %23 = vector.load %arg4[%c1_19, %c0_20, %c0_21] : memref<3x32x32xf32, #tpu.memory_space<vmem>>, vector<1x32x32xf32>
    %24 = vector.shape_cast %23 : vector<1x32x32xf32> to vector<32x32xf32>
    %cst_22 = arith.constant dense<0.000000e+00> : vector<256x32xf32>
    %25 = tpu.matmul %11, %24, %cst_22 {dimension_numbers = #tpu.dot_dimension_numbers<[1], [0], [0], [1], [0, 0, 1, 1], [], []>} : vector<256x32xf32>, vector<32x32xf32>, vector<256x32xf32> -> vector<256x32xf32>
    %26 = arith.addf %22, %25 : vector<256x32xf32>
    %c2 = arith.constant 2 : index
    %c0_23 = arith.constant 0 : index
    %c0_24 = arith.constant 0 : index
    %27 = vector.load %arg4[%c2, %c0_23, %c0_24] : memref<3x32x32xf32, #tpu.memory_space<vmem>>, vector<1x32x32xf32>
    %28 = vector.shape_cast %27 : vector<1x32x32xf32> to vector<32x32xf32>
    %cst_25 = arith.constant dense<0.000000e+00> : vector<256x32xf32>
    %29 = tpu.matmul %19, %28, %cst_25 {dimension_numbers = #tpu.dot_dimension_numbers<[1], [0], [0], [1], [0, 0, 1, 1], [], []>} : vector<256x32xf32>, vector<32x32xf32>, vector<256x32xf32> -> vector<256x32xf32>
    %30 = arith.addf %26, %29 : vector<256x32xf32>
    %c0_26 = arith.constant 0 : index
    %c0_27 = arith.constant 0 : index
    %31 = vector.load %arg5[%c0_26, %c0_27] : memref<1x32xf32, #tpu.memory_space<vmem>>, vector<1x32xf32>
    %32 = vector.broadcast %31 : vector<1x32xf32> to vector<256x32xf32>
    %33 = arith.addf %30, %32 : vector<256x32xf32>
    %cst_28 = arith.constant 0.000000e+00 : f32
    %34 = vector.broadcast %cst_28 : f32 to vector<256x32xf32>
    %35 = arith.maximumf %33, %34 : vector<256x32xf32>
    %c0_29 = arith.constant 0 : index
    %c0_30 = arith.constant 0 : index
    %36 = vector.load %arg14[%c0_29, %c0_30] : memref<256x32xf32, #tpu.memory_space<vmem>>, vector<256x32xf32>
    tpu.vector_store %arg14[%c0_29, %c0_30], %35 {strides = array<i32>} : memref<256x32xf32, #tpu.memory_space<vmem>>, vector<256x32xf32>,
    %c0_31 = arith.constant 0 : index
    %c0_32 = arith.constant 0 : index
    %37 = tpu.strided_load %arg14[%c0_31, %c0_32] {strides = array<i32: 32, 1>} : memref<256x32xf32, #tpu.memory_space<vmem>>, vector<8x32xf32>
    %c1_33 = arith.constant 1 : index
    %c0_34 = arith.constant 0 : index
    %38 = tpu.strided_load %arg14[%c1_33, %c0_34] {strides = array<i32: 32, 1>} : memref<256x32xf32, #tpu.memory_space<vmem>>, vector<8x32xf32>
    %39 = arith.maximumf %37, %38 : vector<8x32xf32>
    %c0_35 = arith.constant 0 : index
    %c0_36 = arith.constant 0 : index
    %c0_37 = arith.constant 0 : index
    %40 = vector.load %arg8[%c0_35, %c0_36, %c0_37] : memref<16x32x64xf32, #tpu.memory_space<vmem>>, vector<1x32x64xf32>
    %41 = vector.shape_cast %40 : vector<1x32x64xf32> to vector<32x64xf32>
    %cst_38 = arith.constant dense<0.000000e+00> : vector<8x64xf32>
    %42 = tpu.matmul %39, %41, %cst_38 {dimension_numbers = #tpu.dot_dimension_numbers<[1], [0], [0], [1], [0, 0, 1, 1], [], []>} : vector<8x32xf32>, vector<32x64xf32>, vector<8x64xf32> -> vector<8x64xf32>
    %c2_39 = arith.constant 2 : index
    %c0_40 = arith.constant 0 : index
    %43 = tpu.strided_load %arg14[%c2_39, %c0_40] {strides = array<i32: 32, 1>} : memref<256x32xf32, #tpu.memory_space<vmem>>, vector<8x32xf32>
    %c3 = arith.constant 3 : index
    %c0_41 = arith.constant 0 : index
    %44 = tpu.strided_load %arg14[%c3, %c0_41] {strides = array<i32: 32, 1>} : memref<256x32xf32, #tpu.memory_space<vmem>>, vector<8x32xf32>
    %45 = arith.maximumf %43, %44 : vector<8x32xf32>
    %c1_42 = arith.constant 1 : index
    %c0_43 = arith.constant 0 : index
    %c0_44 = arith.constant 0 : index
    %46 = vector.load %arg8[%c1_42, %c0_43, %c0_44] : memref<16x32x64xf32, #tpu.memory_space<vmem>>, vector<1x32x64xf32>
    %47 = vector.shape_cast %46 : vector<1x32x64xf32> to vector<32x64xf32>
    %cst_45 = arith.constant dense<0.000000e+00> : vector<8x64xf32>
    %48 = tpu.matmul %45, %47, %cst_45 {dimension_numbers = #tpu.dot_dimension_numbers<[1], [0], [0], [1], [0, 0, 1, 1], [], []>} : vector<8x32xf32>, vector<32x64xf32>, vector<8x64xf32> -> vector<8x64xf32>
    %49 = arith.addf %42, %48 : vector<8x64xf32>
    %c4 = arith.constant 4 : index
    %c0_46 = arith.constant 0 : index
    %50 = tpu.strided_load %arg14[%c4, %c0_46] {strides = array<i32: 32, 1>} : memref<256x32xf32, #tpu.memory_space<vmem>>, vector<8x32xf32>
    %c5 = arith.constant 5 : index
    %c0_47 = arith.constant 0 : index
    %51 = tpu.strided_load %arg14[%c5, %c0_47] {strides = array<i32: 32, 1>} : memref<256x32xf32, #tpu.memory_space<vmem>>, vector<8x32xf32>
    %52 = arith.maximumf %50, %51 : vector<8x32xf32>
    %c2_48 = arith.constant 2 : index
    %c0_49 = arith.constant 0 : index
    %c0_50 = arith.constant 0 : index
    %53 = vector.load %arg8[%c2_48, %c0_49, %c0_50] : memref<16x32x64xf32, #tpu.memory_space<vmem>>, vector<1x32x64xf32>
    %54 = vector.shape_cast %53 : vector<1x32x64xf32> to vector<32x64xf32>
    %cst_51 = arith.constant dense<0.000000e+00> : vector<8x64xf32>
    %55 = tpu.matmul %52, %54, %cst_51 {dimension_numbers = #tpu.dot_dimension_numbers<[1], [0], [0], [1], [0, 0, 1, 1], [], []>} : vector<8x32xf32>, vector<32x64xf32>, vector<8x64xf32> -> vector<8x64xf32>
    %56 = arith.addf %49, %55 : vector<8x64xf32>
    %c6 = arith.constant 6 : index
    %c0_52 = arith.constant 0 : index
    %57 = tpu.strided_load %arg14[%c6, %c0_52] {strides = array<i32: 32, 1>} : memref<256x32xf32, #tpu.memory_space<vmem>>, vector<8x32xf32>
    %c7 = arith.constant 7 : index
    %c0_53 = arith.constant 0 : index
    %58 = tpu.strided_load %arg14[%c7, %c0_53] {strides = array<i32: 32, 1>} : memref<256x32xf32, #tpu.memory_space<vmem>>, vector<8x32xf32>
    %59 = arith.maximumf %57, %58 : vector<8x32xf32>
    %c3_54 = arith.constant 3 : index
    %c0_55 = arith.constant 0 : index
    %c0_56 = arith.constant 0 : index
    %60 = vector.load %arg8[%c3_54, %c0_55, %c0_56] : memref<16x32x64xf32, #tpu.memory_space<vmem>>, vector<1x32x64xf32>
    %61 = vector.shape_cast %60 : vector<1x32x64xf32> to vector<32x64xf32>
    %cst_57 = arith.constant dense<0.000000e+00> : vector<8x64xf32>
    %62 = tpu.matmul %59, %61, %cst_57 {dimension_numbers = #tpu.dot_dimension_numbers<[1], [0], [0], [1], [0, 0, 1, 1], [], []>} : vector<8x32xf32>, vector<32x64xf32>, vector<8x64xf32> -> vector<8x64xf32>
    %63 = arith.addf %56, %62 : vector<8x64xf32>
    %c8 = arith.constant 8 : index
    %c0_58 = arith.constant 0 : index
    %64 = tpu.strided_load %arg14[%c8, %c0_58] {strides = array<i32: 32, 1>} : memref<256x32xf32, #tpu.memory_space<vmem>>, vector<8x32xf32>
    %c9 = arith.constant 9 : index
    %c0_59 = arith.constant 0 : index
    %65 = tpu.strided_load %arg14[%c9, %c0_59] {strides = array<i32: 32, 1>} : memref<256x32xf32, #tpu.memory_space<vmem>>, vector<8x32xf32>
    %66 = arith.maximumf %64, %65 : vector<8x32xf32>
    %c4_60 = arith.constant 4 : index
    %c0_61 = arith.constant 0 : index
    %c0_62 = arith.constant 0 : index
    %67 = vector.load %arg8[%c4_60, %c0_61, %c0_62] : memref<16x32x64xf32, #tpu.memory_space<vmem>>, vector<1x32x64xf32>
    %68 = vector.shape_cast %67 : vector<1x32x64xf32> to vector<32x64xf32>
    %cst_63 = arith.constant dense<0.000000e+00> : vector<8x64xf32>
    %69 = tpu.matmul %66, %68, %cst_63 {dimension_numbers = #tpu.dot_dimension_numbers<[1], [0], [0], [1], [0, 0, 1, 1], [], []>} : vector<8x32xf32>, vector<32x64xf32>, vector<8x64xf32> -> vector<8x64xf32>
    %70 = arith.addf %63, %69 : vector<8x64xf32>
    %c10 = arith.constant 10 : index
    %c0_64 = arith.constant 0 : index
    %71 = tpu.strided_load %arg14[%c10, %c0_64] {strides = array<i32: 32, 1>} : memref<256x32xf32, #tpu.memory_space<vmem>>, vector<8x32xf32>
    %c11 = arith.constant 11 : index
    %c0_65 = arith.constant 0 : index
    %72 = tpu.strided_load %arg14[%c11, %c0_65] {strides = array<i32: 32, 1>} : memref<256x32xf32, #tpu.memory_space<vmem>>, vector<8x32xf32>
    %73 = arith.maximumf %71, %72 : vector<8x32xf32>
    %c5_66 = arith.constant 5 : index
    %c0_67 = arith.constant 0 : index
    %c0_68 = arith.constant 0 : index
    %74 = vector.load %arg8[%c5_66, %c0_67, %c0_68] : memref<16x32x64xf32, #tpu.memory_space<vmem>>, vector<1x32x64xf32>
    %75 = vector.shape_cast %74 : vector<1x32x64xf32> to vector<32x64xf32>
    %cst_69 = arith.constant dense<0.000000e+00> : vector<8x64xf32>
    %76 = tpu.matmul %73, %75, %cst_69 {dimension_numbers = #tpu.dot_dimension_numbers<[1], [0], [0], [1], [0, 0, 1, 1], [], []>} : vector<8x32xf32>, vector<32x64xf32>, vector<8x64xf32> -> vector<8x64xf32>
    %77 = arith.addf %70, %76 : vector<8x64xf32>
    %c12 = arith.constant 12 : index
    %c0_70 = arith.constant 0 : index
    %78 = tpu.strided_load %arg14[%c12, %c0_70] {strides = array<i32: 32, 1>} : memref<256x32xf32, #tpu.memory_space<vmem>>, vector<8x32xf32>
    %c13 = arith.constant 13 : index
    %c0_71 = arith.constant 0 : index
    %79 = tpu.strided_load %arg14[%c13, %c0_71] {strides = array<i32: 32, 1>} : memref<256x32xf32, #tpu.memory_space<vmem>>, vector<8x32xf32>
    %80 = arith.maximumf %78, %79 : vector<8x32xf32>
    %c6_72 = arith.constant 6 : index
    %c0_73 = arith.constant 0 : index
    %c0_74 = arith.constant 0 : index
    %81 = vector.load %arg8[%c6_72, %c0_73, %c0_74] : memref<16x32x64xf32, #tpu.memory_space<vmem>>, vector<1x32x64xf32>
    %82 = vector.shape_cast %81 : vector<1x32x64xf32> to vector<32x64xf32>
    %cst_75 = arith.constant dense<0.000000e+00> : vector<8x64xf32>
    %83 = tpu.matmul %80, %82, %cst_75 {dimension_numbers = #tpu.dot_dimension_numbers<[1], [0], [0], [1], [0, 0, 1, 1], [], []>} : vector<8x32xf32>, vector<32x64xf32>, vector<8x64xf32> -> vector<8x64xf32>
    %84 = arith.addf %77, %83 : vector<8x64xf32>
    %c14 = arith.constant 14 : index
    %c0_76 = arith.constant 0 : index
    %85 = tpu.strided_load %arg14[%c14, %c0_76] {strides = array<i32: 32, 1>} : memref<256x32xf32, #tpu.memory_space<vmem>>, vector<8x32xf32>
    %c15 = arith.constant 15 : index
    %c0_77 = arith.constant 0 : index
    %86 = tpu.strided_load %arg14[%c15, %c0_77] {strides = array<i32: 32, 1>} : memref<256x32xf32, #tpu.memory_space<vmem>>, vector<8x32xf32>
    %87 = arith.maximumf %85, %86 : vector<8x32xf32>
    %c7_78 = arith.constant 7 : index
    %c0_79 = arith.constant 0 : index
    %c0_80 = arith.constant 0 : index
    %88 = vector.load %arg8[%c7_78, %c0_79, %c0_80] : memref<16x32x64xf32, #tpu.memory_space<vmem>>, vector<1x32x64xf32>
    %89 = vector.shape_cast %88 : vector<1x32x64xf32> to vector<32x64xf32>
    %cst_81 = arith.constant dense<0.000000e+00> : vector<8x64xf32>
    %90 = tpu.matmul %87, %89, %cst_81 {dimension_numbers = #tpu.dot_dimension_numbers<[1], [0], [0], [1], [0, 0, 1, 1], [], []>} : vector<8x32xf32>, vector<32x64xf32>, vector<8x64xf32> -> vector<8x64xf32>
    %91 = arith.addf %84, %90 : vector<8x64xf32>
    %c16 = arith.constant 16 : index
    %c0_82 = arith.constant 0 : index
    %92 = tpu.strided_load %arg14[%c16, %c0_82] {strides = array<i32: 32, 1>} : memref<256x32xf32, #tpu.memory_space<vmem>>, vector<8x32xf32>
    %c17 = arith.constant 17 : index
    %c0_83 = arith.constant 0 : index
    %93 = tpu.strided_load %arg14[%c17, %c0_83] {strides = array<i32: 32, 1>} : memref<256x32xf32, #tpu.memory_space<vmem>>, vector<8x32xf32>
    %94 = arith.maximumf %92, %93 : vector<8x32xf32>
    %c8_84 = arith.constant 8 : index
    %c0_85 = arith.constant 0 : index
    %c0_86 = arith.constant 0 : index
    %95 = vector.load %arg8[%c8_84, %c0_85, %c0_86] : memref<16x32x64xf32, #tpu.memory_space<vmem>>, vector<1x32x64xf32>
    %96 = vector.shape_cast %95 : vector<1x32x64xf32> to vector<32x64xf32>
    %cst_87 = arith.constant dense<0.000000e+00> : vector<8x64xf32>
    %97 = tpu.matmul %94, %96, %cst_87 {dimension_numbers = #tpu.dot_dimension_numbers<[1], [0], [0], [1], [0, 0, 1, 1], [], []>} : vector<8x32xf32>, vector<32x64xf32>, vector<8x64xf32> -> vector<8x64xf32>
    %98 = arith.addf %91, %97 : vector<8x64xf32>
    %c18 = arith.constant 18 : index
    %c0_88 = arith.constant 0 : index
    %99 = tpu.strided_load %arg14[%c18, %c0_88] {strides = array<i32: 32, 1>} : memref<256x32xf32, #tpu.memory_space<vmem>>, vector<8x32xf32>
    %c19 = arith.constant 19 : index
    %c0_89 = arith.constant 0 : index
    %100 = tpu.strided_load %arg14[%c19, %c0_89] {strides = array<i32: 32, 1>} : memref<256x32xf32, #tpu.memory_space<vmem>>, vector<8x32xf32>
    %101 = arith.maximumf %99, %100 : vector<8x32xf32>
    %c9_90 = arith.constant 9 : index
    %c0_91 = arith.constant 0 : index
    %c0_92 = arith.constant 0 : index
    %102 = vector.load %arg8[%c9_90, %c0_91, %c0_92] : memref<16x32x64xf32, #tpu.memory_space<vmem>>, vector<1x32x64xf32>
    %103 = vector.shape_cast %102 : vector<1x32x64xf32> to vector<32x64xf32>
    %cst_93 = arith.constant dense<0.000000e+00> : vector<8x64xf32>
    %104 = tpu.matmul %101, %103, %cst_93 {dimension_numbers = #tpu.dot_dimension_numbers<[1], [0], [0], [1], [0, 0, 1, 1], [], []>} : vector<8x32xf32>, vector<32x64xf32>, vector<8x64xf32> -> vector<8x64xf32>
    %105 = arith.addf %98, %104 : vector<8x64xf32>
    %c20 = arith.constant 20 : index
    %c0_94 = arith.constant 0 : index
    %106 = tpu.strided_load %arg14[%c20, %c0_94] {strides = array<i32: 32, 1>} : memref<256x32xf32, #tpu.memory_space<vmem>>, vector<8x32xf32>
    %c21 = arith.constant 21 : index
    %c0_95 = arith.constant 0 : index
    %107 = tpu.strided_load %arg14[%c21, %c0_95] {strides = array<i32: 32, 1>} : memref<256x32xf32, #tpu.memory_space<vmem>>, vector<8x32xf32>
    %108 = arith.maximumf %106, %107 : vector<8x32xf32>
    %c10_96 = arith.constant 10 : index
    %c0_97 = arith.constant 0 : index
    %c0_98 = arith.constant 0 : index
    %109 = vector.load %arg8[%c10_96, %c0_97, %c0_98] : memref<16x32x64xf32, #tpu.memory_space<vmem>>, vector<1x32x64xf32>
    %110 = vector.shape_cast %109 : vector<1x32x64xf32> to vector<32x64xf32>
    %cst_99 = arith.constant dense<0.000000e+00> : vector<8x64xf32>
    %111 = tpu.matmul %108, %110, %cst_99 {dimension_numbers = #tpu.dot_dimension_numbers<[1], [0], [0], [1], [0, 0, 1, 1], [], []>} : vector<8x32xf32>, vector<32x64xf32>, vector<8x64xf32> -> vector<8x64xf32>
    %112 = arith.addf %105, %111 : vector<8x64xf32>
    %c22 = arith.constant 22 : index
    %c0_100 = arith.constant 0 : index
    %113 = tpu.strided_load %arg14[%c22, %c0_100] {strides = array<i32: 32, 1>} : memref<256x32xf32, #tpu.memory_space<vmem>>, vector<8x32xf32>
    %c23 = arith.constant 23 : index
    %c0_101 = arith.constant 0 : index
    %114 = tpu.strided_load %arg14[%c23, %c0_101] {strides = array<i32: 32, 1>} : memref<256x32xf32, #tpu.memory_space<vmem>>, vector<8x32xf32>
    %115 = arith.maximumf %113, %114 : vector<8x32xf32>
    %c11_102 = arith.constant 11 : index
    %c0_103 = arith.constant 0 : index
    %c0_104 = arith.constant 0 : index
    %116 = vector.load %arg8[%c11_102, %c0_103, %c0_104] : memref<16x32x64xf32, #tpu.memory_space<vmem>>, vector<1x32x64xf32>
    %117 = vector.shape_cast %116 : vector<1x32x64xf32> to vector<32x64xf32>
    %cst_105 = arith.constant dense<0.000000e+00> : vector<8x64xf32>
    %118 = tpu.matmul %115, %117, %cst_105 {dimension_numbers = #tpu.dot_dimension_numbers<[1], [0], [0], [1], [0, 0, 1, 1], [], []>} : vector<8x32xf32>, vector<32x64xf32>, vector<8x64xf32> -> vector<8x64xf32>
    %119 = arith.addf %112, %118 : vector<8x64xf32>
    %c24 = arith.constant 24 : index
    %c0_106 = arith.constant 0 : index
    %120 = tpu.strided_load %arg14[%c24, %c0_106] {strides = array<i32: 32, 1>} : memref<256x32xf32, #tpu.memory_space<vmem>>, vector<8x32xf32>
    %c25 = arith.constant 25 : index
    %c0_107 = arith.constant 0 : index
    %121 = tpu.strided_load %arg14[%c25, %c0_107] {strides = array<i32: 32, 1>} : memref<256x32xf32, #tpu.memory_space<vmem>>, vector<8x32xf32>
    %122 = arith.maximumf %120, %121 : vector<8x32xf32>
    %c12_108 = arith.constant 12 : index
    %c0_109 = arith.constant 0 : index
    %c0_110 = arith.constant 0 : index
    %123 = vector.load %arg8[%c12_108, %c0_109, %c0_110] : memref<16x32x64xf32, #tpu.memory_space<vmem>>, vector<1x32x64xf32>
    %124 = vector.shape_cast %123 : vector<1x32x64xf32> to vector<32x64xf32>
    %cst_111 = arith.constant dense<0.000000e+00> : vector<8x64xf32>
    %125 = tpu.matmul %122, %124, %cst_111 {dimension_numbers = #tpu.dot_dimension_numbers<[1], [0], [0], [1], [0, 0, 1, 1], [], []>} : vector<8x32xf32>, vector<32x64xf32>, vector<8x64xf32> -> vector<8x64xf32>
    %126 = arith.addf %119, %125 : vector<8x64xf32>
    %c26 = arith.constant 26 : index
    %c0_112 = arith.constant 0 : index
    %127 = tpu.strided_load %arg14[%c26, %c0_112] {strides = array<i32: 32, 1>} : memref<256x32xf32, #tpu.memory_space<vmem>>, vector<8x32xf32>
    %c27 = arith.constant 27 : index
    %c0_113 = arith.constant 0 : index
    %128 = tpu.strided_load %arg14[%c27, %c0_113] {strides = array<i32: 32, 1>} : memref<256x32xf32, #tpu.memory_space<vmem>>, vector<8x32xf32>
    %129 = arith.maximumf %127, %128 : vector<8x32xf32>
    %c13_114 = arith.constant 13 : index
    %c0_115 = arith.constant 0 : index
    %c0_116 = arith.constant 0 : index
    %130 = vector.load %arg8[%c13_114, %c0_115, %c0_116] : memref<16x32x64xf32, #tpu.memory_space<vmem>>, vector<1x32x64xf32>
    %131 = vector.shape_cast %130 : vector<1x32x64xf32> to vector<32x64xf32>
    %cst_117 = arith.constant dense<0.000000e+00> : vector<8x64xf32>
    %132 = tpu.matmul %129, %131, %cst_117 {dimension_numbers = #tpu.dot_dimension_numbers<[1], [0], [0], [1], [0, 0, 1, 1], [], []>} : vector<8x32xf32>, vector<32x64xf32>, vector<8x64xf32> -> vector<8x64xf32>
    %133 = arith.addf %126, %132 : vector<8x64xf32>
    %c28 = arith.constant 28 : index
    %c0_118 = arith.constant 0 : index
    %134 = tpu.strided_load %arg14[%c28, %c0_118] {strides = array<i32: 32, 1>} : memref<256x32xf32, #tpu.memory_space<vmem>>, vector<8x32xf32>
    %c29 = arith.constant 29 : index
    %c0_119 = arith.constant 0 : index
    %135 = tpu.strided_load %arg14[%c29, %c0_119] {strides = array<i32: 32, 1>} : memref<256x32xf32, #tpu.memory_space<vmem>>, vector<8x32xf32>
    %136 = arith.maximumf %134, %135 : vector<8x32xf32>
    %c14_120 = arith.constant 14 : index
    %c0_121 = arith.constant 0 : index
    %c0_122 = arith.constant 0 : index
    %137 = vector.load %arg8[%c14_120, %c0_121, %c0_122] : memref<16x32x64xf32, #tpu.memory_space<vmem>>, vector<1x32x64xf32>
    %138 = vector.shape_cast %137 : vector<1x32x64xf32> to vector<32x64xf32>
    %cst_123 = arith.constant dense<0.000000e+00> : vector<8x64xf32>
    %139 = tpu.matmul %136, %138, %cst_123 {dimension_numbers = #tpu.dot_dimension_numbers<[1], [0], [0], [1], [0, 0, 1, 1], [], []>} : vector<8x32xf32>, vector<32x64xf32>, vector<8x64xf32> -> vector<8x64xf32>
    %140 = arith.addf %133, %139 : vector<8x64xf32>
    %c30 = arith.constant 30 : index
    %c0_124 = arith.constant 0 : index
    %141 = tpu.strided_load %arg14[%c30, %c0_124] {strides = array<i32: 32, 1>} : memref<256x32xf32, #tpu.memory_space<vmem>>, vector<8x32xf32>
    %c31 = arith.constant 31 : index
    %c0_125 = arith.constant 0 : index
    %142 = tpu.strided_load %arg14[%c31, %c0_125] {strides = array<i32: 32, 1>} : memref<256x32xf32, #tpu.memory_space<vmem>>, vector<8x32xf32>
    %143 = arith.maximumf %141, %142 : vector<8x32xf32>
    %c15_126 = arith.constant 15 : index
    %c0_127 = arith.constant 0 : index
    %c0_128 = arith.constant 0 : index
    %144 = vector.load %arg8[%c15_126, %c0_127, %c0_128] : memref<16x32x64xf32, #tpu.memory_space<vmem>>, vector<1x32x64xf32>
    %145 = vector.shape_cast %144 : vector<1x32x64xf32> to vector<32x64xf32>
    %cst_129 = arith.constant dense<0.000000e+00> : vector<8x64xf32>
    %146 = tpu.matmul %143, %145, %cst_129 {dimension_numbers = #tpu.dot_dimension_numbers<[1], [0], [0], [1], [0, 0, 1, 1], [], []>} : vector<8x32xf32>, vector<32x64xf32>, vector<8x64xf32> -> vector<8x64xf32>
    %147 = arith.addf %140, %146 : vector<8x64xf32>
    %c0_130 = arith.constant 0 : index
    %c0_131 = arith.constant 0 : index
    %148 = vector.load %arg9[%c0_130, %c0_131] : memref<1x64xf32, #tpu.memory_space<vmem>>, vector<1x64xf32>
    %149 = vector.broadcast %148 : vector<1x64xf32> to vector<8x64xf32>
    %150 = arith.addf %147, %149 : vector<8x64xf32>
    %cst_132 = arith.constant 0.000000e+00 : f32
    %151 = vector.broadcast %cst_132 : f32 to vector<8x64xf32>
    %152 = arith.maximumf %150, %151 : vector<8x64xf32>
    %c0_133 = arith.constant 0 : index
    %c0_134 = arith.constant 0 : index
    %153 = vector.load %arg10[%c0_133, %c0_134] : memref<64x128xf32, #tpu.memory_space<vmem>>, vector<64x128xf32>
    %cst_135 = arith.constant dense<0.000000e+00> : vector<8x128xf32>
    %154 = tpu.matmul %152, %153, %cst_135 {dimension_numbers = #tpu.dot_dimension_numbers<[1], [0], [0], [1], [0, 0, 1, 1], [], []>} : vector<8x64xf32>, vector<64x128xf32>, vector<8x128xf32> -> vector<8x128xf32>
    %c0_136 = arith.constant 0 : index
    %c0_137 = arith.constant 0 : index
    %155 = vector.load %arg11[%c0_136, %c0_137] : memref<1x128xf32, #tpu.memory_space<vmem>>, vector<1x128xf32>
    %156 = vector.broadcast %155 : vector<1x128xf32> to vector<8x128xf32>
    %157 = arith.addf %154, %156 : vector<8x128xf32>
    %c0_138 = arith.constant 0 : index
    %c0_139 = arith.constant 0 : index
    %158 = vector.load %arg12[%c0_138, %c0_139] : memref<8x128xf32, #tpu.memory_space<vmem>>, vector<8x128xf32>
    tpu.vector_store %arg12[%c0_138, %c0_139], %157 {strides = array<i32>} : memref<8x128xf32, #tpu.memory_space<vmem>>, vector<8x128xf32>,
    return
  }
  func.func @transform_0(%arg0: i32) -> (i32, i32) {
    %c0_i32 = arith.constant 0 : i32
    %c0_i32_0 = arith.constant 0 : i32
    return %arg0, %c0_i32 : i32, i32
  }
  func.func @transform_1(%arg0: i32) -> (i32, i32) {
    %c0_i32 = arith.constant 0 : i32
    %c0_i32_0 = arith.constant 0 : i32
    %c0_i32_1 = arith.constant 0 : i32
    return %c0_i32, %c0_i32_0 : i32, i32
  }
  func.func @transform_2(%arg0: i32) -> (i32, i32) {
    %c0_i32 = arith.constant 0 : i32
    %c0_i32_0 = arith.constant 0 : i32
    %c0_i32_1 = arith.constant 0 : i32
    return %c0_i32, %c0_i32_0 : i32, i32
  }
  func.func @transform_3(%arg0: i32) -> (i32, i32, i32) {
    %c0_i32 = arith.constant 0 : i32
    %c0_i32_0 = arith.constant 0 : i32
    %c0_i32_1 = arith.constant 0 : i32
    %c0_i32_2 = arith.constant 0 : i32
    return %c0_i32, %c0_i32_0, %c0_i32_1 : i32, i32, i32
  }
  func.func @transform_4(%arg0: i32) -> (i32, i32) {
    %c0_i32 = arith.constant 0 : i32
    %c0_i32_0 = arith.constant 0 : i32
    %c0_i32_1 = arith.constant 0 : i32
    return %c0_i32, %c0_i32_0 : i32, i32
  }
  func.func @transform_5(%arg0: i32) -> (i32, i32) {
    %c0_i32 = arith.constant 0 : i32
    %c0_i32_0 = arith.constant 0 : i32
    %c0_i32_1 = arith.constant 0 : i32
    return %c0_i32, %c0_i32_0 : i32, i32
  }
  func.func @transform_6(%arg0: i32) -> (i32, i32) {
    %c0_i32 = arith.constant 0 : i32
    %c0_i32_0 = arith.constant 0 : i32
    %c0_i32_1 = arith.constant 0 : i32
    return %c0_i32, %c0_i32_0 : i32, i32
  }
  func.func @transform_7(%arg0: i32) -> (i32, i32, i32) {
    %c0_i32 = arith.constant 0 : i32
    %c0_i32_0 = arith.constant 0 : i32
    %c0_i32_1 = arith.constant 0 : i32
    %c0_i32_2 = arith.constant 0 : i32
    return %c0_i32, %c0_i32_0, %c0_i32_1 : i32, i32, i32
  }
  func.func @transform_8(%arg0: i32) -> (i32, i32) {
    %c0_i32 = arith.constant 0 : i32
    %c0_i32_0 = arith.constant 0 : i32
    %c0_i32_1 = arith.constant 0 : i32
    return %c0_i32, %c0_i32_0 : i32, i32
  }
  func.func @transform_9(%arg0: i32) -> (i32, i32) {
    %c0_i32 = arith.constant 0 : i32
    %c0_i32_0 = arith.constant 0 : i32
    %c0_i32_1 = arith.constant 0 : i32
    return %c0_i32, %c0_i32_0 : i32, i32
  }
  func.func @transform_10(%arg0: i32) -> (i32, i32) {
    %c0_i32 = arith.constant 0 : i32
    %c0_i32_0 = arith.constant 0 : i32
    %c0_i32_1 = arith.constant 0 : i32
    return %c0_i32, %c0_i32_0 : i32, i32
  }
  func.func @transform_11(%arg0: i32) -> (i32, i32) {
    %c0_i32 = arith.constant 0 : i32
    %c0_i32_0 = arith.constant 0 : i32
    return %arg0, %c0_i32 : i32, i32
  }
}

</mosaic_0001>

<bundles_post_ra>
// kernel: cnn_forward.1
= control target key start
LH: loop header
LB: loop body
LE: loop exit
PB: predicated region body
PF: predicated region fallthrough
CT: control target
= control target key end

     0   :  { %vm301_vm0 = vcmask 1043456   ;;  %v3453_v0 = vmov 0   ;;  %vm108_vm1 = vcmask 97280   ;;  %vm578_vm2 = vcmask 261120   ;;  %s5440_s5 = inlined_call_operand.vmem [shape: f32[256,1], index: 5, kind: input, shape index: {}]   ;;  %s5441_s1 = inlined_call_operand.vmem [shape: f32[12,32], index: 1, kind: input, shape index: {}]   ;;  %s5442_s0 = inlined_call_operand.vmem [shape: f32[512,12], index: 0, kind: input, shape index: {}]   ;;  %s5443_s6 = inlined_call_operand.vmem [shape: f32[256,1], index: 6, kind: input, shape index: {}]   ;;  %s5444_s2 = inlined_call_operand.vmem [shape: f32[1,32], index: 2, kind: input, shape index: {}]   ;;  %s5445_s3 = inlined_call_operand.vmem [shape: f32[3,32,32], index: 3, kind: input, shape index: {}]   ;;  %s5446_s4 = inlined_call_operand.vmem [shape: f32[1,32], index: 4, kind: input, shape index: {}]   ;;  %s5447_s7 = inlined_call_operand.vmem [shape: f32[16,32,64], index: 7, kind: input, shape index: {}]   ;;  %s5448_s8 = inlined_call_operand.vmem [shape: f32[1,64], index: 8, kind: input, shape index: {}]   ;;  %s5449_s10 = inlined_call_operand.vmem [shape: f32[1,128], index: 10, kind: input, shape index: {}]   ;;  %s5450_s9 = inlined_call_operand.vmem [shape: f32[64,128], index: 9, kind: input, shape index: {}]   ;;  %s5451_s11 = inlined_call_operand.vmem [shape: f32[8,128], index: 11, kind: output, shape index: {}]  }
   0x1   :  { %3443 = vset.pattern.permute.xlu0 %v3453_v0  ;;  %v869_v1 = vld [vmem:[%s5440_s5] sm:$0xff]  ;;  %v103_v2 = vld [vmem:[%s5441_s1 + $0x8] sm:$0xf]  ;;  %3444 = vset.pattern.permute.xlu1 %v3453_v0  ;;  %v871_v9 = vld [vmem:[%s5440_s5 + $0x10] sm:$0xff]  ;;  %vm3161_vm5 = vcmask 523264  }
   0x2   :  { %v102_v3 = vld [vmem:[%s5441_s1] sm:$0xff]  ;;  %903 = vperm.xlu0 %3443, %v869_v1   ;;  %3190 = vmatpush.msk.msra.mxu0 %vm301_vm0, %v103_v2  ;;  %v870_v5 = vld [vmem:[%s5440_s5 + $0x8] sm:$0xff]  ;;  %v1160_v12 = vld [vmem:[%s5443_s6 + $0x10] sm:$0xff] }
   0x3   :  { %v38_v4 = vld [vmem:[%s5442_s0] sm:$0xff]  ;;  %3438 = vmatpush.msk.msra.mxu3 %vm301_vm0, %v103_v2  ;;  %908 = vperm.xlu1 %3444, %v870_v5   ;;  %v1159_v8 = vld [vmem:[%s5443_s6 + $0x8] sm:$0xff]  ;;  %v872_v13 = vld [vmem:[%s5440_s5 + $0x18] sm:$0xff] }
   0x4   :  { %v94_v6 = vld [vmem:[%s5442_s0 + $0x1c0] sm:$0xff]  ;;  %320 = vmatpush.msra.mxu0 %v102_v3  ;;  %3445 = vset.pattern.permute.xlu2 %v3453_v0  ;;  %v39_v10 = vld [vmem:[%s5442_s0 + $0x8] sm:$0xff]  ;;  %v1161_v14 = vld [vmem:[%s5443_s6 + $0x18] sm:$0xff] }
   0x5   :  { %3441 = vmatpush.msra.mxu3 %v102_v3  ;;  %3191 = vmatmul.msk.f32.vlgmr.msra.gmra.mxu0 %vm108_vm1, %v38_v4  ;;  %v1158_v7 = vld [vmem:[%s5443_s6] sm:$0xff]  ;;  %v95_v11 = vld [vmem:[%s5442_s0 + $0x1c8] sm:$0xff]  ;;  %v40_v15 = vld [vmem:[%s5442_s0 + $0x10] sm:$0xff] }
   0x6   :  { %3247 = vmatmul.msk.f32.vlgmr.msra.gmra.mxu3 %vm108_vm1, %v94_v6  ;;  %3436 = vmatpush.msk.msra.mxu1 %vm301_vm0, %v103_v2  ;;  %v96_v16 = vld [vmem:[%s5442_s0 + $0x1d0] sm:$0xff]  ;;  %v873_v17 = vld [vmem:[%s5440_s5 + $0x20] sm:$0xff]  ;;  %v874_v19 = vld [vmem:[%s5440_s5 + $0x28] sm:$0xff] }
   0x7   :  { %3437 = vmatpush.msk.msra.mxu2 %vm301_vm0, %v103_v2  ;;  %913 = vperm.xlu2 %3445, %v871_v9   ;;  %v1162_v18 = vld [vmem:[%s5443_s6 + $0x20] sm:$0xff]  ;;  %v41_v20 = vld [vmem:[%s5442_s0 + $0x18] sm:$0xff]  ;;  %v1163_v22 = vld [vmem:[%s5443_s6 + $0x28] sm:$0xff] }
   0x8   :  { %3439 = vmatpush.msra.mxu1 %v102_v3  ;;  %v97_v21 = vld [vmem:[%s5442_s0 + $0x1d8] sm:$0xff]  ;;  %v875_v23 = vld [vmem:[%s5440_s5 + $0x30] sm:$0xff]  ;;  %v42_v25 = vld [vmem:[%s5442_s0 + $0x20] sm:$0xff] }
   0x9   :  { %3440 = vmatpush.msra.mxu2 %v102_v3  ;;  %v1164_v24 = vld [vmem:[%s5443_s6 + $0x30] sm:$0xff]  ;;  %v98_v26 = vld [vmem:[%s5442_s0 + $0x1e0] sm:$0xff]  ;;  %v876_v27 = vld [vmem:[%s5440_s5 + $0x38] sm:$0xff] }
   0xa   :  { %1192 = vperm.xlu0 %3443, %v1158_v7   ;;  %v1165_v28 = vld [vmem:[%s5443_s6 + $0x38] sm:$0xff]  ;;  %v877_v29 = vld [vmem:[%s5440_s5 + $0x40] sm:$0xff]  ;;  %v43_v30 = vld [vmem:[%s5442_s0 + $0x28] sm:$0xff] }
   0xb   :  { %1197 = vperm.xlu1 %3444, %v1159_v8   ;;  %v99_v31 = vld [vmem:[%s5442_s0 + $0x1e8] sm:$0xff]  ;;  %v1166_v32 = vld [vmem:[%s5443_s6 + $0x40] sm:$0xff]  ;;  %v44_v35 = vld [vmem:[%s5442_s0 + $0x30] sm:$0xff] }
   0xc   :  { %v878_v33 = vld [vmem:[%s5440_s5 + $0x48] sm:$0xff]  ;;  %v100_v36 = vld [vmem:[%s5442_s0 + $0x1f0] sm:$0xff]  ;;  %v880_v39 = vld [vmem:[%s5440_s5 + $0x58] sm:$0xff] }
   0xd   :  { %3192 = vmatmul.msk.f32.gmra.mxu0 %vm108_vm1, %v39_v10  ;;  %v1167_v34 = vld [vmem:[%s5443_s6 + $0x48] sm:$0xff]  ;;  %v879_v37 = vld [vmem:[%s5440_s5 + $0x50] sm:$0xff]  ;;  %v45_v40 = vld [vmem:[%s5442_s0 + $0x38] sm:$0xff] }
   0xe   :  { %3248 = vmatmul.msk.f32.gmra.mxu3 %vm108_vm1, %v95_v11  ;;  %v1168_v38 = vld [vmem:[%s5443_s6 + $0x50] sm:$0xff]  ;;  %v101_v41 = vld [vmem:[%s5442_s0 + $0x1f8] sm:$0xff]  ;;  %v83_v42 = vld [vmem:[%s5442_s0 + $0x168] sm:$0xff] }
   0xf   :  { %1202 = vperm.xlu2 %3445, %v1160_v12   ;;  %v1169_v43 = vld [vmem:[%s5443_s6 + $0x58] sm:$0xff]  ;;  %3236 = vmatmul.msk.f32.vlgmr.msra.gmra.mxu1 %vm108_vm1, %v83_v42  ;;  %v881_v44 = vld [vmem:[%s5440_s5 + $0x60] sm:$0xff]  ;;  %v882_v48 = vld [vmem:[%s5440_s5 + $0x68] sm:$0xff] }
  0x10   :  { %v1170_v45 = vld [vmem:[%s5443_s6 + $0x60] sm:$0xff]  ;;  %v84_v49 = vld [vmem:[%s5442_s0 + $0x170] sm:$0xff]  ;;  %v1171_v50 = vld [vmem:[%s5443_s6 + $0x68] sm:$0xff] }
  0x11   :  { %v46_v46 = vld [vmem:[%s5442_s0 + $0x40] sm:$0xff]  ;;  %v883_v51 = vld [vmem:[%s5440_s5 + $0x70] sm:$0xff]  ;;  %v47_v52 = vld [vmem:[%s5442_s0 + $0x48] sm:$0xff] }
  0x12   :  { %918 = vperm.xlu0 %3443, %v872_v13   ;;  %v90_v47 = vld [vmem:[%s5442_s0 + $0x1a0] sm:$0xff]  ;;  %v91_v53 = vld [vmem:[%s5442_s0 + $0x1a8] sm:$0xff]  ;;  %v1172_v54 = vld [vmem:[%s5443_s6 + $0x70] sm:$0xff] }
  0x13   :  { %1207 = vperm.xlu1 %3444, %v1161_v14   ;;  %3243 = vmatmul.msk.f32.vlgmr.msra.gmra.mxu2 %vm108_vm1, %v90_v47  ;;  %v85_v55 = vld [vmem:[%s5442_s0 + $0x178] sm:$0xff]  ;;  %v48_v58 = vld [vmem:[%s5442_s0 + $0x50] sm:$0xff]  ;;  %v885_v60 = vld [vmem:[%s5440_s5 + $0x80] sm:$0xff] }
  0x14   :  { %v884_v56 = vld [vmem:[%s5440_s5 + $0x78] sm:$0xff]  ;;  %v92_v59 = vld [vmem:[%s5442_s0 + $0x1b0] sm:$0xff]  ;;  %v86_v61 = vld [vmem:[%s5442_s0 + $0x180] sm:$0xff] }
  0x15   :  { %3193 = vmatmul.msk.f32.gmra.mxu0 %vm108_vm1, %v40_v15  ;;  %v1173_v57 = vld [vmem:[%s5443_s6 + $0x78] sm:$0xff]  ;;  %v1174_v62 = vld [vmem:[%s5443_s6 + $0x80] sm:$0xff]  ;;  %v886_v63 = vld [vmem:[%s5440_s5 + $0x88] sm:$0xff] }
  0x16   :  { %3249 = vmatmul.msk.f32.gmra.mxu3 %vm108_vm1, %v96_v16  ;;  %v49_v0 = vld [vmem:[%s5442_s0 + $0x58] sm:$0xff]  ;;  %v1175_v2 = vld [vmem:[%s5443_s6 + $0x88] sm:$0xff]  ;;  %v887_v4 = vld [vmem:[%s5440_s5 + $0x90] sm:$0xff] }
  0x17   :  { %923 = vperm.xlu2 %3445, %v873_v17   ;;  %3237 = vmatmul.msk.f32.gmra.mxu1 %vm108_vm1, %v84_v49  ;;  %v93_v1 = vld [vmem:[%s5442_s0 + $0x1b8] sm:$0xff]  ;;  %v87_v3 = vld [vmem:[%s5442_s0 + $0x188] sm:$0xff]  ;;  %v1176_v5 = vld [vmem:[%s5443_s6 + $0x90] sm:$0xff] }
  0x18   :  { %v50_v6 = vld [vmem:[%s5442_s0 + $0x60] sm:$0xff]  ;;  %v1177_v7 = vld [vmem:[%s5443_s6 + $0x98] sm:$0xff]  ;;  %v88_v10 = vld [vmem:[%s5442_s0 + $0x190] sm:$0xff] }
  0x19   :  { %v888_v8 = vld [vmem:[%s5440_s5 + $0x98] sm:$0xff]  ;;  %v889_v9 = vld [vmem:[%s5440_s5 + $0xa0] sm:$0xff]  ;;  %v51_v11 = vld [vmem:[%s5442_s0 + $0x68] sm:$0xff] }
  0x1a   :  { %1212 = vperm.xlu0 %3443, %v1162_v18   ;;  %v890_v12 = vld [vmem:[%s5440_s5 + $0xa8] sm:$0xff]  ;;  %v1178_v13 = vld [vmem:[%s5443_s6 + $0xa0] sm:$0xff]  ;;  %v89_v15 = vld [vmem:[%s5442_s0 + $0x198] sm:$0xff] }
  0x1b   :  { %928 = vperm.xlu1 %3444, %v874_v19   ;;  %3244 = vmatmul.msk.f32.gmra.mxu2 %vm108_vm1, %v91_v53  ;;  %v1179_v14 = vld [vmem:[%s5443_s6 + $0xa8] sm:$0xff]  ;;  %v52_v16 = vld [vmem:[%s5442_s0 + $0x70] sm:$0xff]  ;;  %v3258_v17 = vld [vmem:[%s5445_s3 + $0x38] sm:$0xff] }
  0x1c   :  { %1499 = vmatpush.msrb.mxu1 %v3258_v17  ;;  %v3257_v18 = vld [vmem:[%s5445_s3 + $0x30] sm:$0xff]  ;;  %v3256_v19 = vld [vmem:[%s5445_s3 + $0x28] sm:$0xff]  ;;  %v896_v47 = vld [vmem:[%s5440_s5 + $0xd8] sm:$0xff] }
  0x1d   :  { %3194 = vmatmul.msk.f32.gmra.mxu0 %vm108_vm1, %v41_v20  ;;  %v1180_v20 = vld [vmem:[%s5443_s6 + $0xb0] sm:$0xff]  ;;  %v1185_v49 = vld [vmem:[%s5443_s6 + $0xd8] sm:$0xff] }
  0x1e   :  { %3250 = vmatmul.msk.f32.gmra.mxu3 %vm108_vm1, %v97_v21  ;;  %1500 = vmatpush.msrb.mxu1 %v3257_v18  ;;  %v891_v21 = vld [vmem:[%s5440_s5 + $0xb0] sm:$0xff] }
  0x1f   :  { %1217 = vperm.xlu2 %3445, %v1163_v22   ;;  %3238 = vmatmul.msk.f32.gmra.mxu1 %vm108_vm1, %v85_v55  ;;  %v892_v22 = vld [vmem:[%s5440_s5 + $0xb8] sm:$0xff]  ;;  %v56_v53 = vld [vmem:[%s5442_s0 + $0x90] sm:$0xff] }
  0x20   :  { %1501 = vmatpush.msrb.mxu1 %v3256_v19 }
  0x22   :  { %933 = vperm.xlu0 %3443, %v875_v23   ;;  %v3255_v23 = vld [vmem:[%s5445_s3 + $0x20] sm:$0xff] }
  0x23   :  { %1222 = vperm.xlu1 %3444, %v1164_v24   ;;  %3245 = vmatmul.msk.f32.gmra.mxu2 %vm108_vm1, %v92_v59  ;;  %v53_v24 = vld [vmem:[%s5442_s0 + $0x78] sm:$0xff] }
  0x24   :  { %1502 = vmatpush.msrb.mxu1 %v3255_v23 }
  0x25   :  { %3195 = vmatmul.msk.f32.gmra.mxu0 %vm108_vm1, %v42_v25  ;;  %v893_v25 = vld [vmem:[%s5440_s5 + $0xc0] sm:$0xff] }
  0x26   :  { %3251 = vmatmul.msk.f32.gmra.mxu3 %vm108_vm1, %v98_v26  ;;  %v3823_v26 = vld [vmem:[%s5444_s2] ss:$0 sm:$0xff] }
  0x27   :  { %938 = vperm.xlu2 %3445, %v876_v27   ;;  %3239 = vmatmul.msk.f32.gmra.mxu1 %vm108_vm1, %v86_v61  ;;  %v1181_v27 = vld [vmem:[%s5443_s6 + $0xb8] sm:$0xff]  ;;  %v897_v61 = vld [vmem:[%s5440_s5 + $0xe0] sm:$0xff] }
  0x2a   :  { %1227 = vperm.xlu0 %3443, %v1165_v28   ;;  %v1182_v28 = vld [vmem:[%s5443_s6 + $0xc0] sm:$0xff] }
  0x2b   :  { %943 = vperm.xlu1 %3444, %v877_v29   ;;  %3246 = vmatmul.msk.f32.gmra.mxu2 %vm108_vm1, %v93_v1 }
  0x2d   :  { %3196 = vmatmul.msk.f32.gmra.mxu0 %vm108_vm1, %v43_v30  ;;  %v54_v30 = vld [vmem:[%s5442_s0 + $0x80] sm:$0xff] }
  0x2e   :  { %3252 = vmatmul.msk.f32.gmra.mxu3 %vm108_vm1, %v99_v31 }
  0x2f   :  { %1232 = vperm.xlu2 %3445, %v1166_v32   ;;  %3240 = vmatmul.msk.f32.gmra.mxu1 %vm108_vm1, %v87_v3 }
  0x32   :  { %948 = vperm.xlu0 %3443, %v878_v33   ;;  %v1183_v33 = vld [vmem:[%s5443_s6 + $0xc8] sm:$0xff] }
  0x33   :  { %1237 = vperm.xlu1 %3444, %v1167_v34   ;;  %v894_v34 = vld [vmem:[%s5440_s5 + $0xc8] sm:$0xff] }
  0x35   :  { %3197 = vmatmul.msk.f32.gmra.mxu0 %vm108_vm1, %v44_v35  ;;  %v3326_v35 = vld [vmem:[%s5445_s3 + $0x58] sm:$0xff] }
  0x36   :  { %3253 = vmatmul.msk.f32.gmra.mxu3 %vm108_vm1, %v100_v36  ;;  %v895_v36 = vld [vmem:[%s5440_s5 + $0xd0] sm:$0xff] }
  0x37   :  { %953 = vperm.xlu2 %3445, %v879_v37   ;;  %3241 = vmatmul.msk.f32.gmra.mxu1 %vm108_vm1, %v88_v10 }
  0x38   :  { %1922 = vmatpush.msrb.mxu3 %v3326_v35 }
  0x3a   :  { %1242 = vperm.xlu0 %3443, %v1168_v38   ;;  %v3325_v38 = vld [vmem:[%s5445_s3 + $0x50] sm:$0xff] }
  0x3b   :  { %958 = vperm.xlu1 %3444, %v880_v39   ;;  %1923 = vmatpush.msrb.mxu3 %v3325_v38  ;;  %v1383_v38 = vld [vmem:[%s5445_s3 + $0x8] sm:$0xff] }
  0x3d   :  { %3198 = vmatmul.msk.f32.gmra.mxu0 %vm108_vm1, %v45_v40 }
  0x3e   :  { %3254 = vmatmul.msk.f32.gmra.mxu3 %vm108_vm1, %v101_v41  ;;  %v55_v41 = vld [vmem:[%s5442_s0 + $0x88] sm:$0xff] }
  0x3f   :  { %1247 = vperm.xlu2 %3445, %v1169_v43   ;;  %3242 = vmatmul.msk.f32.gmra.mxu1 %vm108_vm1, %v89_v15  ;;  %v3324_v43 = vld [vmem:[%s5445_s3 + $0x48] sm:$0xff] }
  0x40   :  { %1924 = vmatpush.msrb.mxu3 %v3324_v43  ;;  %v60_v43 = vld [vmem:[%s5442_s0 + $0xb0] sm:$0xff] }
  0x42   :  { %963 = vperm.xlu0 %3443, %v881_v44  }
  0x43   :  { %1252 = vperm.xlu1 %3444, %v1170_v45  }
  0x45   :  { %3199 = vmatmul.msk.f32.gmra.mxu0 %vm108_vm1, %v46_v46  ;;  %v3323_v46 = vld [vmem:[%s5445_s3 + $0x40] sm:$0xff] }
  0x46   :  { %1925 = vmatpush.msrb.mxu3 %v3323_v46 }
  0x47   :  { %968 = vperm.xlu2 %3445, %v882_v48   ;;  %v1184_v48 = vld [vmem:[%s5443_s6 + $0xd0] sm:$0xff] }
  0x4a   :  { %1257 = vperm.xlu0 %3443, %v1171_v50  }
  0x4b   :  { %973 = vperm.xlu1 %3444, %v883_v51  }
  0x4d   :  { %3200 = vmatmul.msk.f32.gmra.mxu0 %vm108_vm1, %v47_v52 }
  0x4f   :  { %1262 = vperm.xlu2 %3445, %v1172_v54  }
  0x52   :  { %978 = vperm.xlu0 %3443, %v884_v56  }
  0x53   :  { %1267 = vperm.xlu1 %3444, %v1173_v57  }
  0x55   :  { %3201 = vmatmul.msk.f32.gmra.mxu0 %vm108_vm1, %v48_v58 }
  0x57   :  { %983 = vperm.xlu2 %3445, %v885_v60   ;;  %v1186_v60 = vld [vmem:[%s5443_s6 + $0xe0] sm:$0xff] }
  0x5a   :  { %1272 = vperm.xlu0 %3443, %v1174_v62   ;;  %v898_v62 = vld [vmem:[%s5440_s5 + $0xe8] sm:$0xff] }
  0x5b   :  { %988 = vperm.xlu1 %3444, %v886_v63  }
  0x5d   :  { %3202 = vmatmul.msk.f32.gmra.mxu0 %vm108_vm1, %v49_v0 }
  0x5f   :  { %1277 = vperm.xlu2 %3445, %v1175_v2   ;;  %v57_v2 = vld [vmem:[%s5442_s0 + $0x98] sm:$0xff] }
  0x62   :  { %993 = vperm.xlu0 %3443, %v887_v4  }
  0x63   :  { %1282 = vperm.xlu1 %3444, %v1176_v5  }
  0x65   :  { %3203 = vmatmul.msk.f32.gmra.mxu0 %vm108_vm1, %v50_v6  ;;  %v899_v6 = vld [vmem:[%s5440_s5 + $0xf0] sm:$0xff] }
  0x67   :  { %998 = vperm.xlu2 %3445, %v888_v8   ;;  %v1188_v8 = vld [vmem:[%s5443_s6 + $0xf0] sm:$0xff] }
  0x6a   :  { %1287 = vperm.xlu0 %3443, %v1177_v7   ;;  %v834_v7 = vlaneseq }
  0x6b   :  { %1003 = vperm.xlu1 %3444, %v889_v9  }
  0x6d   :  { %3204 = vmatmul.msk.f32.gmra.mxu0 %vm108_vm1, %v51_v11 }
  0x6f   :  { %1292 = vperm.xlu2 %3445, %v1178_v13   ;;  %v58_v13 = vld [vmem:[%s5442_s0 + $0xa0] sm:$0xff] }
  0x72   :  { %1008 = vperm.xlu0 %3443, %v890_v12  }
  0x73   :  { %1297 = vperm.xlu1 %3444, %v1179_v14  }
  0x74   :  { %v3910_v9 = vpop.permute.xlu0 %903 }
  0x75   :  { %3205 = vmatmul.msk.f32.gmra.mxu0 %vm108_vm1, %v52_v16  ;;  %v3917_v16 = vshrl.u32 %v834_v7, 7 }
  0x77   :  { %1013 = vperm.xlu2 %3445, %v891_v21   ;;  %v1189_v21 = vld [vmem:[%s5443_s6 + $0xf8] sm:$0xff]  ;;  %vm1125_vm3 = vcmp.lt.s32.totalorder %v3917_v16, 7  ;;  %vm836_vm4 = vcmp.lt.s32.totalorder %v3917_v16, 1 }
  0x7a   :  { %1302 = vperm.xlu0 %3443, %v1180_v20  }
  0x7b   :  { %1018 = vperm.xlu1 %3444, %v892_v22   ;;  %v1187_v22 = vld [vmem:[%s5443_s6 + $0xe8] sm:$0xff] }
  0x7d   :  { %3206 = vmatmul.msk.f32.gmra.mxu0 %vm108_vm1, %v53_v24 }
  0x7f   :  { %1307 = vperm.xlu2 %3445, %v1181_v27  }
  0x82   :  { %1023 = vperm.xlu0 %3443, %v893_v25   ;;  %v322_v29 = vpop.f32.mrf.mxu0 }
  0x83   :  { %v323_v31 = vadd.f32 %v3823_v26, %v322_v29  ;;  %1312 = vperm.xlu1 %3444, %v1182_v28   ;;  %v59_v29 = vld [vmem:[%s5442_s0 + $0xa8] sm:$0xff] }
  0x85   :  { %v514_v32 = vmax.f32 %v323_v31, 0.0  ;;  %3207 = vmatmul.msk.f32.gmra.mxu0 %vm108_vm1, %v54_v30  ;;  %v1193_v30 = vpop.permute.xlu0 %1192 }
  0x87   :  { %579 = vst.msk [vmem:[#allocation2] sm:$0xff] %vm578_vm2, %v514_v32  ;;  %1028 = vperm.xlu2 %3445, %v894_v34  }
  0x89   :  { %v490_v37 = vpop.f32.mrf.mxu3 }
  0x8a   :  { %v491_v39 = vadd.f32 %v3823_v26, %v490_v37  ;;  %1317 = vperm.xlu0 %3443, %v1183_v33   ;;  %v325_v40 = vpop.f32.mrf.mxu0  ;;  %v1384_v37 = vld [vmem:[%s5445_s3 + $0x10] sm:$0xff] }
  0x8b   :  { %v326_v42 = vadd.f32 %v3823_v26, %v325_v40  ;;  %1033 = vperm.xlu1 %3444, %v895_v36   ;;  %v1385_v36 = vld [vmem:[%s5445_s3 + $0x18] sm:$0xff] }
  0x8c   :  { %v570_v44 = vmax.f32 %v491_v39, 0.0  ;;  %1708 = vmatpush.msrb.mxu2 %v1385_v36  ;;  %v3957_v39 = vpop.permute.xlu1 %908 }
  0x8d   :  { %v515_v45 = vmax.f32 %v326_v42, 0.0  ;;  %3208 = vmatmul.msk.f32.gmra.mxu0 %vm108_vm1, %v55_v41 }
  0x8e   :  { %635 = vst.msk [vmem:[#allocation2 + $0x1c0] sm:$0xff] %vm578_vm2, %v570_v44  ;;  %1709 = vmatpush.msrb.mxu2 %v1384_v37 }
  0x8f   :  { %580 = vst.msk [vmem:[#allocation2 + $0x8] sm:$0xff] %vm578_vm2, %v515_v45  ;;  %1322 = vperm.xlu2 %3445, %v1184_v48   ;;  %v1382_v45 = vld [vmem:[%s5445_s3] sm:$0xff] }
  0x90   :  { %1710 = vmatpush.msrb.mxu2 %v1383_v38 }
  0x91   :  { %v493_v50 = vpop.f32.mrf.mxu3 }
  0x92   :  { %v494_v51 = vadd.f32 %v3823_v26, %v493_v50  ;;  %1038 = vperm.xlu0 %3443, %v896_v47   ;;  %v328_v52 = vpop.f32.mrf.mxu0  ;;  %1711 = vmatpush.msrb.mxu2 %v1382_v45 }
  0x93   :  { %v329_v54 = vadd.f32 %v3823_v26, %v328_v52  ;;  %1327 = vperm.xlu1 %3444, %v1185_v49  }
  0x94   :  { %v571_v55 = vmax.f32 %v494_v51, 0.0  ;;  %v900_v51 = vld [vmem:[%s5440_s5 + $0xf8] sm:$0xff] }
  0x95   :  { %v516_v56 = vmax.f32 %v329_v54, 0.0  ;;  %3209 = vmatmul.msk.f32.gmra.mxu0 %vm108_vm1, %v56_v53 }
  0x96   :  { %636 = vst.msk [vmem:[#allocation2 + $0x1c8] sm:$0xff] %vm578_vm2, %v571_v55  ;;  %v643_v57 = vld [vmem:[#allocation2] ss:$2 sm:$0xff]  ;;  %v707_v58 = vld [vmem:[#allocation2 + $0x1] ss:$2 sm:$0xff] }
  0x97   :  { %581 = vst.msk [vmem:[#allocation2 + $0x10] sm:$0xff] %vm578_vm2, %v516_v56  ;;  %v3883_v59 = vmax.f32 %v643_v57, %v707_v58  ;;  %1043 = vperm.xlu2 %3445, %v897_v61   ;;  %v61_v56 = vld [vmem:[%s5442_s0 + $0xb8] sm:$0xff]  ;;  %v1198_v57 = vpop.permute.xlu1 %1197 }
  0x99   :  { %v496_v63 = vpop.f32.mrf.mxu3  ;;  %3259 = vmatmul.msk.f32.vlgmr.msrb.gmra.mxu1 %vm578_vm2, %v3883_v59  ;;  %v1093_v23 = vrot.slane %v3883_v59, 1  ;;  %v802_v37 = vrot.slane %v3883_v59, 7  ;;  %v4492_v59 = vld [vmem:[%s5446_s4] ss:$0 sm:$0xff] }
  0x9a   :  { %v497_v0 = vadd.f32 %v3823_v26, %v496_v63  ;;  %1332 = vperm.xlu0 %3443, %v1186_v60   ;;  %v331_v1 = vpop.f32.mrf.mxu0 }
  0x9b   :  { %v332_v3 = vadd.f32 %v3823_v26, %v331_v1  ;;  %1048 = vperm.xlu1 %3444, %v898_v62  }
  0x9c   :  { %v572_v4 = vmax.f32 %v497_v0, 0.0  ;;  %v457_v0 = vpop.f32.mrf.mxu1 }
  0x9d   :  { %v517_v5 = vmax.f32 %v332_v3, 0.0  ;;  %3210 = vmatmul.msk.f32.gmra.mxu0 %vm108_vm1, %v57_v2  ;;  %v458_v1 = vadd.f32 %v3823_v26, %v457_v0  ;;  %v3990_v2 = vpop.permute.xlu2 %913 }
  0x9e   :  { %637 = vst.msk [vmem:[#allocation2 + $0x1d0] sm:$0xff] %vm578_vm2, %v572_v4 }
  0x9f   :  { %582 = vst.msk [vmem:[#allocation2 + $0x18] sm:$0xff] %vm578_vm2, %v517_v5  ;;  %1337 = vperm.xlu2 %3445, %v1187_v22   ;;  %v559_v7 = vmax.f32 %v458_v1, 0.0  ;;  %v63_v22 = vld [vmem:[%s5442_s0 + $0xc8] sm:$0xff]  ;;  %v1208_v0 = vpop.permute.xlu1 %1207 }
  0xa1   :  { %v499_v10 = vpop.f32.mrf.mxu3  ;;  %624 = vst.msk [vmem:[#allocation2 + $0x168] sm:$0xff] %vm578_vm2, %v559_v7 }
  0xa2   :  { %v500_v11 = vadd.f32 %v3823_v26, %v499_v10  ;;  %1053 = vperm.xlu0 %3443, %v899_v6   ;;  %v334_v12 = vpop.f32.mrf.mxu0  ;;  %v62_v6 = vld [vmem:[%s5442_s0 + $0xc0] sm:$0xff] }
  0xa3   :  { %v335_v14 = vadd.f32 %v3823_v26, %v334_v12  ;;  %1342 = vperm.xlu1 %3444, %v1188_v8  }
  0xa4   :  { %v573_v15 = vmax.f32 %v500_v11, 0.0 }
  0xa5   :  { %v518_v17 = vmax.f32 %v335_v14, 0.0  ;;  %3211 = vmatmul.msk.f32.gmra.mxu0 %vm108_vm1, %v58_v13 }
  0xa6   :  { %638 = vst.msk [vmem:[#allocation2 + $0x1d8] sm:$0xff] %vm578_vm2, %v573_v15  ;;  %v645_v18 = vld [vmem:[#allocation2 + $0x10] ss:$2 sm:$0xff]  ;;  %v709_v19 = vld [vmem:[#allocation2 + $0x11] ss:$2 sm:$0xff]  ;;  %v460_v15 = vpop.f32.mrf.mxu1 }
  0xa7   :  { %583 = vst.msk [vmem:[#allocation2 + $0x20] sm:$0xff] %vm578_vm2, %v518_v17  ;;  %v3922_v20 = vmax.f32 %v645_v18, %v709_v19  ;;  %1058 = vperm.xlu2 %3445, %v900_v51   ;;  %v461_v17 = vadd.f32 %v3823_v26, %v460_v15  ;;  %v478_v19 = vpop.f32.mrf.mxu2  ;;  %v66_v15 = vld [vmem:[%s5442_s0 + $0xe0] sm:$0xff] }
  0xa9   :  { %v502_v24 = vpop.f32.mrf.mxu3  ;;  %v1094_v25 = vrot.slane %v3922_v20, 1  ;;  %3260 = vmatmul.msk.f32.gmra.mxu1 %vm578_vm2, %v3922_v20 }
  0xaa   :  { %v503_v27 = vadd.f32 %v3823_v26, %v502_v24  ;;  %1347 = vperm.xlu0 %3443, %v1189_v21   ;;  %v337_v28 = vpop.f32.mrf.mxu0  ;;  %v560_v24 = vmax.f32 %v461_v17, 0.0 }
  0xab   :  { %v338_v31 = vadd.f32 %v3823_v26, %v337_v28  ;;  %v1156_v32 = vsel %vm1125_vm3, %v1093_v23, %v1094_v25 }
  0xac   :  { %v574_v33 = vmax.f32 %v503_v27, 0.0  ;;  %v1350_v34 = vmul.f32 %v1193_v30, %v1156_v32  ;;  %v1203_v27 = vpop.permute.xlu2 %1202  ;;  %625 = vst.msk [vmem:[#allocation2 + $0x170] sm:$0xff] %vm578_vm2, %v560_v24 }
  0xad   :  { %v519_v35 = vmax.f32 %v338_v31, 0.0  ;;  %3212 = vmatmul.msk.f32.gmra.mxu0 %vm108_vm1, %v59_v29 }
  0xae   :  { %639 = vst.msk [vmem:[#allocation2 + $0x1e0] sm:$0xff] %vm578_vm2, %v574_v33  ;;  %3327 = vmatmul.msk.f32.vlgmr.msrb.gmra.mxu3 %vm578_vm2, %v1350_v34  ;;  %v463_v36 = vpop.f32.mrf.mxu1 }
  0xaf   :  { %584 = vst.msk [vmem:[#allocation2 + $0x28] sm:$0xff] %vm578_vm2, %v519_v35 }
  0xb1   :  { %v505_v40 = vpop.f32.mrf.mxu3 }
  0xb2   :  { %v506_v41 = vadd.f32 %v3823_v26, %v505_v40  ;;  %v340_v42 = vpop.f32.mrf.mxu0  ;;  %v464_v40 = vadd.f32 %v3823_v26, %v463_v36 }
  0xb3   :  { %v341_v44 = vadd.f32 %v3823_v26, %v340_v42 }
  0xb4   :  { %v575_v46 = vmax.f32 %v506_v41, 0.0  ;;  %v481_v41 = vpop.f32.mrf.mxu2  ;;  %v561_v45 = vmax.f32 %v464_v40, 0.0 }
  0xb5   :  { %v520_v47 = vmax.f32 %v341_v44, 0.0  ;;  %3213 = vmatmul.msk.f32.gmra.mxu0 %vm108_vm1, %v60_v43  ;;  %v64_v44 = vld [vmem:[%s5442_s0 + $0xd0] sm:$0xff] }
  0xb6   :  { %640 = vst.msk [vmem:[#allocation2 + $0x1e8] sm:$0xff] %vm578_vm2, %v575_v46  ;;  %v647_v48 = vld [vmem:[#allocation2 + $0x20] ss:$2 sm:$0xff]  ;;  %v711_v49 = vld [vmem:[#allocation2 + $0x21] ss:$2 sm:$0xff]  ;;  %v482_v46 = vadd.f32 %v3823_v26, %v481_v41 }
  0xb7   :  { %585 = vst.msk [vmem:[#allocation2 + $0x30] sm:$0xff] %vm578_vm2, %v520_v47  ;;  %v3970_v50 = vmax.f32 %v647_v48, %v711_v49  ;;  %v803_v49 = vrot.slane %v3922_v20, 7 }
  0xb8   :  { %626 = vst.msk [vmem:[#allocation2 + $0x178] sm:$0xff] %vm578_vm2, %v561_v45  ;;  %v567_v51 = vmax.f32 %v482_v46, 0.0 }
  0xb9   :  { %v508_v52 = vpop.f32.mrf.mxu3  ;;  %v1095_v53 = vrot.slane %v3970_v50, 1  ;;  %3261 = vmatmul.msk.f32.gmra.mxu1 %vm578_vm2, %v3970_v50 }
  0xba   :  { %v509_v54 = vadd.f32 %v3823_v26, %v508_v52  ;;  %v343_v55 = vpop.f32.mrf.mxu0  ;;  %632 = vst.msk [vmem:[#allocation2 + $0x1a8] sm:$0xff] %vm578_vm2, %v567_v51  ;;  %v68_v51 = vld [vmem:[%s5442_s0 + $0xf0] sm:$0xff] }
  0xbb   :  { %v344_v58 = vadd.f32 %v3823_v26, %v343_v55  ;;  %v1155_v60 = vsel %vm1125_vm3, %v1094_v25, %v1095_v53  ;;  %v479_v25 = vadd.f32 %v3823_v26, %v478_v19 }
  0xbc   :  { %v576_v61 = vmax.f32 %v509_v54, 0.0  ;;  %v1351_v62 = vmul.f32 %v1198_v57, %v1155_v60 }
  0xbd   :  { %v521_v63 = vmax.f32 %v344_v58, 0.0  ;;  %3214 = vmatmul.msk.f32.gmra.mxu0 %vm108_vm1, %v61_v56  ;;  %v566_v31 = vmax.f32 %v479_v25, 0.0  ;;  %v466_v56 = vpop.f32.mrf.mxu1  ;;  %v484_v58 = vpop.f32.mrf.mxu2 }
  0xbe   :  { %641 = vst.msk [vmem:[#allocation2 + $0x1f0] sm:$0xff] %vm578_vm2, %v576_v61  ;;  %3328 = vmatmul.msk.f32.gmra.mxu3 %vm578_vm2, %v1351_v62  ;;  %v467_v20 = vadd.f32 %v3823_v26, %v466_v56  ;;  %v65_v61 = vld [vmem:[%s5442_s0 + $0xd8] sm:$0xff] }
  0xbf   :  { %586 = vst.msk [vmem:[#allocation2 + $0x38] sm:$0xff] %vm578_vm2, %v521_v63  ;;  %v485_v63 = vadd.f32 %v3823_v26, %v484_v58 }
  0xc0   :  { %631 = vst.msk [vmem:[#allocation2 + $0x1a0] sm:$0xff] %vm578_vm2, %v566_v31  ;;  %v562_v62 = vmax.f32 %v467_v20, 0.0 }
  0xc1   :  { %v511_v3 = vpop.f32.mrf.mxu3  ;;  %v568_v7 = vmax.f32 %v485_v63, 0.0  ;;  %v69_v63 = vld [vmem:[%s5442_s0 + $0xf8] sm:$0xff] }
  0xc2   :  { %v512_v4 = vadd.f32 %v3823_v26, %v511_v3  ;;  %v346_v5 = vpop.f32.mrf.mxu0  ;;  %627 = vst.msk [vmem:[#allocation2 + $0x180] sm:$0xff] %vm578_vm2, %v562_v62 }
  0xc3   :  { %v347_v8 = vadd.f32 %v3823_v26, %v346_v5  ;;  %v804_v5 = vrot.slane %v3970_v50, 7  ;;  %633 = vst.msk [vmem:[#allocation2 + $0x1b0] sm:$0xff] %vm578_vm2, %v568_v7 }
  0xc4   :  { %v577_v10 = vmax.f32 %v512_v4, 0.0 }
  0xc5   :  { %v522_v11 = vmax.f32 %v347_v8, 0.0  ;;  %3215 = vmatmul.msk.f32.gmra.mxu0 %vm108_vm1, %v62_v6 }
  0xc6   :  { %642 = vst.msk [vmem:[#allocation2 + $0x1f8] sm:$0xff] %vm578_vm2, %v577_v10  ;;  %v649_v12 = vld [vmem:[#allocation2 + $0x30] ss:$2 sm:$0xff]  ;;  %v713_v13 = vld [vmem:[#allocation2 + $0x31] ss:$2 sm:$0xff]  ;;  %v866_v10 = vsel %vm836_vm4, %v803_v49, %v804_v5 }
  0xc7   :  { %587 = vst.msk [vmem:[#allocation2 + $0x40] sm:$0xff] %vm578_vm2, %v522_v11  ;;  %v4001_v14 = vmax.f32 %v649_v12, %v713_v13  ;;  %v919_v11 = vpop.permute.xlu0 %918  ;;  %v487_v12 = vpop.f32.mrf.mxu2 }
  0xc9   :  { %v1096_v18 = vrot.slane %v4001_v14, 1  ;;  %3262 = vmatmul.msk.f32.gmra.mxu1 %vm578_vm2, %v4001_v14 }
  0xca   :  { %v349_v21 = vpop.f32.mrf.mxu0 }
  0xcb   :  { %v350_v28 = vadd.f32 %v3823_v26, %v349_v21  ;;  %v1154_v29 = vsel %vm1125_vm3, %v1095_v53, %v1096_v18  ;;  %v1063_v21 = vmul.f32 %v3990_v2, %v866_v10 }
  0xcc   :  { %v1352_v30 = vmul.f32 %v1203_v27, %v1154_v29 }
  0xcd   :  { %v523_v32 = vmax.f32 %v350_v28, 0.0  ;;  %3216 = vmatmul.msk.f32.gmra.mxu0 %vm108_vm1, %v63_v22  ;;  %v705_v33 = vld [vmem:[#allocation2 + $0x1f0] ss:$2 sm:$0xff]  ;;  %v769_v34 = vld [vmem:[#allocation2 + $0x1f1] ss:$2 sm:$0xff]  ;;  %v805_v22 = vrot.slane %v4001_v14, 7 }
  0xce   :  { %3329 = vmatmul.msk.f32.gmra.mxu3 %vm578_vm2, %v1352_v30  ;;  %v4017_v35 = vmax.f32 %v705_v33, %v769_v34  ;;  %v67_v33 = vld [vmem:[%s5442_s0 + $0xe8] sm:$0xff] }
  0xcf   :  { %588 = vst.msk [vmem:[#allocation2 + $0x48] sm:$0xff] %vm578_vm2, %v523_v32  ;;  %v865_v2 = vsel %vm836_vm4, %v804_v5, %v805_v22  ;;  %v1213_v36 = vpop.permute.xlu0 %1212 }
  0xd0   :  { %v833_v38 = vrot.slane %v4017_v35, 7  ;;  %v1064_v40 = vmul.f32 %v919_v11, %v865_v2 }
  0xd2   :  { %v352_v42 = vpop.f32.mrf.mxu0  ;;  %v868_v43 = vsel %vm836_vm4, %v833_v38, %v802_v37 }
  0xd3   :  { %v353_v47 = vadd.f32 %v3823_v26, %v352_v42  ;;  %v1061_v48 = vmul.f32 %v3910_v9, %v868_v43  ;;  %v867_v9 = vsel %vm836_vm4, %v802_v37, %v803_v49 }
  0xd4   :  { %v1062_v3 = vmul.f32 %v3957_v39, %v867_v9  ;;  %v469_v39 = vpop.f32.mrf.mxu1 }
  0xd5   :  { %v524_v52 = vmax.f32 %v353_v47, 0.0  ;;  %3291 = vmatmul.msk.f32.vlgmr.msrb.gmra.mxu2 %vm578_vm2, %v1061_v48  ;;  %3217 = vmatmul.msk.f32.gmra.mxu0 %vm108_vm1, %v64_v44  ;;  %v470_v50 = vadd.f32 %v3823_v26, %v469_v39  ;;  %v924_v48 = vpop.permute.xlu2 %923 }
  0xd6   :  { %v651_v53 = vld [vmem:[#allocation2 + $0x40] ss:$2 sm:$0xff]  ;;  %v715_v54 = vld [vmem:[#allocation2 + $0x41] ss:$2 sm:$0xff] }
  0xd7   :  { %589 = vst.msk [vmem:[#allocation2 + $0x50] sm:$0xff] %vm578_vm2, %v524_v52  ;;  %v4041_v55 = vmax.f32 %v651_v53, %v715_v54  ;;  %v563_v17 = vmax.f32 %v470_v50, 0.0  ;;  %v934_v39 = vpop.permute.xlu0 %933  ;;  %v70_v50 = vld [vmem:[%s5442_s0 + $0x100] sm:$0xff] }
  0xd9   :  { %v1097_v57 = vrot.slane %v4041_v55, 1  ;;  %3263 = vmatmul.msk.f32.gmra.mxu1 %vm578_vm2, %v4041_v55  ;;  %628 = vst.msk [vmem:[#allocation2 + $0x188] sm:$0xff] %vm578_vm2, %v563_v17  ;;  %v806_v42 = vrot.slane %v4041_v55, 7 }
  0xda   :  { %v355_v60 = vpop.f32.mrf.mxu0 }
  0xdb   :  { %v356_v1 = vadd.f32 %v3823_v26, %v355_v60  ;;  %v1153_v4 = vsel %vm1125_vm3, %v1096_v18, %v1097_v57  ;;  %v488_v18 = vadd.f32 %v3823_v26, %v487_v12  ;;  %v864_v46 = vsel %vm836_vm4, %v805_v22, %v806_v42 }
  0xdc   :  { %v1353_v6 = vmul.f32 %v1208_v0, %v1153_v4  ;;  %v472_v30 = vpop.f32.mrf.mxu1  ;;  %v1065_v54 = vmul.f32 %v924_v48, %v864_v46 }
  0xdd   :  { %v525_v8 = vmax.f32 %v356_v1, 0.0  ;;  %3292 = vmatmul.msk.f32.gmra.mxu2 %vm578_vm2, %v1062_v3  ;;  %3218 = vmatmul.msk.f32.gmra.mxu0 %vm108_vm1, %v65_v61  ;;  %v569_v24 = vmax.f32 %v488_v18, 0.0  ;;  %v473_v14 = vadd.f32 %v3823_v26, %v472_v30  ;;  %v929_v61 = vpop.permute.xlu1 %928  ;;  %v1218_v0 = vpop.permute.xlu2 %1217 }
  0xde   :  { %3330 = vmatmul.msk.f32.gmra.mxu3 %vm578_vm2, %v1353_v6 }
  0xdf   :  { %590 = vst.msk [vmem:[#allocation2 + $0x58] sm:$0xff] %vm578_vm2, %v525_v8  ;;  %v564_v34 = vmax.f32 %v473_v14, 0.0  ;;  %v1228_v46 = vpop.permute.xlu0 %1227 }
  0xe0   :  { %634 = vst.msk [vmem:[#allocation2 + $0x1b8] sm:$0xff] %vm578_vm2, %v569_v24  ;;  %v71_v24 = vld [vmem:[%s5442_s0 + $0x108] sm:$0xff] }
  0xe1   :  { %629 = vst.msk [vmem:[#allocation2 + $0x190] sm:$0xff] %vm578_vm2, %v564_v34 }
  0xe2   :  { %v358_v13 = vpop.f32.mrf.mxu0 }
  0xe3   :  { %v359_v19 = vadd.f32 %v3823_v26, %v358_v13 }
  0xe4   :  { %v475_v45 = vpop.f32.mrf.mxu1 }
  0xe5   :  { %v526_v25 = vmax.f32 %v359_v19, 0.0  ;;  %3293 = vmatmul.msk.f32.gmra.mxu2 %vm578_vm2, %v1063_v21  ;;  %3219 = vmatmul.msk.f32.gmra.mxu0 %vm108_vm1, %v66_v15  ;;  %v476_v47 = vadd.f32 %v3823_v26, %v475_v45  ;;  %v73_v45 = vld [vmem:[%s5442_s0 + $0x118] sm:$0xff] }
  0xe6   :  { %v653_v27 = vld [vmem:[#allocation2 + $0x50] ss:$2 sm:$0xff]  ;;  %v717_v28 = vld [vmem:[#allocation2 + $0x51] ss:$2 sm:$0xff] }
  0xe7   :  { %591 = vst.msk [vmem:[#allocation2 + $0x60] sm:$0xff] %vm578_vm2, %v526_v25  ;;  %v775_v29 = vmax.f32 %v653_v27, %v717_v28  ;;  %v565_v52 = vmax.f32 %v476_v47, 0.0  ;;  %v1223_v25 = vpop.permute.xlu1 %1222  ;;  %v939_v27 = vpop.permute.xlu2 %938 }
  0xe9   :  { %v1098_v31 = vrot.slane %v775_v29, 1  ;;  %3264 = vmatmul.msk.f32.gmra.mxu1 %vm578_vm2, %v775_v29  ;;  %v807_v55 = vrot.slane %v775_v29, 7  ;;  %630 = vst.msk [vmem:[#allocation2 + $0x198] sm:$0xff] %vm578_vm2, %v565_v52 }
  0xea   :  { %v361_v32 = vpop.f32.mrf.mxu0 }
  0xeb   :  { %v362_v37 = vadd.f32 %v3823_v26, %v361_v32  ;;  %v1152_v41 = vsel %vm1125_vm3, %v1097_v57, %v1098_v31  ;;  %v863_v58 = vsel %vm836_vm4, %v806_v42, %v807_v55 }
  0xec   :  { %v1354_v43 = vmul.f32 %v1213_v36, %v1152_v41  ;;  %v1066_v3 = vmul.f32 %v929_v61, %v863_v58 }
  0xed   :  { %v527_v44 = vmax.f32 %v362_v37, 0.0  ;;  %3294 = vmatmul.msk.f32.gmra.mxu2 %vm578_vm2, %v1064_v40  ;;  %3220 = vmatmul.msk.f32.gmra.mxu0 %vm108_vm1, %v67_v33  ;;  %v72_v33 = vld [vmem:[%s5442_s0 + $0x110] sm:$0xff] }
  0xee   :  { %3331 = vmatmul.msk.f32.gmra.mxu3 %vm578_vm2, %v1354_v43 }
  0xef   :  { %592 = vst.msk [vmem:[#allocation2 + $0x68] sm:$0xff] %vm578_vm2, %v527_v44  ;;  %v944_v47 = vpop.permute.xlu1 %943 }
  0xf2   :  { %v364_v49 = vpop.f32.mrf.mxu0 }
  0xf3   :  { %v365_v53 = vadd.f32 %v3823_v26, %v364_v49 }
  0xf5   :  { %v528_v56 = vmax.f32 %v365_v53, 0.0  ;;  %3295 = vmatmul.msk.f32.gmra.mxu2 %vm578_vm2, %v1065_v54  ;;  %3221 = vmatmul.msk.f32.gmra.mxu0 %vm108_vm1, %v68_v51 }
  0xf6   :  { %v655_v9 = vld [vmem:[#allocation2 + $0x60] ss:$2 sm:$0xff]  ;;  %v719_v20 = vld [vmem:[#allocation2 + $0x61] ss:$2 sm:$0xff] }
  0xf7   :  { %593 = vst.msk [vmem:[#allocation2 + $0x70] sm:$0xff] %vm578_vm2, %v528_v56  ;;  %v776_v57 = vmax.f32 %v655_v9, %v719_v20  ;;  %v74_v56 = vld [vmem:[%s5442_s0 + $0x120] sm:$0xff] }
  0xf9   :  { %v1099_v60 = vrot.slane %v776_v57, 1  ;;  %3265 = vmatmul.msk.f32.gmra.mxu1 %vm578_vm2, %v776_v57  ;;  %v808_v5 = vrot.slane %v776_v57, 7 }
  0xfa   :  { %v367_v62 = vpop.f32.mrf.mxu0 }
  0xfb   :  { %v368_v1 = vadd.f32 %v3823_v26, %v367_v62  ;;  %v1151_v4 = vsel %vm1125_vm3, %v1098_v31, %v1099_v60  ;;  %v862_v8 = vsel %vm836_vm4, %v807_v55, %v808_v5 }
  0xfc   :  { %v1355_v6 = vmul.f32 %v1218_v0, %v1151_v4  ;;  %v1067_v12 = vmul.f32 %v934_v39, %v862_v8  ;;  %v75_v0 = vld [vmem:[%s5442_s0 + $0x128] sm:$0xff] }
  0xfd   :  { %v529_v7 = vmax.f32 %v368_v1, 0.0  ;;  %3296 = vmatmul.msk.f32.gmra.mxu2 %vm578_vm2, %v1066_v3  ;;  %3222 = vmatmul.msk.f32.gmra.mxu0 %vm108_vm1, %v69_v63  ;;  %v949_v1 = vpop.permute.xlu0 %948  ;;  %v1233_v3 = vpop.permute.xlu2 %1232 }
  0xfe   :  { %3332 = vmatmul.msk.f32.gmra.mxu3 %vm578_vm2, %v1355_v6 }
  0xff   :  { %594 = vst.msk [vmem:[#allocation2 + $0x78] sm:$0xff] %vm578_vm2, %v529_v7 }
 0x102   :  { %v370_v10 = vpop.f32.mrf.mxu0 }
 0x103   :  { %v371_v11 = vadd.f32 %v3823_v26, %v370_v10 }
 0x105   :  { %v530_v13 = vmax.f32 %v371_v11, 0.0  ;;  %3297 = vmatmul.msk.f32.gmra.mxu2 %vm578_vm2, %v1067_v12  ;;  %3223 = vmatmul.msk.f32.gmra.mxu0 %vm108_vm1, %v70_v50  ;;  %v76_v50 = vld [vmem:[%s5442_s0 + $0x130] sm:$0xff] }
 0x106   :  { %v657_v15 = vld [vmem:[#allocation2 + $0x70] ss:$2 sm:$0xff]  ;;  %v721_v17 = vld [vmem:[#allocation2 + $0x71] ss:$2 sm:$0xff] }
 0x107   :  { %595 = vst.msk [vmem:[#allocation2 + $0x80] sm:$0xff] %vm578_vm2, %v530_v13  ;;  %v777_v18 = vmax.f32 %v657_v15, %v721_v17 }
 0x109   :  { %v809_v19 = vrot.slane %v777_v18, 7  ;;  %v1100_v21 = vrot.slane %v777_v18, 1  ;;  %3266 = vmatmul.msk.f32.gmra.mxu1 %vm578_vm2, %v777_v18 }
 0x10a   :  { %v373_v22 = vpop.f32.mrf.mxu0 }
 0x10b   :  { %v374_v28 = vadd.f32 %v3823_v26, %v373_v22  ;;  %v861_v29 = vsel %vm836_vm4, %v808_v5, %v809_v19  ;;  %v1150_v30 = vsel %vm1125_vm3, %v1099_v60, %v1100_v21  ;;  %v77_v22 = vld [vmem:[%s5442_s0 + $0x138] sm:$0xff] }
 0x10c   :  { %v1068_v2 = vmul.f32 %v939_v27, %v861_v29  ;;  %v1356_v14 = vmul.f32 %v1223_v25, %v1150_v30  ;;  %v954_v25 = vpop.permute.xlu2 %953 }
 0x10d   :  { %v531_v31 = vmax.f32 %v374_v28, 0.0  ;;  %3224 = vmatmul.msk.f32.gmra.mxu0 %vm108_vm1, %v71_v24  ;;  %v1238_v24 = vpop.permute.xlu1 %1237 }
 0x10e   :  { %3298 = vmatmul.msk.f32.gmra.mxu2 %vm578_vm2, %v1068_v2  ;;  %3333 = vmatmul.msk.f32.gmra.mxu3 %vm578_vm2, %v1356_v14 }
 0x10f   :  { %596 = vst.msk [vmem:[#allocation2 + $0x88] sm:$0xff] %vm578_vm2, %v531_v31 }
 0x112   :  { %v376_v32 = vpop.f32.mrf.mxu0 }
 0x113   :  { %v377_v34 = vadd.f32 %v3823_v26, %v376_v32  ;;  %v78_v32 = vld [vmem:[%s5442_s0 + $0x140] sm:$0xff] }
 0x115   :  { %v532_v36 = vmax.f32 %v377_v34, 0.0  ;;  %3225 = vmatmul.msk.f32.gmra.mxu0 %vm108_vm1, %v72_v33 }
 0x116   :  { %v659_v37 = vld [vmem:[#allocation2 + $0x80] ss:$2 sm:$0xff]  ;;  %v723_v40 = vld [vmem:[#allocation2 + $0x81] ss:$2 sm:$0xff] }
 0x117   :  { %597 = vst.msk [vmem:[#allocation2 + $0x90] sm:$0xff] %vm578_vm2, %v532_v36  ;;  %v778_v41 = vmax.f32 %v659_v37, %v723_v40 }
 0x119   :  { %v810_v42 = vrot.slane %v778_v41, 7  ;;  %v1101_v43 = vrot.slane %v778_v41, 1  ;;  %3267 = vmatmul.msk.f32.gmra.mxu1 %vm578_vm2, %v778_v41 }
 0x11a   :  { %v379_v44 = vpop.f32.mrf.mxu0 }
 0x11b   :  { %v380_v48 = vadd.f32 %v3823_v26, %v379_v44  ;;  %v860_v49 = vsel %vm836_vm4, %v809_v19, %v810_v42  ;;  %v1149_v51 = vsel %vm1125_vm3, %v1100_v21, %v1101_v43  ;;  %v79_v44 = vld [vmem:[%s5442_s0 + $0x148] sm:$0xff] }
 0x11c   :  { %v1069_v52 = vmul.f32 %v944_v47, %v860_v49  ;;  %v1357_v53 = vmul.f32 %v1228_v46, %v1149_v51  ;;  %v959_v46 = vpop.permute.xlu1 %958 }
 0x11d   :  { %v533_v54 = vmax.f32 %v380_v48, 0.0  ;;  %3226 = vmatmul.msk.f32.gmra.mxu0 %vm108_vm1, %v73_v45  ;;  %v1243_v45 = vpop.permute.xlu0 %1242 }
 0x11e   :  { %3299 = vmatmul.msk.f32.gmra.mxu2 %vm578_vm2, %v1069_v52  ;;  %3334 = vmatmul.msk.f32.gmra.mxu3 %vm578_vm2, %v1357_v53 }
 0x11f   :  { %598 = vst.msk [vmem:[#allocation2 + $0x98] sm:$0xff] %vm578_vm2, %v533_v54 }
 0x122   :  { %v382_v55 = vpop.f32.mrf.mxu0 }
 0x123   :  { %v383_v9 = vadd.f32 %v3823_v26, %v382_v55  ;;  %v80_v55 = vld [vmem:[%s5442_s0 + $0x150] sm:$0xff] }
 0x125   :  { %v534_v20 = vmax.f32 %v383_v9, 0.0  ;;  %3227 = vmatmul.msk.f32.gmra.mxu0 %vm108_vm1, %v74_v56 }
 0x126   :  { %v661_v57 = vld [vmem:[#allocation2 + $0x90] ss:$2 sm:$0xff]  ;;  %v725_v58 = vld [vmem:[#allocation2 + $0x91] ss:$2 sm:$0xff] }
 0x127   :  { %599 = vst.msk [vmem:[#allocation2 + $0xa0] sm:$0xff] %vm578_vm2, %v534_v20  ;;  %v779_v60 = vmax.f32 %v661_v57, %v725_v58 }
 0x129   :  { %v811_v61 = vrot.slane %v779_v60, 7  ;;  %v1102_v62 = vrot.slane %v779_v60, 1  ;;  %3268 = vmatmul.msk.f32.gmra.mxu1 %vm578_vm2, %v779_v60  ;;  %v1504_v60 = vpop.f32.mrf.mxu1 }
 0x12a   :  { %v385_v63 = vpop.f32.mrf.mxu0 }
 0x12b   :  { %v386_v4 = vadd.f32 %v3823_v26, %v385_v63  ;;  %v859_v5 = vsel %vm836_vm4, %v810_v42, %v811_v61  ;;  %v1148_v6 = vsel %vm1125_vm3, %v1101_v43, %v1102_v62 }
 0x12c   :  { %v1070_v7 = vmul.f32 %v949_v1, %v859_v5  ;;  %v1358_v8 = vmul.f32 %v1233_v3, %v1148_v6  ;;  %v81_v5 = vld [vmem:[%s5442_s0 + $0x158] sm:$0xff]  ;;  %v964_v6 = vpop.permute.xlu0 %963 }
 0x12d   :  { %v535_v39 = vmax.f32 %v386_v4, 0.0  ;;  %3228 = vmatmul.msk.f32.gmra.mxu0 %vm108_vm1, %v75_v0  ;;  %v4226_v0 = vld [vmem:[%s5446_s4] ss:$0 sm:$0xff] }
 0x12e   :  { %3300 = vmatmul.msk.f32.gmra.mxu2 %vm578_vm2, %v1070_v7  ;;  %3335 = vmatmul.msk.f32.gmra.mxu3 %vm578_vm2, %v1358_v8  ;;  %v1248_v7 = vpop.permute.xlu2 %1247 }
 0x12f   :  { %600 = vst.msk [vmem:[#allocation2 + $0xa8] sm:$0xff] %vm578_vm2, %v535_v39 }
 0x132   :  { %v388_v10 = vpop.f32.mrf.mxu0 }
 0x133   :  { %v389_v11 = vadd.f32 %v3823_v26, %v388_v10 }
 0x135   :  { %v536_v12 = vmax.f32 %v389_v11, 0.0  ;;  %3229 = vmatmul.msk.f32.gmra.mxu0 %vm108_vm1, %v76_v50 }
 0x136   :  { %v663_v13 = vld [vmem:[#allocation2 + $0xa0] ss:$2 sm:$0xff]  ;;  %v727_v15 = vld [vmem:[#allocation2 + $0xa1] ss:$2 sm:$0xff] }
 0x137   :  { %601 = vst.msk [vmem:[#allocation2 + $0xb0] sm:$0xff] %vm578_vm2, %v536_v12  ;;  %v780_v17 = vmax.f32 %v663_v13, %v727_v15 }
 0x139   :  { %v812_v18 = vrot.slane %v780_v17, 7  ;;  %v1103_v19 = vrot.slane %v780_v17, 1  ;;  %3269 = vmatmul.msk.f32.gmra.mxu1 %vm578_vm2, %v780_v17 }
 0x13a   :  { %v391_v21 = vpop.f32.mrf.mxu0 }
 0x13b   :  { %v392_v27 = vadd.f32 %v3823_v26, %v391_v21  ;;  %v858_v28 = vsel %vm836_vm4, %v811_v61, %v812_v18  ;;  %v1147_v29 = vsel %vm1125_vm3, %v1102_v62, %v1103_v19  ;;  %v1927_v62 = vpop.f32.mrf.mxu3 }
 0x13c   :  { %v1071_v30 = vmul.f32 %v954_v25, %v858_v28  ;;  %v1359_v2 = vmul.f32 %v1238_v24, %v1147_v29  ;;  %v82_v25 = vld [vmem:[%s5442_s0 + $0x160] sm:$0xff] }
 0x13d   :  { %v537_v14 = vmax.f32 %v392_v27, 0.0  ;;  %3230 = vmatmul.msk.f32.gmra.mxu0 %vm108_vm1, %v77_v22 }
 0x13e   :  { %3301 = vmatmul.msk.f32.gmra.mxu2 %vm578_vm2, %v1071_v30  ;;  %3336 = vmatmul.msk.f32.gmra.mxu3 %vm578_vm2, %v1359_v2 }
 0x13f   :  { %602 = vst.msk [vmem:[#allocation2 + $0xb8] sm:$0xff] %vm578_vm2, %v537_v14 }
 0x142   :  { %v394_v31 = vpop.f32.mrf.mxu0 }
 0x143   :  { %v395_v33 = vadd.f32 %v3823_v26, %v394_v31  ;;  %v1930_v21 = vpop.f32.mrf.mxu3 }
 0x145   :  { %v538_v34 = vmax.f32 %v395_v33, 0.0  ;;  %3231 = vmatmul.msk.f32.gmra.mxu0 %vm108_vm1, %v78_v32 }
 0x146   :  { %v665_v36 = vld [vmem:[#allocation2 + $0xb0] ss:$2 sm:$0xff]  ;;  %v729_v37 = vld [vmem:[#allocation2 + $0xb1] ss:$2 sm:$0xff] }
 0x147   :  { %603 = vst.msk [vmem:[#allocation2 + $0xc0] sm:$0xff] %vm578_vm2, %v538_v34  ;;  %v781_v40 = vmax.f32 %v665_v36, %v729_v37 }
 0x149   :  { %v813_v41 = vrot.slane %v781_v40, 7  ;;  %v1104_v42 = vrot.slane %v781_v40, 1  ;;  %3270 = vmatmul.msk.f32.gmra.mxu1 %vm578_vm2, %v781_v40 }
 0x14a   :  { %v397_v43 = vpop.f32.mrf.mxu0 }
 0x14b   :  { %v398_v47 = vadd.f32 %v3823_v26, %v397_v43  ;;  %v857_v48 = vsel %vm836_vm4, %v812_v18, %v813_v41  ;;  %v1146_v49 = vsel %vm1125_vm3, %v1103_v19, %v1104_v42  ;;  %v1507_v18 = vpop.f32.mrf.mxu1  ;;  %v969_v43 = vpop.permute.xlu2 %968 }
 0x14c   :  { %v1072_v51 = vmul.f32 %v959_v46, %v857_v48  ;;  %v1360_v52 = vmul.f32 %v1243_v45, %v1146_v49  ;;  %v4255_v45 = vld [vmem:[%s5444_s2] ss:$0 sm:$0xff] }
 0x14d   :  { %v539_v53 = vmax.f32 %v398_v47, 0.0  ;;  %3232 = vmatmul.msk.f32.gmra.mxu0 %vm108_vm1, %v79_v44 }
 0x14e   :  { %3302 = vmatmul.msk.f32.gmra.mxu2 %vm578_vm2, %v1072_v51  ;;  %3337 = vmatmul.msk.f32.gmra.mxu3 %vm578_vm2, %v1360_v52 }
 0x14f   :  { %604 = vst.msk [vmem:[#allocation2 + $0xc8] sm:$0xff] %vm578_vm2, %v539_v53 }
 0x151   :  { %v1933_v36 = vpop.f32.mrf.mxu3 }
 0x152   :  { %v400_v54 = vpop.f32.mrf.mxu0 }
 0x153   :  { %v401_v56 = vadd.f32 %v3823_v26, %v400_v54  ;;  %v1510_v33 = vpop.f32.mrf.mxu1 }
 0x155   :  { %v540_v9 = vmax.f32 %v401_v56, 0.0  ;;  %3233 = vmatmul.msk.f32.gmra.mxu0 %vm108_vm1, %v80_v55 }
 0x156   :  { %v667_v20 = vld [vmem:[#allocation2 + $0xc0] ss:$2 sm:$0xff]  ;;  %v731_v57 = vld [vmem:[#allocation2 + $0xc1] ss:$2 sm:$0xff] }
 0x157   :  { %605 = vst.msk [vmem:[#allocation2 + $0xd0] sm:$0xff] %vm578_vm2, %v540_v9  ;;  %v782_v58 = vmax.f32 %v667_v20, %v731_v57 }
 0x158   :  { %v1713_v61 = vpop.f32.mrf.mxu2 }
 0x159   :  { %v1714_v63 = vadd.f32 %v1713_v61, %v1504_v60  ;;  %v814_v1 = vrot.slane %v782_v58, 7  ;;  %v1105_v3 = vrot.slane %v782_v58, 1  ;;  %3271 = vmatmul.msk.f32.gmra.mxu1 %vm578_vm2, %v782_v58 }
 0x15a   :  { %v403_v4 = vpop.f32.mrf.mxu0 }
 0x15b   :  { %v2023_v8 = vadd.f32 %v1927_v62, %v1714_v63  ;;  %v404_v39 = vadd.f32 %v3823_v26, %v403_v4  ;;  %v856_v10 = vsel %vm836_vm4, %v813_v41, %v814_v1  ;;  %v1145_v50 = vsel %vm1125_vm3, %v1104_v42, %v1105_v3  ;;  %v1253_v42 = vpop.permute.xlu1 %1252  ;;  %v1513_v55 = vpop.f32.mrf.mxu1 }
 0x15c   :  { %v1073_v11 = vmul.f32 %v964_v6, %v856_v10  ;;  %v1361_v12 = vmul.f32 %v1248_v7, %v1145_v50 }
 0x15d   :  { %v2059_v13 = vadd.f32 %v4226_v0, %v2023_v8  ;;  %v541_v15 = vmax.f32 %v404_v39, 0.0  ;;  %3234 = vmatmul.msk.f32.gmra.mxu0 %vm108_vm1, %v81_v5 }
 0x15e   :  { %3303 = vmatmul.msk.f32.gmra.mxu2 %vm578_vm2, %v1073_v11  ;;  %3338 = vmatmul.msk.f32.gmra.mxu3 %vm578_vm2, %v1361_v12  ;;  %v1258_v11 = vpop.permute.xlu0 %1257 }
 0x15f   :  { %v2091_v17 = vmax.f32 %v2059_v13, 0.0  ;;  %606 = vst.msk [vmem:[#allocation2 + $0xd8] sm:$0xff] %vm578_vm2, %v541_v15 }
 0x160   :  { %v1716_v19 = vpop.f32.mrf.mxu2 }
 0x161   :  { %2123 = vst.msk [vmem:[#allocation3] sm:$0xff] %vm578_vm2, %v2091_v17  ;;  %v1717_v22 = vadd.f32 %v1716_v19, %v1507_v18  ;;  %v1936_v9 = vpop.f32.mrf.mxu3 }
 0x162   :  { %v406_v24 = vpop.f32.mrf.mxu0 }
 0x163   :  { %v2024_v27 = vadd.f32 %v1930_v21, %v1717_v22  ;;  %v407_v28 = vadd.f32 %v3823_v26, %v406_v24  ;;  %v1516_v5 = vpop.f32.mrf.mxu1  ;;  %v974_v12 = vpop.permute.xlu1 %973 }
 0x165   :  { %v2060_v29 = vadd.f32 %v4226_v0, %v2024_v27  ;;  %v542_v30 = vmax.f32 %v407_v28, 0.0  ;;  %3235 = vmatmul.msk.f32.gmra.mxu0 %vm108_vm1, %v82_v25 }
 0x166   :  { %v669_v2 = vld [vmem:[#allocation2 + $0xd0] ss:$2 sm:$0xff]  ;;  %v733_v14 = vld [vmem:[#allocation2 + $0xd1] ss:$2 sm:$0xff] }
 0x167   :  { %v2092_v31 = vmax.f32 %v2060_v29, 0.0  ;;  %607 = vst.msk [vmem:[#allocation2 + $0xe0] sm:$0xff] %vm578_vm2, %v542_v30  ;;  %v783_v32 = vmax.f32 %v669_v2, %v733_v14 }
 0x168   :  { %v1719_v34 = vpop.f32.mrf.mxu2 }
 0x169   :  { %2124 = vst.msk [vmem:[#allocation3 + $0x8] sm:$0xff] %vm578_vm2, %v2092_v31  ;;  %v1720_v37 = vadd.f32 %v1719_v34, %v1510_v33  ;;  %v815_v40 = vrot.slane %v783_v32, 7  ;;  %v1106_v41 = vrot.slane %v783_v32, 1  ;;  %3272 = vmatmul.msk.f32.gmra.mxu1 %vm578_vm2, %v783_v32 }
 0x16a   :  { %v409_v26 = vpop.f32.mrf.mxu0 }
 0x16b   :  { %v2025_v44 = vadd.f32 %v1933_v36, %v1720_v37  ;;  %v410_v46 = vadd.f32 %v4255_v45, %v409_v26  ;;  %v855_v47 = vsel %vm836_vm4, %v814_v1, %v815_v40  ;;  %v1144_v48 = vsel %vm1125_vm3, %v1105_v3, %v1106_v41  ;;  %v1519_v27 = vpop.f32.mrf.mxu1 }
 0x16c   :  { %v1074_v49 = vmul.f32 %v969_v43, %v855_v47  ;;  %v1362_v51 = vmul.f32 %v1253_v42, %v1144_v48  ;;  %v979_v43 = vpop.permute.xlu0 %978 }
 0x16d   :  { %v2061_v52 = vadd.f32 %v4226_v0, %v2025_v44  ;;  %v543_v53 = vmax.f32 %v410_v46, 0.0  ;;  %v1263_v44 = vpop.permute.xlu2 %1262 }
 0x16e   :  { %3304 = vmatmul.msk.f32.gmra.mxu2 %vm578_vm2, %v1074_v49  ;;  %3339 = vmatmul.msk.f32.gmra.mxu3 %vm578_vm2, %v1362_v51 }
 0x16f   :  { %v2093_v54 = vmax.f32 %v2061_v52, 0.0  ;;  %608 = vst.msk [vmem:[#allocation2 + $0xe8] sm:$0xff] %vm578_vm2, %v543_v53 }
 0x170   :  { %v1722_v56 = vpop.f32.mrf.mxu2 }
 0x171   :  { %2125 = vst.msk [vmem:[#allocation3 + $0x10] sm:$0xff] %vm578_vm2, %v2093_v54  ;;  %v1723_v20 = vadd.f32 %v1722_v56, %v1513_v55  ;;  %v1939_v7 = vpop.f32.mrf.mxu3 }
 0x172   :  { %v412_v57 = vpop.f32.mrf.mxu0 }
 0x173   :  { %v2026_v58 = vadd.f32 %v1936_v9, %v1723_v20  ;;  %v413_v60 = vadd.f32 %v4255_v45, %v412_v57 }
 0x175   :  { %v2062_v61 = vadd.f32 %v4226_v0, %v2026_v58  ;;  %v544_v62 = vmax.f32 %v413_v60, 0.0 }
 0x176   :  { %v671_v63 = vld [vmem:[#allocation2 + $0xe0] ss:$2 sm:$0xff]  ;;  %v735_v1 = vld [vmem:[#allocation2 + $0xe1] ss:$2 sm:$0xff]  ;;  %v1522_v54 = vpop.f32.mrf.mxu1 }
 0x177   :  { %v2094_v3 = vmax.f32 %v2062_v61, 0.0  ;;  %609 = vst.msk [vmem:[#allocation2 + $0xf0] sm:$0xff] %vm578_vm2, %v544_v62  ;;  %v784_v4 = vmax.f32 %v671_v63, %v735_v1 }
 0x178   :  { %v1725_v6 = vpop.f32.mrf.mxu2 }
 0x179   :  { %2126 = vst.msk [vmem:[#allocation3 + $0x18] sm:$0xff] %vm578_vm2, %v2094_v3  ;;  %v1726_v8 = vadd.f32 %v1725_v6, %v1516_v5  ;;  %v816_v39 = vrot.slane %v784_v4, 7  ;;  %v1107_v10 = vrot.slane %v784_v4, 1  ;;  %3273 = vmatmul.msk.f32.gmra.mxu1 %vm578_vm2, %v784_v4  ;;  %v1268_v6 = vpop.permute.xlu1 %1267 }
 0x17a   :  { %v415_v50 = vpop.f32.mrf.mxu0 }
 0x17b   :  { %v2027_v13 = vadd.f32 %v1939_v7, %v1726_v8  ;;  %v416_v15 = vadd.f32 %v4255_v45, %v415_v50  ;;  %v854_v17 = vsel %vm836_vm4, %v815_v40, %v816_v39  ;;  %v1143_v18 = vsel %vm1125_vm3, %v1106_v41, %v1107_v10  ;;  %v984_v7 = vpop.permute.xlu2 %983 }
 0x17c   :  { %v1075_v19 = vmul.f32 %v974_v12, %v854_v17  ;;  %v1363_v21 = vmul.f32 %v1258_v11, %v1143_v18 }
 0x17d   :  { %v2063_v22 = vadd.f32 %v4226_v0, %v2027_v13  ;;  %v545_v24 = vmax.f32 %v416_v15, 0.0 }
 0x17e   :  { %3305 = vmatmul.msk.f32.gmra.mxu2 %vm578_vm2, %v1075_v19  ;;  %3340 = vmatmul.msk.f32.gmra.mxu3 %vm578_vm2, %v1363_v21 }
 0x17f   :  { %v2095_v25 = vmax.f32 %v2063_v22, 0.0  ;;  %610 = vst.msk [vmem:[#allocation2 + $0xf8] sm:$0xff] %vm578_vm2, %v545_v24 }
 0x180   :  { %v1728_v28 = vpop.f32.mrf.mxu2 }
 0x181   :  { %2127 = vst.msk [vmem:[#allocation3 + $0x20] sm:$0xff] %vm578_vm2, %v2095_v25  ;;  %v1729_v29 = vadd.f32 %v1728_v28, %v1519_v27  ;;  %v1942_v30 = vpop.f32.mrf.mxu3 }
 0x182   :  { %v418_v2 = vpop.f32.mrf.mxu0 }
 0x183   :  { %v2028_v14 = vadd.f32 %v1942_v30, %v1729_v29  ;;  %v419_v31 = vadd.f32 %v4255_v45, %v418_v2  ;;  %v2190_v2 = vld [vmem:[%s5447_s7 + $0x18] sm:$0xff] }
 0x184   :  { %2267 = vmatpush.msra.mxu2 %v2190_v2 }
 0x185   :  { %v2064_v32 = vadd.f32 %v4226_v0, %v2028_v14  ;;  %v546_v33 = vmax.f32 %v419_v31, 0.0  ;;  %v3362_v14 = vld [vmem:[%s5447_s7 + $0x38] sm:$0xff] }
 0x186   :  { %v673_v34 = vld [vmem:[#allocation2 + $0xf0] ss:$2 sm:$0xff]  ;;  %v737_v36 = vld [vmem:[#allocation2 + $0xf1] ss:$2 sm:$0xff]  ;;  %v1525_v15 = vpop.f32.mrf.mxu1  ;;  %2244 = vmatpush.msra.mxu1 %v3362_v14 }
 0x187   :  { %v2096_v37 = vmax.f32 %v2064_v32, 0.0  ;;  %611 = vst.msk [vmem:[#allocation2 + $0x100] sm:$0xff] %vm578_vm2, %v546_v33  ;;  %v785_v40 = vmax.f32 %v673_v34, %v737_v36  ;;  %v3368_v31 = vld [vmem:[%s5447_s7 + $0x58] sm:$0xff]  ;;  %v1273_v36 = vpop.permute.xlu0 %1272 }
 0x188   :  { %v1731_v52 = vpop.f32.mrf.mxu2  ;;  %2328 = vmatpush.msra.mxu3 %v3368_v31 }
 0x189   :  { %2128 = vst.msk [vmem:[#allocation3 + $0x28] sm:$0xff] %vm578_vm2, %v2096_v37  ;;  %v817_v41 = vrot.slane %v785_v40, 7  ;;  %v1108_v26 = vrot.slane %v785_v40, 1  ;;  %3274 = vmatmul.msk.f32.gmra.mxu1 %vm578_vm2, %v785_v40  ;;  %v1732_v55 = vadd.f32 %v1731_v52, %v1522_v54  ;;  %v989_v37 = vpop.permute.xlu1 %988 }
 0x18a   :  { %v421_v42 = vpop.f32.mrf.mxu0 }
 0x18b   :  { %v422_v46 = vadd.f32 %v4255_v45, %v421_v42  ;;  %v853_v47 = vsel %vm836_vm4, %v816_v39, %v817_v41  ;;  %v1142_v48 = vsel %vm1125_vm3, %v1107_v10, %v1108_v26 }
 0x18c   :  { %v1076_v49 = vmul.f32 %v979_v43, %v853_v47  ;;  %v1364_v51 = vmul.f32 %v1263_v44, %v1142_v48 }
 0x18d   :  { %v547_v53 = vmax.f32 %v422_v46, 0.0 }
 0x18e   :  { %3306 = vmatmul.msk.f32.gmra.mxu2 %vm578_vm2, %v1076_v49  ;;  %3341 = vmatmul.msk.f32.gmra.mxu3 %vm578_vm2, %v1364_v51 }
 0x18f   :  { %612 = vst.msk [vmem:[#allocation2 + $0x108] sm:$0xff] %vm578_vm2, %v547_v53 }
 0x191   :  { %v1945_v56 = vpop.f32.mrf.mxu3  ;;  %v1734_v12 = vpop.f32.mrf.mxu2 }
 0x192   :  { %v2029_v9 = vadd.f32 %v1945_v56, %v1732_v55  ;;  %v424_v20 = vpop.f32.mrf.mxu0  ;;  %v1735_v17 = vadd.f32 %v1734_v12, %v1525_v15 }
 0x193   :  { %v425_v57 = vadd.f32 %v4255_v45, %v424_v20 }
 0x194   :  { %v2065_v58 = vadd.f32 %v4226_v0, %v2029_v9 }
 0x195   :  { %v548_v60 = vmax.f32 %v425_v57, 0.0 }
 0x196   :  { %v2097_v61 = vmax.f32 %v2065_v58, 0.0  ;;  %v675_v62 = vld [vmem:[#allocation2 + $0x100] ss:$2 sm:$0xff]  ;;  %v739_v63 = vld [vmem:[#allocation2 + $0x101] ss:$2 sm:$0xff]  ;;  %v1528_v47 = vpop.f32.mrf.mxu1 }
 0x197   :  { %613 = vst.msk [vmem:[#allocation2 + $0x110] sm:$0xff] %vm578_vm2, %v548_v60  ;;  %v786_v1 = vmax.f32 %v675_v62, %v739_v63  ;;  %v994_v62 = vpop.permute.xlu0 %993  ;;  %v1278_v63 = vpop.permute.xlu2 %1277 }
 0x198   :  { %2129 = vst.msk [vmem:[#allocation3 + $0x30] sm:$0xff] %vm578_vm2, %v2097_v61 }
 0x199   :  { %v818_v3 = vrot.slane %v786_v1, 7  ;;  %v1109_v4 = vrot.slane %v786_v1, 1  ;;  %3275 = vmatmul.msk.f32.gmra.mxu1 %vm578_vm2, %v786_v1 }
 0x19a   :  { %v427_v5 = vpop.f32.mrf.mxu0 }
 0x19b   :  { %v428_v8 = vadd.f32 %v4255_v45, %v427_v5  ;;  %v852_v39 = vsel %vm836_vm4, %v817_v41, %v818_v3  ;;  %v1141_v10 = vsel %vm1125_vm3, %v1108_v26, %v1109_v4 }
 0x19c   :  { %v1077_v50 = vmul.f32 %v984_v7, %v852_v39  ;;  %v1365_v11 = vmul.f32 %v1268_v6, %v1141_v10 }
 0x19d   :  { %v549_v13 = vmax.f32 %v428_v8, 0.0 }
 0x19e   :  { %3307 = vmatmul.msk.f32.gmra.mxu2 %vm578_vm2, %v1077_v50  ;;  %3342 = vmatmul.msk.f32.gmra.mxu3 %vm578_vm2, %v1365_v11 }
 0x19f   :  { %614 = vst.msk [vmem:[#allocation2 + $0x118] sm:$0xff] %vm578_vm2, %v549_v13 }
 0x1a1   :  { %v1948_v18 = vpop.f32.mrf.mxu3  ;;  %v1737_v44 = vpop.f32.mrf.mxu2 }
 0x1a2   :  { %v2030_v19 = vadd.f32 %v1948_v18, %v1735_v17  ;;  %v430_v21 = vpop.f32.mrf.mxu0  ;;  %v1738_v48 = vadd.f32 %v1737_v44, %v1528_v47 }
 0x1a3   :  { %v431_v22 = vadd.f32 %v4255_v45, %v430_v21 }
 0x1a4   :  { %v2066_v24 = vadd.f32 %v4226_v0, %v2030_v19 }
 0x1a5   :  { %v550_v25 = vmax.f32 %v431_v22, 0.0 }
 0x1a6   :  { %v2098_v27 = vmax.f32 %v2066_v24, 0.0  ;;  %v677_v28 = vld [vmem:[#allocation2 + $0x110] ss:$2 sm:$0xff]  ;;  %v741_v29 = vld [vmem:[#allocation2 + $0x111] ss:$2 sm:$0xff]  ;;  %v1531_v39 = vpop.f32.mrf.mxu1 }
 0x1a7   :  { %615 = vst.msk [vmem:[#allocation2 + $0x120] sm:$0xff] %vm578_vm2, %v550_v25  ;;  %v787_v30 = vmax.f32 %v677_v28, %v741_v29  ;;  %v1283_v28 = vpop.permute.xlu1 %1282  ;;  %v999_v29 = vpop.permute.xlu2 %998 }
 0x1a8   :  { %2130 = vst.msk [vmem:[#allocation3 + $0x38] sm:$0xff] %vm578_vm2, %v2098_v27 }
 0x1a9   :  { %v1110_v32 = vrot.slane %v787_v30, 1  ;;  %3276 = vmatmul.msk.f32.gmra.mxu1 %vm578_vm2, %v787_v30  ;;  %v819_v33 = vrot.slane %v787_v30, 7 }
 0x1aa   :  { %v433_v34 = vpop.f32.mrf.mxu0 }
 0x1ab   :  { %v434_v40 = vadd.f32 %v4255_v45, %v433_v34  ;;  %v851_v41 = vsel %vm836_vm4, %v818_v3, %v819_v33  ;;  %v1140_v26 = vsel %vm1125_vm3, %v1109_v4, %v1110_v32 }
 0x1ac   :  { %v1078_v42 = vmul.f32 %v989_v37, %v851_v41  ;;  %v1366_v43 = vmul.f32 %v1273_v36, %v1140_v26 }
 0x1ad   :  { %v551_v46 = vmax.f32 %v434_v40, 0.0 }
 0x1ae   :  { %3308 = vmatmul.msk.f32.gmra.mxu2 %vm578_vm2, %v1078_v42  ;;  %3343 = vmatmul.msk.f32.gmra.mxu3 %vm578_vm2, %v1366_v43 }
 0x1af   :  { %616 = vst.msk [vmem:[#allocation2 + $0x128] sm:$0xff] %vm578_vm2, %v551_v46 }
 0x1b1   :  { %v1951_v49 = vpop.f32.mrf.mxu3  ;;  %v1740_v7 = vpop.f32.mrf.mxu2 }
 0x1b2   :  { %v2031_v51 = vadd.f32 %v1951_v49, %v1738_v48  ;;  %v436_v52 = vpop.f32.mrf.mxu0  ;;  %v1741_v10 = vadd.f32 %v1740_v7, %v1531_v39 }
 0x1b3   :  { %v437_v53 = vadd.f32 %v4255_v45, %v436_v52 }
 0x1b4   :  { %v2067_v54 = vadd.f32 %v4226_v0, %v2031_v51 }
 0x1b5   :  { %v552_v55 = vmax.f32 %v437_v53, 0.0 }
 0x1b6   :  { %v2099_v56 = vmax.f32 %v2067_v54, 0.0  ;;  %v679_v9 = vld [vmem:[#allocation2 + $0x120] ss:$2 sm:$0xff]  ;;  %v743_v20 = vld [vmem:[#allocation2 + $0x121] ss:$2 sm:$0xff]  ;;  %v1534_v36 = vpop.f32.mrf.mxu1  ;;  %v1288_v54 = vpop.permute.xlu0 %1287 }
 0x1b7   :  { %617 = vst.msk [vmem:[#allocation2 + $0x130] sm:$0xff] %vm578_vm2, %v552_v55  ;;  %v788_v57 = vmax.f32 %v679_v9, %v743_v20  ;;  %v1004_v55 = vpop.permute.xlu1 %1003 }
 0x1b8   :  { %2131 = vst.msk [vmem:[#allocation3 + $0x40] sm:$0xff] %vm578_vm2, %v2099_v56 }
 0x1b9   :  { %v1111_v58 = vrot.slane %v788_v57, 1  ;;  %3277 = vmatmul.msk.f32.gmra.mxu1 %vm578_vm2, %v788_v57  ;;  %v820_v60 = vrot.slane %v788_v57, 7 }
 0x1ba   :  { %v439_v61 = vpop.f32.mrf.mxu0 }
 0x1bb   :  { %v440_v1 = vadd.f32 %v4255_v45, %v439_v61  ;;  %v850_v3 = vsel %vm836_vm4, %v819_v33, %v820_v60  ;;  %v1139_v4 = vsel %vm1125_vm3, %v1110_v32, %v1111_v58 }
 0x1bc   :  { %v1079_v5 = vmul.f32 %v994_v62, %v850_v3  ;;  %v1367_v6 = vmul.f32 %v1278_v63, %v1139_v4 }
 0x1bd   :  { %v553_v8 = vmax.f32 %v440_v1, 0.0 }
 0x1be   :  { %3309 = vmatmul.msk.f32.gmra.mxu2 %vm578_vm2, %v1079_v5  ;;  %3344 = vmatmul.msk.f32.gmra.mxu3 %vm578_vm2, %v1367_v6 }
 0x1bf   :  { %618 = vst.msk [vmem:[#allocation2 + $0x138] sm:$0xff] %vm578_vm2, %v553_v8 }
 0x1c1   :  { %v1954_v50 = vpop.f32.mrf.mxu3  ;;  %v1743_v33 = vpop.f32.mrf.mxu2 }
 0x1c2   :  { %v2032_v11 = vadd.f32 %v1954_v50, %v1741_v10  ;;  %v442_v12 = vpop.f32.mrf.mxu0  ;;  %v1744_v37 = vadd.f32 %v1743_v33, %v1534_v36 }
 0x1c3   :  { %v443_v13 = vadd.f32 %v4255_v45, %v442_v12  ;;  %v3361_v12 = vld [vmem:[%s5447_s7 + $0x30] sm:$0xff] }
 0x1c4   :  { %v2068_v15 = vadd.f32 %v4226_v0, %v2032_v11  ;;  %v2189_v11 = vld [vmem:[%s5447_s7 + $0x10] sm:$0xff]  ;;  %2245 = vmatpush.msra.mxu1 %v3361_v12 }
 0x1c5   :  { %v554_v17 = vmax.f32 %v443_v13, 0.0  ;;  %v1293_v13 = vpop.permute.xlu2 %1292  ;;  %2268 = vmatpush.msra.mxu2 %v2189_v11 }
 0x1c6   :  { %v2100_v18 = vmax.f32 %v2068_v15, 0.0  ;;  %v681_v19 = vld [vmem:[#allocation2 + $0x130] ss:$2 sm:$0xff]  ;;  %v745_v21 = vld [vmem:[#allocation2 + $0x131] ss:$2 sm:$0xff]  ;;  %v1537_v62 = vpop.f32.mrf.mxu1 }
 0x1c7   :  { %619 = vst.msk [vmem:[#allocation2 + $0x140] sm:$0xff] %vm578_vm2, %v554_v17  ;;  %v789_v22 = vmax.f32 %v681_v19, %v745_v21 }
 0x1c8   :  { %2132 = vst.msk [vmem:[#allocation3 + $0x48] sm:$0xff] %vm578_vm2, %v2100_v18  ;;  %v1009_v18 = vpop.permute.xlu0 %1008 }
 0x1c9   :  { %v1112_v24 = vrot.slane %v789_v22, 1  ;;  %3278 = vmatmul.msk.f32.gmra.mxu1 %vm578_vm2, %v789_v22  ;;  %v821_v25 = vrot.slane %v789_v22, 7 }
 0x1ca   :  { %v445_v27 = vpop.f32.mrf.mxu0 }
 0x1cb   :  { %v446_v30 = vadd.f32 %v4255_v45, %v445_v27  ;;  %v849_v2 = vsel %vm836_vm4, %v820_v60, %v821_v25  ;;  %v1138_v14 = vsel %vm1125_vm3, %v1111_v58, %v1112_v24 }
 0x1cc   :  { %v1080_v31 = vmul.f32 %v999_v29, %v849_v2  ;;  %v1368_v32 = vmul.f32 %v1283_v28, %v1138_v14  ;;  %v689_v14 = vld [vmem:[#allocation2 + $0x170] ss:$2 sm:$0xff] }
 0x1cd   :  { %v555_v34 = vmax.f32 %v446_v30, 0.0 }
 0x1ce   :  { %3310 = vmatmul.msk.f32.gmra.mxu2 %vm578_vm2, %v1080_v31  ;;  %3345 = vmatmul.msk.f32.gmra.mxu3 %vm578_vm2, %v1368_v32  ;;  %v753_v31 = vld [vmem:[#allocation2 + $0x171] ss:$2 sm:$0xff]  ;;  %v1298_v32 = vpop.permute.xlu1 %1297 }
 0x1cf   :  { %620 = vst.msk [vmem:[#allocation2 + $0x148] sm:$0xff] %vm578_vm2, %v555_v34 }
 0x1d1   :  { %v1957_v40 = vpop.f32.mrf.mxu3  ;;  %v1746_v60 = vpop.f32.mrf.mxu2 }
 0x1d2   :  { %v2033_v41 = vadd.f32 %v1957_v40, %v1744_v37  ;;  %v448_v26 = vpop.f32.mrf.mxu0  ;;  %v1747_v63 = vadd.f32 %v1746_v60, %v1537_v62  ;;  %v1014_v40 = vpop.permute.xlu2 %1013 }
 0x1d3   :  { %v449_v42 = vadd.f32 %v4255_v45, %v448_v26 }
 0x1d4   :  { %v2069_v43 = vadd.f32 %v4226_v0, %v2033_v41 }
 0x1d5   :  { %v556_v44 = vmax.f32 %v449_v42, 0.0  ;;  %v793_v42 = vmax.f32 %v689_v14, %v753_v31  ;;  %v697_v31 = vld [vmem:[#allocation2 + $0x1b0] ss:$2 sm:$0xff] }
 0x1d6   :  { %v2101_v46 = vmax.f32 %v2069_v43, 0.0  ;;  %v683_v47 = vld [vmem:[#allocation2 + $0x140] ss:$2 sm:$0xff]  ;;  %v747_v48 = vld [vmem:[#allocation2 + $0x141] ss:$2 sm:$0xff]  ;;  %v1540_v29 = vpop.f32.mrf.mxu1 }
 0x1d7   :  { %621 = vst.msk [vmem:[#allocation2 + $0x150] sm:$0xff] %vm578_vm2, %v556_v44  ;;  %v790_v49 = vmax.f32 %v683_v47, %v747_v48  ;;  %v691_v48 = vld [vmem:[#allocation2 + $0x180] ss:$2 sm:$0xff] }
 0x1d8   :  { %2133 = vst.msk [vmem:[#allocation3 + $0x50] sm:$0xff] %vm578_vm2, %v2101_v46 }
 0x1d9   :  { %v822_v51 = vrot.slane %v790_v49, 7  ;;  %v1113_v52 = vrot.slane %v790_v49, 1  ;;  %3279 = vmatmul.msk.f32.gmra.mxu1 %vm578_vm2, %v790_v49  ;;  %v755_v49 = vld [vmem:[#allocation2 + $0x181] ss:$2 sm:$0xff] }
 0x1da   :  { %v451_v53 = vpop.f32.mrf.mxu0 }
 0x1db   :  { %v452_v56 = vadd.f32 %v4255_v45, %v451_v53  ;;  %v848_v9 = vsel %vm836_vm4, %v821_v25, %v822_v51  ;;  %v1137_v20 = vsel %vm1125_vm3, %v1112_v24, %v1113_v52  ;;  %v1303_v53 = vpop.permute.xlu0 %1302 }
 0x1dc   :  { %v1081_v57 = vmul.f32 %v1004_v55, %v848_v9  ;;  %v1369_v58 = vmul.f32 %v1288_v54, %v1137_v20  ;;  %v1019_v9 = vpop.permute.xlu1 %1018 }
 0x1dd   :  { %v557_v61 = vmax.f32 %v452_v56, 0.0  ;;  %v794_v56 = vmax.f32 %v691_v48, %v755_v49  ;;  %v763_v48 = vld [vmem:[#allocation2 + $0x1c1] ss:$2 sm:$0xff] }
 0x1de   :  { %3311 = vmatmul.msk.f32.gmra.mxu2 %vm578_vm2, %v1081_v57  ;;  %3346 = vmatmul.msk.f32.gmra.mxu3 %vm578_vm2, %v1369_v58 }
 0x1df   :  { %622 = vst.msk [vmem:[#allocation2 + $0x158] sm:$0xff] %vm578_vm2, %v557_v61  ;;  %v826_v60 = vrot.slane %v794_v56, 7  ;;  %v1117_v62 = vrot.slane %v794_v56, 1 }
 0x1e1   :  { %v1960_v1 = vpop.f32.mrf.mxu3  ;;  %v1749_v25 = vpop.f32.mrf.mxu2 }
 0x1e2   :  { %v2034_v3 = vadd.f32 %v1960_v1, %v1747_v63  ;;  %v454_v4 = vpop.f32.mrf.mxu0  ;;  %v1750_v2 = vadd.f32 %v1749_v25, %v1540_v29  ;;  %v693_v1 = vld [vmem:[#allocation2 + $0x190] ss:$2 sm:$0xff] }
 0x1e3   :  { %v455_v5 = vadd.f32 %v4255_v45, %v454_v4  ;;  %v3367_v45 = vld [vmem:[%s5447_s7 + $0x50] sm:$0xff]  ;;  %v1308_v4 = vpop.permute.xlu2 %1307 }
 0x1e4   :  { %v2070_v6 = vadd.f32 %v4226_v0, %v2034_v3  ;;  %2329 = vmatpush.msra.mxu3 %v3367_v45  ;;  %v757_v3 = vld [vmem:[#allocation2 + $0x191] ss:$2 sm:$0xff]  ;;  %v695_v45 = vld [vmem:[#allocation2 + $0x1a0] ss:$2 sm:$0xff] }
 0x1e5   :  { %v558_v7 = vmax.f32 %v455_v5, 0.0 }
 0x1e6   :  { %v2102_v8 = vmax.f32 %v2070_v6, 0.0  ;;  %v685_v39 = vld [vmem:[#allocation2 + $0x150] ss:$2 sm:$0xff]  ;;  %v749_v10 = vld [vmem:[#allocation2 + $0x151] ss:$2 sm:$0xff]  ;;  %v1543_v61 = vpop.f32.mrf.mxu1 }
 0x1e7   :  { %623 = vst.msk [vmem:[#allocation2 + $0x160] sm:$0xff] %vm578_vm2, %v558_v7  ;;  %v791_v50 = vmax.f32 %v685_v39, %v749_v10  ;;  %v1024_v39 = vpop.permute.xlu0 %1023  ;;  %v795_v10 = vmax.f32 %v693_v1, %v757_v3 }
 0x1e8   :  { %2134 = vst.msk [vmem:[#allocation3 + $0x58] sm:$0xff] %vm578_vm2, %v2102_v8 }
 0x1e9   :  { %v823_v15 = vrot.slane %v791_v50, 7  ;;  %v1114_v17 = vrot.slane %v791_v50, 1  ;;  %3280 = vmatmul.msk.f32.gmra.mxu1 %vm578_vm2, %v791_v50 }
 0x1eb   :  { %v847_v19 = vsel %vm836_vm4, %v822_v51, %v823_v15  ;;  %v1136_v21 = vsel %vm1125_vm3, %v1113_v52, %v1114_v17  ;;  %v825_v51 = vrot.slane %v793_v42, 7  ;;  %v1116_v52 = vrot.slane %v793_v42, 1  ;;  %v1029_v25 = vpop.permute.xlu2 %1028 }
 0x1ec   :  { %v1082_v22 = vmul.f32 %v1009_v18, %v847_v19  ;;  %v1370_v24 = vmul.f32 %v1293_v13, %v1136_v21  ;;  %v759_v13 = vld [vmem:[#allocation2 + $0x1a1] ss:$2 sm:$0xff]  ;;  %v1118_v18 = vrot.slane %v795_v10, 1  ;;  %v1313_v19 = vpop.permute.xlu1 %1312 }
 0x1ed   :  { %v844_v6 = vsel %vm836_vm4, %v825_v51, %v826_v60  ;;  %v1133_v7 = vsel %vm1125_vm3, %v1116_v52, %v1117_v62  ;;  %v796_v21 = vmax.f32 %v695_v45, %v759_v13 }
 0x1ee   :  { %3312 = vmatmul.msk.f32.gmra.mxu2 %vm578_vm2, %v1082_v22  ;;  %3347 = vmatmul.msk.f32.gmra.mxu3 %vm578_vm2, %v1370_v24  ;;  %v687_v27 = vld [vmem:[#allocation2 + $0x160] ss:$2 sm:$0xff]  ;;  %v751_v28 = vld [vmem:[#allocation2 + $0x161] ss:$2 sm:$0xff]  ;;  %v1085_v11 = vmul.f32 %v1024_v39, %v844_v6  ;;  %v1373_v12 = vmul.f32 %v1308_v4, %v1133_v7  ;;  %v1132_v24 = vsel %vm1125_vm3, %v1117_v62, %v1118_v18  ;;  %v701_v62 = vld [vmem:[#allocation2 + $0x1d0] ss:$2 sm:$0xff] }
 0x1ef   :  { %v792_v30 = vmax.f32 %v687_v27, %v751_v28  ;;  %v1374_v28 = vmul.f32 %v1313_v19, %v1132_v24  ;;  %v1119_v29 = vrot.slane %v796_v21, 1  ;;  %v2188_v19 = vld [vmem:[%s5447_s7 + $0x8] sm:$0xff] }
 0x1f0   :  { %2269 = vmatpush.msra.mxu2 %v2188_v19 }
 0x1f1   :  { %v824_v33 = vrot.slane %v792_v30, 7  ;;  %v1115_v34 = vrot.slane %v792_v30, 1  ;;  %3281 = vmatmul.msk.f32.gmra.mxu1 %vm578_vm2, %v792_v30  ;;  %v1963_v36 = vpop.f32.mrf.mxu3  ;;  %v1752_v58 = vpop.f32.mrf.mxu2 }
 0x1f2   :  { %v2035_v37 = vadd.f32 %v1963_v36, %v1750_v2  ;;  %v1753_v63 = vadd.f32 %v1752_v58, %v1543_v61  ;;  %v828_v2 = vrot.slane %v796_v21, 7 }
 0x1f3   :  { %v846_v41 = vsel %vm836_vm4, %v823_v15, %v824_v33  ;;  %v1135_v26 = vsel %vm1125_vm3, %v1114_v17, %v1115_v34  ;;  %v845_v54 = vsel %vm836_vm4, %v824_v33, %v825_v51  ;;  %v1134_v55 = vsel %vm1125_vm3, %v1115_v34, %v1116_v52  ;;  %v1318_v34 = vpop.permute.xlu0 %1317  ;;  %v1323_v52 = vpop.permute.xlu2 %1322 }
 0x1f4   :  { %v2071_v43 = vadd.f32 %v4226_v0, %v2035_v37  ;;  %v1083_v44 = vmul.f32 %v1014_v40, %v846_v41  ;;  %v1371_v46 = vmul.f32 %v1298_v32, %v1135_v26  ;;  %v1084_v20 = vmul.f32 %v1019_v9, %v845_v54  ;;  %v761_v32 = vld [vmem:[#allocation2 + $0x1b1] ss:$2 sm:$0xff]  ;;  %v1034_v26 = vpop.permute.xlu1 %1033 }
 0x1f5   :  { %v1372_v57 = vmul.f32 %v1303_v53, %v1134_v55  ;;  %v827_v17 = vrot.slane %v795_v10, 7  ;;  %v1131_v40 = vsel %vm1125_vm3, %v1118_v18, %v1119_v29 }
 0x1f6   :  { %v2103_v47 = vmax.f32 %v2071_v43, 0.0  ;;  %3313 = vmatmul.msk.f32.gmra.mxu2 %vm578_vm2, %v1083_v44  ;;  %3348 = vmatmul.msk.f32.gmra.mxu3 %vm578_vm2, %v1371_v46  ;;  %v1546_v14 = vpop.f32.mrf.mxu1  ;;  %v1375_v46 = vmul.f32 %v1318_v34, %v1131_v40 }
 0x1f7   :  { %v843_v22 = vsel %vm836_vm4, %v826_v60, %v827_v17  ;;  %v842_v37 = vsel %vm836_vm4, %v827_v17, %v828_v2  ;;  %v767_v17 = vld [vmem:[#allocation2 + $0x1e1] ss:$2 sm:$0xff] }
 0x1f8   :  { %2135 = vst.msk [vmem:[#allocation3 + $0x60] sm:$0xff] %vm578_vm2, %v2103_v47  ;;  %v1086_v27 = vmul.f32 %v1029_v25, %v843_v22  ;;  %v1087_v44 = vmul.f32 %v1034_v26, %v842_v37  ;;  %v699_v47 = vld [vmem:[#allocation2 + $0x1c0] ss:$2 sm:$0xff] }
 0x1f9   :  { %3282 = vmatmul.msk.f32.gmra.mxu1 %vm578_vm2, %v793_v42  ;;  %v797_v42 = vmax.f32 %v697_v31, %v761_v32  ;;  %v3366_v22 = vld [vmem:[%s5447_s7 + $0x48] sm:$0xff] }
 0x1fa   :  { %2330 = vmatpush.msra.mxu3 %v3366_v22 }
 0x1fb   :  { %v829_v51 = vrot.slane %v797_v42, 7  ;;  %v1120_v53 = vrot.slane %v797_v42, 1  ;;  %v1039_v9 = vpop.permute.xlu0 %1038  ;;  %v1044_v7 = vpop.permute.xlu2 %1043 }
 0x1fc   :  { %v1328_v1 = vpop.permute.xlu1 %1327 }
 0x1fd   :  { %v841_v54 = vsel %vm836_vm4, %v828_v2, %v829_v51  ;;  %v1130_v55 = vsel %vm1125_vm3, %v1119_v29, %v1120_v53 }
 0x1fe   :  { %3314 = vmatmul.msk.f32.gmra.mxu2 %vm578_vm2, %v1084_v20  ;;  %3349 = vmatmul.msk.f32.gmra.mxu3 %vm578_vm2, %v1372_v57  ;;  %v1088_v20 = vmul.f32 %v1039_v9, %v841_v54  ;;  %v1376_v57 = vmul.f32 %v1323_v52, %v1130_v55 }
 0x201   :  { %3283 = vmatmul.msk.f32.gmra.mxu1 %vm578_vm2, %v794_v56  ;;  %v1966_v5 = vpop.f32.mrf.mxu3  ;;  %v1755_v30 = vpop.f32.mrf.mxu2  ;;  %v798_v56 = vmax.f32 %v699_v47, %v763_v48  ;;  %v1124_v48 = vrot.slane %v4017_v35, 1 }
 0x202   :  { %v2036_v8 = vadd.f32 %v1966_v5, %v1753_v63  ;;  %v1756_v33 = vadd.f32 %v1755_v30, %v1546_v14  ;;  %v765_v63 = vld [vmem:[#allocation2 + $0x1d1] ss:$2 sm:$0xff] }
 0x203   :  { %v1121_v58 = vrot.slane %v798_v56, 1  ;;  %v830_v60 = vrot.slane %v798_v56, 7  ;;  %v799_v6 = vmax.f32 %v701_v62, %v765_v63  ;;  %v1333_v24 = vpop.permute.xlu0 %1332  ;;  %v1338_v37 = vpop.permute.xlu2 %1337 }
 0x204   :  { %v2072_v50 = vadd.f32 %v4226_v0, %v2036_v8 }
 0x205   :  { %v1129_v5 = vsel %vm1125_vm3, %v1120_v53, %v1121_v58  ;;  %v840_v8 = vsel %vm836_vm4, %v829_v51, %v830_v60  ;;  %v1122_v45 = vrot.slane %v799_v6, 1  ;;  %v831_v13 = vrot.slane %v799_v6, 7 }
 0x206   :  { %v2104_v15 = vmax.f32 %v2072_v50, 0.0  ;;  %3315 = vmatmul.msk.f32.gmra.mxu2 %vm578_vm2, %v1085_v11  ;;  %3350 = vmatmul.msk.f32.gmra.mxu3 %vm578_vm2, %v1373_v12  ;;  %v1549_v3 = vpop.f32.mrf.mxu1  ;;  %v1377_v50 = vmul.f32 %v1328_v1, %v1129_v5  ;;  %v1089_v11 = vmul.f32 %v1044_v7, %v840_v8 }
 0x207   :  { %v1128_v25 = vsel %vm1125_vm3, %v1121_v58, %v1122_v45 }
 0x208   :  { %2136 = vst.msk [vmem:[#allocation3 + $0x68] sm:$0xff] %vm578_vm2, %v2104_v15  ;;  %v703_v15 = vld [vmem:[#allocation2 + $0x1e0] ss:$2 sm:$0xff]  ;;  %v1378_v30 = vmul.f32 %v1333_v24, %v1128_v25 }
 0x209   :  { %3284 = vmatmul.msk.f32.gmra.mxu1 %vm578_vm2, %v795_v10  ;;  %v800_v29 = vmax.f32 %v703_v15, %v767_v17  ;;  %v3365_v15 = vld [vmem:[%s5447_s7 + $0x40] sm:$0xff] }
 0x20a   :  { %2331 = vmatpush.msra.mxu3 %v3365_v15  ;;  %v4565_v15 = vld [vmem:[#allocation3 + $0xe] ss:$32 sm:$0x2] }
 0x20b   :  { %v832_v14 = vrot.slane %v800_v29, 7  ;;  %v1123_v31 = vrot.slane %v800_v29, 1  ;;  %5524 = vst [vmem:[#allocation9_spill] sm:$0xff] %v4565_v15  ;;  %v2465_v15 = vld [vmem:[#allocation3 + $0xa] ss:$32 sm:$0x4] }
 0x20d   :  { %v1127_v40 = vsel %vm1125_vm3, %v1122_v45, %v1123_v31  ;;  %v837_v51 = vsel %vm836_vm4, %v832_v14, %v833_v38  ;;  %v1126_v53 = vsel %vm1125_vm3, %v1123_v31, %v1124_v48  ;;  %v1157_v38 = vsel %vm1125_vm3, %v1124_v48, %v1093_v23  ;;  %v2187_v45 = vld [vmem:[%s5447_s7] sm:$0xff] }
 0x20e   :  { %3316 = vmatmul.msk.f32.gmra.mxu2 %vm578_vm2, %v1086_v27  ;;  %3351 = vmatmul.msk.f32.gmra.mxu3 %vm578_vm2, %v1374_v28  ;;  %v1049_v27 = vpop.permute.xlu1 %1048  ;;  %v839_v28 = vsel %vm836_vm4, %v830_v60, %v831_v13 }
 0x20f   :  { %v1090_v2 = vmul.f32 %v1049_v27, %v839_v28  ;;  %2270 = vmatpush.msra.mxu2 %v2187_v45  ;;  %v4561_v45 = vld [vmem:[#allocation3 + $0xc] ss:$32 sm:$0x2] }
 0x210   :  { %5522 = vst [vmem:[#allocation7_spill] sm:$0xff] %v4561_v45  ;;  %v4677_v45 = vld [vmem:[#allocation3 + $0x19] ss:$32 sm:$0x1] }
 0x211   :  { %3285 = vmatmul.msk.f32.gmra.mxu1 %vm578_vm2, %v796_v21  ;;  %v1969_v36 = vpop.f32.mrf.mxu3  ;;  %v1758_v61 = vpop.f32.mrf.mxu2  ;;  %v3360_v21 = vld [vmem:[%s5447_s7 + $0x28] sm:$0xff] }
 0x212   :  { %v2037_v41 = vadd.f32 %v1969_v36, %v1756_v33  ;;  %v1759_v4 = vadd.f32 %v1758_v61, %v1549_v3  ;;  %2246 = vmatpush.msra.mxu1 %v3360_v21  ;;  %v838_v36 = vsel %vm836_vm4, %v831_v13, %v832_v14  ;;  %v3359_v13 = vld [vmem:[%s5447_s7 + $0x20] sm:$0xff] }
 0x214   :  { %v2073_v43 = vadd.f32 %v4226_v0, %v2037_v41  ;;  %2247 = vmatpush.msra.mxu1 %v3359_v13  ;;  %v4563_v13 = vld [vmem:[#allocation3 + $0xd] ss:$32 sm:$0x2] }
 0x215   :  { %5523 = vst [vmem:[#allocation8_spill] sm:$0xff] %v4563_v13 }
 0x216   :  { %v2105_v49 = vmax.f32 %v2073_v43, 0.0  ;;  %3317 = vmatmul.msk.f32.gmra.mxu2 %vm578_vm2, %v1087_v44  ;;  %3352 = vmatmul.msk.f32.gmra.mxu3 %vm578_vm2, %v1375_v46  ;;  %v1552_v33 = vpop.f32.mrf.mxu1  ;;  %v1379_v44 = vmul.f32 %v1338_v37, %v1127_v40  ;;  %v1343_v52 = vpop.permute.xlu1 %1342 }
 0x217   :  { %v1380_v55 = vmul.f32 %v1343_v52, %v1126_v53 }
 0x218   :  { %2137 = vst.msk [vmem:[#allocation3 + $0x70] sm:$0xff] %vm578_vm2, %v2105_v49  ;;  %v1059_v49 = vpop.permute.xlu2 %1058 }
 0x219   :  { %3286 = vmatmul.msk.f32.gmra.mxu1 %vm578_vm2, %v797_v42  ;;  %v1054_v42 = vpop.permute.xlu0 %1053  ;;  %v1092_v54 = vmul.f32 %v1059_v49, %v837_v51 }
 0x21a   :  { %v1091_v43 = vmul.f32 %v1054_v42, %v838_v36 }
 0x21e   :  { %3318 = vmatmul.msk.f32.gmra.mxu2 %vm578_vm2, %v1088_v20  ;;  %3353 = vmatmul.msk.f32.gmra.mxu3 %vm578_vm2, %v1376_v57 }
 0x221   :  { %3287 = vmatmul.msk.f32.gmra.mxu1 %vm578_vm2, %v798_v56  ;;  %v1972_v39 = vpop.f32.mrf.mxu3  ;;  %v1761_v32 = vpop.f32.mrf.mxu2 }
 0x222   :  { %v2038_v10 = vadd.f32 %v1972_v39, %v1759_v4  ;;  %v1762_v34 = vadd.f32 %v1761_v32, %v1552_v33  ;;  %v1348_v57 = vpop.permute.xlu0 %1347 }
 0x223   :  { %v1381_v61 = vmul.f32 %v1348_v57, %v1157_v38  ;;  %v4520_v57 = vld [vmem:[#allocation3 + $0x3] ss:$32 sm:$0x2] }
 0x224   :  { %v2074_v12 = vadd.f32 %v4226_v0, %v2038_v10 }
 0x226   :  { %v2106_v18 = vmax.f32 %v2074_v12, 0.0  ;;  %3319 = vmatmul.msk.f32.gmra.mxu2 %vm578_vm2, %v1089_v11  ;;  %3354 = vmatmul.msk.f32.gmra.mxu3 %vm578_vm2, %v1377_v50  ;;  %v1555_v9 = vpop.f32.mrf.mxu1 }
 0x228   :  { %2138 = vst.msk [vmem:[#allocation3 + $0x78] sm:$0xff] %vm578_vm2, %v2106_v18 }
 0x229   :  { %3288 = vmatmul.msk.f32.gmra.mxu1 %vm578_vm2, %v799_v6 }
 0x22e   :  { %3320 = vmatmul.msk.f32.gmra.mxu2 %vm578_vm2, %v1090_v2  ;;  %3355 = vmatmul.msk.f32.gmra.mxu3 %vm578_vm2, %v1378_v30 }
 0x231   :  { %3289 = vmatmul.msk.f32.gmra.mxu1 %vm578_vm2, %v800_v29  ;;  %v1975_v41 = vpop.f32.mrf.mxu3  ;;  %v1764_v56 = vpop.f32.mrf.mxu2 }
 0x232   :  { %v2039_v26 = vadd.f32 %v1975_v41, %v1762_v34  ;;  %v1765_v20 = vadd.f32 %v1764_v56, %v1555_v9 }
 0x234   :  { %v2075_v46 = vadd.f32 %v4226_v0, %v2039_v26 }
 0x236   :  { %v2107_v47 = vmax.f32 %v2075_v46, 0.0  ;;  %3321 = vmatmul.msk.f32.gmra.mxu2 %vm578_vm2, %v1091_v43  ;;  %3356 = vmatmul.msk.f32.gmra.mxu3 %vm578_vm2, %v1379_v44  ;;  %v1558_v1 = vpop.f32.mrf.mxu1 }
 0x238   :  { %2139 = vst.msk [vmem:[#allocation3 + $0x80] sm:$0xff] %vm578_vm2, %v2107_v47 }
 0x239   :  { %3290 = vmatmul.msk.f32.gmra.mxu1 %vm578_vm2, %v4017_v35 }
 0x23e   :  { %3322 = vmatmul.msk.f32.gmra.mxu2 %vm578_vm2, %v1092_v54  ;;  %3357 = vmatmul.msk.f32.gmra.mxu3 %vm578_vm2, %v1380_v55 }
 0x241   :  { %v1978_v58 = vpop.f32.mrf.mxu3  ;;  %v1767_v63 = vpop.f32.mrf.mxu2 }
 0x242   :  { %v2040_v60 = vadd.f32 %v1978_v58, %v1765_v20  ;;  %v1768_v3 = vadd.f32 %v1767_v63, %v1558_v1  ;;  %v4518_v20 = vld [vmem:[#allocation3 + $0x2] ss:$32 sm:$0x2]  ;;  %v4522_v58 = vld [vmem:[#allocation3] ss:$32 sm:$0x2] }
 0x243   :  { %v4533_v63 = vld [vmem:[#allocation3 + $0x6] ss:$32 sm:$0x2]  ;;  %v4535_v1 = vld [vmem:[#allocation3 + $0x7] ss:$32 sm:$0x2] }
 0x244   :  { %v2076_v35 = vadd.f32 %v4226_v0, %v2040_v60  ;;  %v4524_v60 = vld [vmem:[#allocation3 + $0x1] ss:$32 sm:$0x2] }
 0x246   :  { %v2108_v62 = vmax.f32 %v2076_v35, 0.0  ;;  %3358 = vmatmul.msk.f32.gmra.mxu3 %vm578_vm2, %v1381_v61  ;;  %v1561_v23 = vpop.f32.mrf.mxu1  ;;  %v4527_v61 = vld [vmem:[#allocation3 + $0x2] ss:$32 sm:$0x1] }
 0x247   :  { %v4529_v35 = vld [vmem:[#allocation3 + $0x4] ss:$32 sm:$0x2] }
 0x248   :  { %2140 = vst.msk [vmem:[#allocation3 + $0x88] sm:$0xff] %vm578_vm2, %v2108_v62  ;;  %v4531_v62 = vld [vmem:[#allocation3 + $0x5] ss:$32 sm:$0x2] }
 0x251   :  { %v1981_v4 = vpop.f32.mrf.mxu3  ;;  %v1770_v0 = vpop.f32.mrf.mxu2 }
 0x252   :  { %v2041_v5 = vadd.f32 %v1981_v4, %v1768_v3  ;;  %v1771_v8 = vadd.f32 %v1770_v0, %v1561_v23  ;;  %v4543_v23 = vld [vmem:[#allocation3 + $0x1] ss:$32 sm:$0x1]  ;;  %v4547_v0 = vld [vmem:[#allocation3 + $0x9] ss:$32 sm:$0x2] }
 0x253   :  { %5519 = vst [vmem:[#allocation4_spill] sm:$0xff] %v4547_v0  ;;  %v2403_v0 = vld [vmem:[#allocation3 + $0x8] ss:$32 sm:$0x4] }
 0x254   :  { %v2077_v16 = vadd.f32 %v4492_v59, %v2041_v5  ;;  %v4539_v5 = vld [vmem:[#allocation3 + $0x3] ss:$32 sm:$0x1] }
 0x256   :  { %v2109_v6 = vmax.f32 %v2077_v16, 0.0  ;;  %v1564_v7 = vpop.f32.mrf.mxu1  ;;  %v4541_v16 = vld [vmem:[#allocation3] ss:$32 sm:$0x1] }
 0x258   :  { %2141 = vst.msk [vmem:[#allocation3 + $0x90] sm:$0xff] %vm578_vm2, %v2109_v6  ;;  %v4545_v6 = vld [vmem:[#allocation3 + $0x8] ss:$32 sm:$0x2] }
 0x261   :  { %v1984_v39 = vpop.f32.mrf.mxu3  ;;  %v1773_v17 = vpop.f32.mrf.mxu2 }
 0x262   :  { %v2042_v10 = vadd.f32 %v1984_v39, %v1771_v8  ;;  %v1774_v19 = vadd.f32 %v1773_v17, %v1564_v7  ;;  %v4549_v7 = vld [vmem:[#allocation3 + $0xa] ss:$32 sm:$0x2]  ;;  %v4551_v39 = vld [vmem:[#allocation3 + $0x4] ss:$32 sm:$0x1] }
 0x263   :  { %5520 = vst [vmem:[#allocation5_spill] sm:$0xff] %v4549_v7  ;;  %v4662_v17 = vld [vmem:[#allocation3 + $0x1d] ss:$32 sm:$0x2] }
 0x264   :  { %v2078_v50 = vadd.f32 %v4492_v59, %v2042_v10  ;;  %v4553_v10 = vld [vmem:[#allocation3 + $0x5] ss:$32 sm:$0x1] }
 0x265   :  { %v2295_v7 = vld [vmem:[#allocation3 + $0x5] ss:$32 sm:$0x4] }
 0x266   :  { %v2110_v11 = vmax.f32 %v2078_v50, 0.0  ;;  %v1567_v12 = vpop.f32.mrf.mxu1  ;;  %v4555_v50 = vld [vmem:[#allocation3 + $0x6] ss:$32 sm:$0x1] }
 0x268   :  { %2142 = vst.msk [vmem:[#allocation3 + $0x98] sm:$0xff] %vm578_vm2, %v2110_v11  ;;  %v4557_v11 = vld [vmem:[#allocation3 + $0x7] ss:$32 sm:$0x1] }
 0x26e   :  { %v1570_v18 = vpop.f32.mrf.mxu1 }
 0x271   :  { %v1776_v21 = vpop.f32.mrf.mxu2  ;;  %v1987_v22 = vpop.f32.mrf.mxu3 }
 0x272   :  { %v2043_v24 = vadd.f32 %v1987_v22, %v1774_v19  ;;  %v1777_v29 = vadd.f32 %v1776_v21, %v1567_v12  ;;  %v4559_v12 = vld [vmem:[#allocation3 + $0xb] ss:$32 sm:$0x2]  ;;  %v4571_v19 = vld [vmem:[#allocation3 + $0x9] ss:$32 sm:$0x1] }
 0x273   :  { %5521 = vst [vmem:[#allocation6_spill] sm:$0xff] %v4559_v12  ;;  %v4573_v21 = vld [vmem:[#allocation3 + $0xa] ss:$32 sm:$0x1] }
 0x274   :  { %v2079_v25 = vadd.f32 %v4492_v59, %v2043_v24  ;;  %5526 = vst [vmem:[#allocation11_spill] sm:$0xff] %v4571_v19  ;;  %v4575_v22 = vld [vmem:[#allocation3 + $0xf] ss:$32 sm:$0x2] }
 0x275   :  { %5527 = vst [vmem:[#allocation12_spill] sm:$0xff] %v4573_v21  ;;  %v4577_v24 = vld [vmem:[#allocation3 + $0x10] ss:$32 sm:$0x2] }
 0x276   :  { %v2111_v27 = vmax.f32 %v2079_v25, 0.0  ;;  %v1573_v28 = vpop.f32.mrf.mxu1  ;;  %5528 = vst [vmem:[#allocation13_spill] sm:$0xff] %v4575_v22  ;;  %v4579_v25 = vld [vmem:[#allocation3 + $0x11] ss:$32 sm:$0x2] }
 0x277   :  { %5529 = vst [vmem:[#allocation14_spill] sm:$0xff] %v4577_v24  ;;  %v2279_v21 = vld [vmem:[#allocation3 + $0x4] ss:$32 sm:$0x4] }
 0x278   :  { %2143 = vst.msk [vmem:[#allocation3 + $0xa0] sm:$0xff] %vm578_vm2, %v2111_v27  ;;  %v2341_v19 = vld [vmem:[#allocation3 + $0x6] ss:$32 sm:$0x4] }
 0x279   :  { %v1779_v30 = vpop.f32.mrf.mxu2  ;;  %v1990_v2 = vpop.f32.mrf.mxu3  ;;  %5530 = vst [vmem:[#allocation15_spill] sm:$0xff] %v4579_v25  ;;  %v4693_v25 = vld [vmem:[#allocation3 + $0x1d] ss:$32 sm:$0x1] }
 0x27a   :  { %v2044_v14 = vadd.f32 %v1990_v2, %v1777_v29  ;;  %v1780_v33 = vadd.f32 %v1779_v30, %v1570_v18  ;;  %v4569_v18 = vld [vmem:[#allocation3 + $0x8] ss:$32 sm:$0x1]  ;;  %v4588_v2 = vld [vmem:[#allocation3 + $0xb] ss:$32 sm:$0x1] }
 0x27b   :  { %5525 = vst [vmem:[#allocation10_spill] sm:$0xff] %v4569_v18  ;;  %v4656_v30 = vld [vmem:[#allocation3 + $0x16] ss:$32 sm:$0x1] }
 0x27c   :  { %v2080_v31 = vadd.f32 %v4492_v59, %v2044_v14  ;;  %5531 = vst [vmem:[#allocation16_spill] sm:$0xff] %v4588_v2  ;;  %v4590_v14 = vld [vmem:[#allocation3 + $0xc] ss:$32 sm:$0x1] }
 0x27d   :  { %5532 = vst [vmem:[#allocation17_spill] sm:$0xff] %v4590_v14  ;;  %v4658_v29 = vld [vmem:[#allocation3 + $0x17] ss:$32 sm:$0x1] }
 0x27e   :  { %v2112_v32 = vmax.f32 %v2080_v31, 0.0  ;;  %v1576_v34 = vpop.f32.mrf.mxu1  ;;  %v4592_v31 = vld [vmem:[#allocation3 + $0xd] ss:$32 sm:$0x1]  ;;  %5544 = vst [vmem:[#allocation29_spill] sm:$0xff] %v4658_v29 }
 0x27f   :  { %5533 = vst [vmem:[#allocation18_spill] sm:$0xff] %v4592_v31  ;;  %v2211_v31 = vld [vmem:[#allocation3 + $0x3] ss:$32 sm:$0x4] }
 0x280   :  { %2144 = vst.msk [vmem:[#allocation3 + $0xa8] sm:$0xff] %vm578_vm2, %v2112_v32  ;;  %v4594_v32 = vld [vmem:[#allocation3 + $0xe] ss:$32 sm:$0x1] }
 0x281   :  { %v1782_v36 = vpop.f32.mrf.mxu2  ;;  %v1993_v37 = vpop.f32.mrf.mxu3  ;;  %5534 = vst [vmem:[#allocation19_spill] sm:$0xff] %v4594_v32  ;;  %v2174_v32 = vld [vmem:[#allocation3 + $0x1] ss:$32 sm:$0x4] }
 0x282   :  { %v2045_v40 = vadd.f32 %v1993_v37, %v1780_v33  ;;  %v1783_v42 = vadd.f32 %v1782_v36, %v1573_v28  ;;  %v4596_v33 = vld [vmem:[#allocation3 + $0x12] ss:$32 sm:$0x2]  ;;  %v4600_v36 = vld [vmem:[#allocation3 + $0x14] ss:$32 sm:$0x2] }
 0x283   :  { %5535 = vst [vmem:[#allocation20_spill] sm:$0xff] %v4600_v36  ;;  %v4602_v37 = vld [vmem:[#allocation3 + $0x15] ss:$32 sm:$0x2]  ;;  %v5553_v36 = vor.u32 %v4524_v60, %v4543_v23 }
 0x284   :  { %v2081_v41 = vadd.f32 %v4492_v59, %v2045_v40  ;;  %5536 = vst [vmem:[#allocation21_spill] sm:$0xff] %v4602_v37  ;;  %v4660_v28 = vld [vmem:[#allocation3 + $0x18] ss:$32 sm:$0x1] }
 0x285   :  { %5545 = vst [vmem:[#allocation30_spill] sm:$0xff] %v4660_v28  ;;  %v2158_v40 = vld [vmem:[#allocation3] ss:$32 sm:$0x4] }
 0x286   :  { %v2113_v26 = vmax.f32 %v2081_v41, 0.0  ;;  %v1579_v46 = vpop.f32.mrf.mxu1  ;;  %v2195_v41 = vld [vmem:[#allocation3 + $0x2] ss:$32 sm:$0x4] }
 0x287   :  { %v4679_v2 = vld [vmem:[#allocation3 + $0x1a] ss:$32 sm:$0x1]  ;;  %v4697_v24 = vld [vmem:[#allocation3 + $0x1f] ss:$32 sm:$0x1] }
 0x288   :  { %2145 = vst.msk [vmem:[#allocation3 + $0xb0] sm:$0xff] %vm578_vm2, %v2113_v26  ;;  %v4644_v26 = vld [vmem:[#allocation3 + $0x1b] ss:$32 sm:$0x2] }
 0x289   :  { %v1785_v43 = vpop.f32.mrf.mxu2  ;;  %v1996_v44 = vpop.f32.mrf.mxu3  ;;  %5549 = vst [vmem:[#allocation34_spill] sm:$0xff] %v4697_v24  ;;  %v2357_v22 = vld [vmem:[#allocation3 + $0x7] ss:$32 sm:$0x4] }
 0x28a   :  { %v2046_v47 = vadd.f32 %v1996_v44, %v1783_v42  ;;  %v1786_v51 = vadd.f32 %v1785_v43, %v1576_v34  ;;  %v4598_v34 = vld [vmem:[#allocation3 + $0x13] ss:$32 sm:$0x2]  ;;  %v4612_v43 = vld [vmem:[#allocation3 + $0xf] ss:$32 sm:$0x1] }
 0x28b   :  { %5537 = vst [vmem:[#allocation22_spill] sm:$0xff] %v4612_v43  ;;  %v4614_v44 = vld [vmem:[#allocation3 + $0x10] ss:$32 sm:$0x1] }
 0x28c   :  { %v2082_v48 = vadd.f32 %v4492_v59, %v2046_v47  ;;  %5538 = vst [vmem:[#allocation23_spill] sm:$0xff] %v4614_v44  ;;  %v4618_v47 = vld [vmem:[#allocation3 + $0x16] ss:$32 sm:$0x2] }
 0x28d   :  { %v4640_v42 = vld [vmem:[#allocation3 + $0x19] ss:$32 sm:$0x2]  ;;  %v4695_v44 = vld [vmem:[#allocation3 + $0x1e] ss:$32 sm:$0x1] }
 0x28e   :  { %v2114_v49 = vmax.f32 %v2082_v48, 0.0  ;;  %v4515_v55 = vpop.f32.mrf.mxu1  ;;  %v4620_v48 = vld [vmem:[#allocation3 + $0x17] ss:$32 sm:$0x2]  ;;  %5548 = vst [vmem:[#allocation33_spill] sm:$0xff] %v4695_v44  ;;  %v4738_v44 = vor.u32 %v2174_v32, %v5553_v36 }
 0x28f   :  { %5540 = vst [vmem:[#allocation25_spill] sm:$0xff] %v4620_v48  ;;  %v2419_v18 = vld [vmem:[#allocation3 + $0x9] ss:$32 sm:$0x4] }
 0x290   :  { %2146 = vst.msk [vmem:[#allocation3 + $0xb8] sm:$0xff] %vm578_vm2, %v2114_v49  ;;  %v4622_v49 = vld [vmem:[#allocation3 + $0x18] ss:$32 sm:$0x2] }
 0x291   :  { %v1788_v52 = vpop.f32.mrf.mxu2  ;;  %v1999_v53 = vpop.f32.mrf.mxu3  ;;  %v2527_v37 = vld [vmem:[#allocation3 + $0xc] ss:$32 sm:$0x4]  ;;  %v2589_v29 = vld [vmem:[#allocation3 + $0xe] ss:$32 sm:$0x4] }
 0x292   :  { %v2047_v54 = vadd.f32 %v1999_v53, %v1786_v51  ;;  %v1789_v38 = vadd.f32 %v1788_v52, %v1579_v46  ;;  %v4616_v46 = vld [vmem:[#allocation3 + $0x11] ss:$32 sm:$0x1]  ;;  %v4646_v53 = vld [vmem:[#allocation3 + $0x1c] ss:$32 sm:$0x2] }
 0x293   :  { %5539 = vst [vmem:[#allocation24_spill] sm:$0xff] %v4616_v46  ;;  %v2605_v48 = vld [vmem:[#allocation3 + $0xf] ss:$32 sm:$0x4] }
 0x294   :  { %v2083_v56 = vadd.f32 %v4492_v59, %v2047_v54  ;;  %v4666_v54 = vld [vmem:[#allocation3 + $0x1f] ss:$32 sm:$0x2]  ;;  %v2651_v46 = vld [vmem:[#allocation3 + $0x10] ss:$32 sm:$0x4] }
 0x295   :  { %v2713_v24 = vld [vmem:[#allocation3 + $0x12] ss:$32 sm:$0x4]  ;;  %v2775_v23 = vld [vmem:[#allocation3 + $0x14] ss:$32 sm:$0x4] }
 0x296   :  { %v2115_v9 = vmax.f32 %v2083_v56, 0.0  ;;  %v4624_v51 = vpop.f32.mrf.mxu1  ;;  %v2837_v32 = vld [vmem:[#allocation3 + $0x16] ss:$32 sm:$0x4] }
 0x297   :  { %5541 = vst [vmem:[#allocation26_spill] sm:$0xff] %v4624_v51  ;;  %v4664_v51 = vld [vmem:[#allocation3 + $0x1e] ss:$32 sm:$0x2] }
 0x298   :  { %2147 = vst.msk [vmem:[#allocation3 + $0xc0] sm:$0xff] %vm578_vm2, %v2115_v9  ;;  %v4632_v9 = vld [vmem:[#allocation3 + $0x12] ss:$32 sm:$0x1] }
 0x299   :  { %v4537_v3 = vpop.f32.mrf.mxu2  ;;  %v2002_v4 = vpop.f32.mrf.mxu3 }
 0x29a   :  { %v2048_v8 = vadd.f32 %v2002_v4, %v1789_v38  ;;  %v4634_v38 = vld [vmem:[#allocation3 + $0x13] ss:$32 sm:$0x1]  ;;  %v4636_v4 = vld [vmem:[#allocation3 + $0x14] ss:$32 sm:$0x1]  ;;  %v1792_v56 = vadd.f32 %v4537_v3, %v4515_v55 }
 0x29b   :  { %5542 = vst [vmem:[#allocation27_spill] sm:$0xff] %v4636_v4  ;;  %v4681_v55 = vld [vmem:[#allocation3 + $0x1b] ss:$32 sm:$0x1] }
 0x29c   :  { %v2084_v27 = vadd.f32 %v4492_v59, %v2048_v8  ;;  %v4638_v8 = vld [vmem:[#allocation3 + $0x15] ss:$32 sm:$0x1]  ;;  %5546 = vst [vmem:[#allocation31_spill] sm:$0xff] %v4681_v55 }
 0x29d   :  { %5543 = vst [vmem:[#allocation28_spill] sm:$0xff] %v4638_v8  ;;  %v4683_v3 = vld [vmem:[#allocation3 + $0x1c] ss:$32 sm:$0x1] }
 0x29e   :  { %v2116_v52 = vmax.f32 %v2084_v27, 0.0  ;;  %v4642_v27 = vld [vmem:[#allocation3 + $0x1a] ss:$32 sm:$0x2]  ;;  %5547 = vst [vmem:[#allocation32_spill] sm:$0xff] %v4683_v3  ;;  %v5552_v3 = vor.u32 %v4522_v58, %v4541_v16  ;;  %v5557_v16 = vor.u32 %v4533_v63, %v4555_v50  ;;  %v5568_v63 = vld [vmem:[#allocation5_spill] sm:$0xff] }
 0x29f   :  { %v2481_v8 = vld [vmem:[#allocation3 + $0xb] ss:$32 sm:$0x4]  ;;  %v2543_v4 = vld [vmem:[#allocation3 + $0xd] ss:$32 sm:$0x4] }
 0x2a0   :  { %2148 = vst.msk [vmem:[#allocation3 + $0xc8] sm:$0xff] %vm578_vm2, %v2116_v52  ;;  %v4733_v28 = vor.u32 %v2158_v40, %v5552_v3  ;;  %v4753_v60 = vor.u32 %v2341_v19, %v5557_v16  ;;  %v5569_v50 = vld [vmem:[#allocation12_spill] sm:$0xff] }
 0x2a1   :  { %v1794_v52 = vpop.f32.mrf.mxu2  ;;  %v2005_v12 = vpop.f32.mrf.mxu3  ;;  %v5570_v19 = vor.u32 %v5568_v63, %v5569_v50  ;;  %v2961_v50 = vld [vmem:[#allocation3 + $0x1a] ss:$32 sm:$0x4] }
 0x2a2   :  { %v2049_v43 = vadd.f32 %v2005_v12, %v1792_v56  ;;  %v5550_v56 = vor.u32 %v4518_v20, %v4527_v61  ;;  %v2667_v12 = vld [vmem:[#allocation3 + $0x11] ss:$32 sm:$0x4]  ;;  %v2729_v20 = vld [vmem:[#allocation3 + $0x13] ss:$32 sm:$0x4] }
 0x2a3   :  { %5558 = vst [vmem:[#allocation36_spill] sm:$0xff] %v4753_v60  ;;  %v4773_v3 = vor.u32 %v2465_v15, %v5570_v19  ;;  %v3383_v15 = vld [vmem:[%s5447_s7 + $0xb8] sm:$0xff]  ;;  %v4829_v60 = vld [vmem:[#allocation3 + $0x2] ss:$32 sm:$0x8] }
 0x2a4   :  { %v2085_v14 = vadd.f32 %v4492_v59, %v2049_v43  ;;  %v4723_v55 = vor.u32 %v2195_v41, %v5550_v56  ;;  %v5551_v43 = vor.u32 %v4520_v57, %v4539_v5  ;;  %v5554_v41 = vor.u32 %v4529_v35, %v4551_v39  ;;  %v5561_v35 = vld [vmem:[#allocation10_spill] sm:$0xff]  ;;  %v2977_v19 = vld [vmem:[#allocation3 + $0x1b] ss:$32 sm:$0x4]  ;;  %2514 = vmatpush.msrb.mxu3 %v3383_v15 }
 0x2a5   :  { %v5555_v5 = vor.u32 %v4531_v62, %v4553_v10  ;;  %v5562_v39 = vor.u32 %v4545_v6, %v5561_v35  ;;  %v5564_v62 = vld [vmem:[#allocation4_spill] sm:$0xff]  ;;  %v2853_v56 = vld [vmem:[#allocation3 + $0x17] ss:$32 sm:$0x4]  ;;  %v3378_v6 = vld [vmem:[%s5447_s7 + $0x98] sm:$0xff] }
 0x2a6   :  { %v4728_v13 = vor.u32 %v2211_v31, %v5551_v43  ;;  %v2117_v61 = vmax.f32 %v2085_v14, 0.0  ;;  %v4743_v57 = vor.u32 %v2279_v21, %v5554_v41  ;;  %v2791_v31 = vld [vmem:[#allocation3 + $0x15] ss:$32 sm:$0x4]  ;;  %v5559_v14 = vor.u32 %v4535_v1, %v4557_v11  ;;  %v4775_v11 = vpop.f32.mrf.mxu1  ;;  %v5578_v35 = vld [vmem:[#allocation17_spill] sm:$0xff]  ;;  %2452 = vmatpush.msrb.mxu2 %v3378_v6 }
 0x2a7   :  { %v4748_v58 = vor.u32 %v2295_v7, %v5555_v5  ;;  %v4763_v21 = vor.u32 %v2403_v0, %v5562_v39  ;;  %v5565_v7 = vld [vmem:[#allocation11_spill] sm:$0xff]  ;;  %v5574_v5 = vld [vmem:[#allocation16_spill] sm:$0xff]  ;;  %v5590_v6 = vld [vmem:[#allocation22_spill] sm:$0xff] }
 0x2a8   :  { %v4758_v36 = vor.u32 %v2357_v22, %v5559_v14  ;;  %v5566_v10 = vor.u32 %v5564_v62, %v5565_v7  ;;  %5571 = vst [vmem:[#allocation11_spill] sm:$0xff] %v4773_v3  ;;  %v2899_v43 = vld [vmem:[#allocation3 + $0x18] ss:$32 sm:$0x4]  ;;  %v5572_v22 = vld [vmem:[#allocation26_spill] sm:$0xff]  ;;  %v5581_v62 = vld [vmem:[#allocation8_spill] sm:$0xff] }
 0x2a9   :  { %5556 = vst [vmem:[#allocation35_spill] sm:$0xff] %v4748_v58  ;;  %v2915_v1 = vld [vmem:[#allocation3 + $0x19] ss:$32 sm:$0x4]  ;;  %v1795_v41 = vadd.f32 %v1794_v52, %v5572_v22  ;;  %v5582_v7 = vld [vmem:[#allocation18_spill] sm:$0xff]  ;;  %v4803_v3 = vpop.f32.mrf.mxu2 }
 0x2aa   :  { %5560 = vst [vmem:[#allocation37_spill] sm:$0xff] %v4758_v36  ;;  %v4768_v40 = vor.u32 %v2419_v18, %v5566_v10  ;;  %v3373_v0 = vld [vmem:[%s5447_s7 + $0x78] sm:$0xff]  ;;  %v5573_v18 = vld [vmem:[#allocation6_spill] sm:$0xff]  ;;  %v5583_v10 = vor.u32 %v5581_v62, %v5582_v7  ;;  %v4831_v58 = vld [vmem:[#allocation3 + $0x3] ss:$32 sm:$0x8] }
 0x2ab   :  { %5563 = vst [vmem:[#allocation10_spill] sm:$0xff] %v4763_v21  ;;  %v5575_v16 = vor.u32 %v5573_v18, %v5574_v5  ;;  %v5577_v52 = vld [vmem:[#allocation7_spill] sm:$0xff]  ;;  %2390 = vmatpush.msrb.mxu1 %v3373_v0  ;;  %v5585_v18 = vld [vmem:[#allocation9_spill] sm:$0xff]  ;;  %v5593_v62 = vld [vmem:[#allocation14_spill] sm:$0xff] }
 0x2ac   :  { %5567 = vst [vmem:[#allocation4_spill] sm:$0xff] %v4768_v40  ;;  %v4801_v63 = vor.u32 %v2543_v4, %v5583_v10  ;;  %v3023_v22 = vld [vmem:[#allocation3 + $0x1c] ss:$32 sm:$0x4]  ;;  %v2008_v40 = vpop.f32.mrf.mxu3  ;;  %v3382_v4 = vld [vmem:[%s5447_s7 + $0xb0] sm:$0xff] }
 0x2ad   :  { %2149 = vst.msk [vmem:[#allocation3 + $0xd0] sm:$0xff] %vm578_vm2, %v2117_v61  ;;  %v4791_v14 = vor.u32 %v2481_v8, %v5575_v16  ;;  %v5579_v61 = vor.u32 %v5577_v52, %v5578_v35  ;;  %v3377_v8 = vld [vmem:[%s5447_s7 + $0x90] sm:$0xff]  ;;  %v5586_v5 = vld [vmem:[#allocation19_spill] sm:$0xff]  ;;  %v5589_v35 = vld [vmem:[#allocation13_spill] sm:$0xff]  ;;  %v2050_v36 = vadd.f32 %v2008_v40, %v1795_v41  ;;  %v5603_v41 = vor.u32 %v4598_v34, %v4634_v38 }
 0x2ae   :  { %5584 = vst [vmem:[#allocation26_spill] sm:$0xff] %v4801_v63  ;;  %v5587_v16 = vor.u32 %v5585_v18, %v5586_v5  ;;  %v5591_v0 = vor.u32 %v5589_v35, %v5590_v6  ;;  %v5594_v7 = vld [vmem:[#allocation23_spill] sm:$0xff]  ;;  %v5598_v5 = vld [vmem:[#allocation24_spill] sm:$0xff]  ;;  %v5601_v35 = vor.u32 %v4596_v33, %v4632_v9  ;;  %2453 = vmatpush.msrb.mxu2 %v3377_v8  ;;  %v3381_v8 = vld [vmem:[%s5447_s7 + $0xa8] sm:$0xff] }
 0x2af   :  { %5576 = vst [vmem:[#allocation5_spill] sm:$0xff] %v4791_v14  ;;  %v4796_v39 = vor.u32 %v2527_v37, %v5579_v61  ;;  %v3372_v37 = vld [vmem:[%s5447_s7 + $0x70] sm:$0xff]  ;;  %v5595_v10 = vor.u32 %v5593_v62, %v5594_v7  ;;  %v3085_v14 = vld [vmem:[#allocation3 + $0x1e] ss:$32 sm:$0x4]  ;;  %v4851_v6 = vor.u32 %v2729_v20, %v5603_v41  ;;  %v5604_v62 = vld [vmem:[#allocation20_spill] sm:$0xff]  ;;  %v5611_v34 = vor.u32 %v4618_v47, %v4656_v30 }
 0x2b0   :  { %v4817_v52 = vor.u32 %v2589_v29, %v5587_v16  ;;  %v4822_v61 = vor.u32 %v2605_v48, %v5591_v0  ;;  %v3101_v21 = vld [vmem:[#allocation3 + $0x1f] ss:$32 sm:$0x4]  ;;  %v4833_v29 = vld [vmem:[#allocation3] ss:$32 sm:$0x8]  ;;  %v4846_v40 = vor.u32 %v2713_v24, %v5601_v35  ;;  %2391 = vmatpush.msrb.mxu1 %v3372_v37  ;;  %v2086_v20 = vadd.f32 %v4492_v59, %v2050_v36 }
 0x2b1   :  { %5580 = vst [vmem:[#allocation12_spill] sm:$0xff] %v4796_v39  ;;  %v4827_v63 = vor.u32 %v2651_v46, %v5595_v10  ;;  %v3039_v39 = vld [vmem:[#allocation3 + $0x1d] ss:$32 sm:$0x4]  ;;  %v3376_v48 = vld [vmem:[%s5447_s7 + $0x88] sm:$0xff]  ;;  %v5609_v33 = vld [vmem:[#allocation28_spill] sm:$0xff]  ;;  %v4870_v38 = vor.u32 %v2837_v32, %v5611_v34  ;;  %2515 = vmatpush.msrb.mxu3 %v3382_v4 }
 0x2b2   :  { %5588 = vst [vmem:[#allocation6_spill] sm:$0xff] %v4817_v52  ;;  %v5597_v18 = vld [vmem:[#allocation15_spill] sm:$0xff]  ;;  %v4853_v15 = vld [vmem:[#allocation3 + $0x1] ss:$32 sm:$0x8]  ;;  %v5615_v47 = vld [vmem:[#allocation25_spill] sm:$0xff]  ;;  %2454 = vmatpush.msrb.mxu2 %v3376_v48 }
 0x2b3   :  { %5592 = vst [vmem:[#allocation16_spill] sm:$0xff] %v4822_v61  ;;  %v5599_v16 = vor.u32 %v5597_v18, %v5598_v5  ;;  %v4855_v0 = vld [vmem:[#allocation3 + $0x4] ss:$32 sm:$0x8]  ;;  %v5605_v7 = vld [vmem:[#allocation27_spill] sm:$0xff]  ;;  %v5608_v18 = vld [vmem:[#allocation21_spill] sm:$0xff]  ;;  %2516 = vmatpush.msrb.mxu3 %v3381_v8 }
 0x2b4   :  { %5596 = vst [vmem:[#allocation7_spill] sm:$0xff] %v4827_v63  ;;  %v5610_v24 = vor.u32 %v5608_v18, %v5609_v33  ;;  %v4873_v5 = vld [vmem:[#allocation3 + $0x5] ss:$32 sm:$0x8]  ;;  %v5616_v32 = vld [vmem:[#allocation29_spill] sm:$0xff]  ;;  %v5619_v4 = vld [vmem:[#allocation30_spill] sm:$0xff] }
 0x2b5   :  { %v4841_v46 = vor.u32 %v2667_v12, %v5599_v16  ;;  %5602 = vst [vmem:[#allocation8_spill] sm:$0xff] %v4846_v40  ;;  %v5606_v12 = vor.u32 %v5604_v62, %v5605_v7  ;;  %v4883_v37 = vld [vmem:[#allocation3 + $0x7] ss:$32 sm:$0x8]  ;;  %v5617_v36 = vor.u32 %v5615_v47, %v5616_v32  ;;  %v5620_v35 = vor.u32 %v4622_v49, %v5619_v4  ;;  %v5628_v49 = vld [vmem:[#allocation31_spill] sm:$0xff]  ;;  %v5638_v8 = vld [vmem:[#allocation33_spill] sm:$0xff] }
 0x2b6   :  { %v4865_v9 = vor.u32 %v2791_v31, %v5610_v24  ;;  %v4881_v31 = vld [vmem:[#allocation3 + $0x6] ss:$32 sm:$0x8]  ;;  %5613 = vst [vmem:[#allocation19_spill] sm:$0xff] %v4883_v37  ;;  %v5621_v62 = vor.u32 %v4640_v42, %v4677_v45  ;;  %v2118_v48 = vmax.f32 %v2086_v20, 0.0  ;;  %v5639_v47 = vor.u32 %v4664_v51, %v5638_v8 }
 0x2b7   :  { %5600 = vst [vmem:[#allocation17_spill] sm:$0xff] %v4841_v46  ;;  %v4860_v10 = vor.u32 %v2775_v23, %v5606_v12  ;;  %v3371_v23 = vld [vmem:[%s5447_s7 + $0x68] sm:$0xff]  ;;  %v4890_v16 = vor.u32 %v2853_v56, %v5617_v36  ;;  %v4895_v41 = vor.u32 %v2899_v43, %v5620_v35  ;;  %v5626_v56 = vor.u32 %v4642_v27, %v4679_v2  ;;  %v5631_v45 = vld [vmem:[#allocation32_spill] sm:$0xff]  ;;  %v5641_v36 = vld [vmem:[#allocation34_spill] sm:$0xff] }
 0x2b8   :  { %5612 = vst [vmem:[#allocation9_spill] sm:$0xff] %v4881_v31  ;;  %v4885_v30 = vld [vmem:[#allocation3 + $0x8] ss:$32 sm:$0x8]  ;;  %v4900_v7 = vor.u32 %v2915_v1, %v5621_v62  ;;  %2392 = vmatpush.msrb.mxu1 %v3371_v23  ;;  %v5629_v43 = vor.u32 %v4644_v26, %v5628_v49  ;;  %v5632_v42 = vor.u32 %v4646_v53, %v5631_v45  ;;  %v3375_v23 = vld [vmem:[%s5447_s7 + $0x80] sm:$0xff] }
 0x2b9   :  { %5607 = vst [vmem:[#allocation18_spill] sm:$0xff] %v4860_v10  ;;  %v4902_v12 = vld [vmem:[#allocation3 + $0x9] ss:$32 sm:$0x8]  ;;  %v4911_v24 = vor.u32 %v2961_v50, %v5626_v56  ;;  %v3370_v2 = vld [vmem:[%s5447_s7 + $0x60] sm:$0xff]  ;;  %v4948_v32 = vor.u32 %v3085_v14, %v5639_v47  ;;  %v5642_v4 = vor.u32 %v4666_v54, %v5641_v36  ;;  %2455 = vmatpush.msrb.mxu2 %v3375_v23  ;;  %v1800_v23 = vpop.f32.mrf.mxu2  ;;  %v5657_v56 = vld [vmem:[#allocation26_spill] sm:$0xff] }
 0x2ba   :  { %5614 = vst [vmem:[#allocation13_spill] sm:$0xff] %v4885_v30  ;;  %v4904_v18 = vld [vmem:[#allocation3 + $0xa] ss:$32 sm:$0x8]  ;;  %v4916_v34 = vor.u32 %v2977_v19, %v5629_v43  ;;  %v4921_v1 = vor.u32 %v3023_v22, %v5632_v42  ;;  %v3380_v26 = vld [vmem:[%s5447_s7 + $0xa0] sm:$0xff]  ;;  %v5636_v22 = vor.u32 %v4662_v17, %v4693_v25  ;;  %2393 = vmatpush.msrb.mxu1 %v3370_v2  ;;  %v2011_v2 = vpop.f32.mrf.mxu3  ;;  %v1591_v30 = vpop.f32.mrf.mxu1 }
 0x2bb   :  { %5618 = vst [vmem:[#allocation22_spill] sm:$0xff] %v4890_v16  ;;  %v4906_v33 = vld [vmem:[#allocation3 + $0xb] ss:$32 sm:$0x8]  ;;  %v4953_v35 = vor.u32 %v3101_v21, %v5642_v4  ;;  %v1798_v54 = vadd.f32 %v4803_v3, %v4775_v11  ;;  %2517 = vmatpush.msrb.mxu3 %v3380_v26  ;;  %v1801_v16 = vadd.f32 %v1800_v23, %v1591_v30 }
 0x2bc   :  { %5622 = vst [vmem:[#allocation14_spill] sm:$0xff] %v4900_v7  ;;  %v4932_v27 = vld [vmem:[#allocation3 + $0xc] ss:$32 sm:$0x8]  ;;  %v4943_v20 = vor.u32 %v3039_v39, %v5636_v22  ;;  %v5660_v7 = vor.u32 %v4831_v58, %v4728_v13  ;;  %v5661_v30 = vor.u32 %v4833_v29, %v4733_v28  ;;  %v5663_v13 = vor.u32 %v4855_v0, %v4743_v57  ;;  %v5667_v28 = vld [vmem:[#allocation36_spill] sm:$0xff]  ;;  %v5673_v0 = vld [vmem:[#allocation10_spill] sm:$0xff] }
 0x2bd   :  { %5623 = vst [vmem:[#allocation23_spill] sm:$0xff] %v4902_v12  ;;  %v4934_v50 = vld [vmem:[#allocation3 + $0xd] ss:$32 sm:$0x8]  ;;  %v2051_v17 = vadd.f32 %v2011_v2, %v1798_v54  ;;  %v5656_v2 = vld [vmem:[#allocation12_spill] sm:$0xff] }
 0x2be   :  { %5624 = vst [vmem:[#allocation15_spill] sm:$0xff] %v4904_v18  ;;  %v4936_v53 = vld [vmem:[#allocation3 + $0xe] ss:$32 sm:$0x8] }
 0x2bf   :  { %5625 = vst [vmem:[#allocation24_spill] sm:$0xff] %v4906_v33  ;;  %v4938_v19 = vld [vmem:[#allocation3 + $0xf] ss:$32 sm:$0x8]  ;;  %v2087_v11 = vadd.f32 %v4492_v59, %v2051_v17  ;;  %v5659_v17 = vor.u32 %v4829_v60, %v4723_v55  ;;  %v5662_v55 = vor.u32 %v4853_v15, %v4738_v44  ;;  %v5669_v44 = vld [vmem:[#allocation19_spill] sm:$0xff] }
 0x2c0   :  { %5627 = vst [vmem:[#allocation20_spill] sm:$0xff] %v4911_v24  ;;  %v4961_v25 = vld [vmem:[#allocation3 + $0x10] ss:$32 sm:$0x8]  ;;  %v5670_v15 = vld [vmem:[#allocation37_spill] sm:$0xff] }
 0x2c1   :  { %5630 = vst [vmem:[#allocation27_spill] sm:$0xff] %v4916_v34  ;;  %v4963_v51 = vld [vmem:[#allocation3 + $0x11] ss:$32 sm:$0x8]  ;;  %v2119_v63 = vmax.f32 %v2087_v11, 0.0  ;;  %v5672_v57 = vld [vmem:[#allocation13_spill] sm:$0xff] }
 0x2c2   :  { %5633 = vst [vmem:[#allocation21_spill] sm:$0xff] %v4921_v1  ;;  %v4965_v14 = vld [vmem:[#allocation3 + $0x12] ss:$32 sm:$0x8]  ;;  %v2014_v1 = vpop.f32.mrf.mxu3 }
 0x2c3   :  { %5634 = vst [vmem:[#allocation28_spill] sm:$0xff] %v4936_v53  ;;  %v4974_v49 = vld [vmem:[#allocation3 + $0x13] ss:$32 sm:$0x8]  ;;  %v2052_v62 = vadd.f32 %v2014_v1, %v1801_v16  ;;  %v1803_v16 = vpop.f32.mrf.mxu2 }
 0x2c4   :  { %5635 = vst [vmem:[#allocation25_spill] sm:$0xff] %v4938_v19  ;;  %v4976_v43 = vld [vmem:[#allocation3 + $0x14] ss:$32 sm:$0x8] }
 0x2c5   :  { %5637 = vst [vmem:[#allocation29_spill] sm:$0xff] %v4943_v20  ;;  %v4978_v45 = vld [vmem:[#allocation3 + $0x15] ss:$32 sm:$0x8] }
 0x2c6   :  { %5640 = vst [vmem:[#allocation30_spill] sm:$0xff] %v4948_v32  ;;  %v4980_v42 = vld [vmem:[#allocation3 + $0x16] ss:$32 sm:$0x8] }
 0x2c7   :  { %5643 = vst [vmem:[#allocation31_spill] sm:$0xff] %v4953_v35  ;;  %v4990_v4 = vld [vmem:[#allocation3 + $0x17] ss:$32 sm:$0x8] }
 0x2c8   :  { %5644 = vst [vmem:[#allocation32_spill] sm:$0xff] %v4963_v51  ;;  %v4992_v39 = vld [vmem:[#allocation3 + $0x18] ss:$32 sm:$0x8] }
 0x2c9   :  { %2150 = vst.msk [vmem:[#allocation3 + $0xd8] sm:$0xff] %vm578_vm2, %v2118_v48  ;;  %v4994_v21 = vld [vmem:[#allocation3 + $0x19] ss:$32 sm:$0x8] }
 0x2ca   :  { %5645 = vst [vmem:[#allocation33_spill] sm:$0xff] %v4976_v43  ;;  %v5002_v47 = vld [vmem:[#allocation3 + $0x1a] ss:$32 sm:$0x8] }
 0x2cb   :  { %5653 = vst [vmem:[#allocation34_spill] sm:$0xff] %v5002_v47  ;;  %v5004_v8 = vld [vmem:[#allocation3 + $0x1b] ss:$32 sm:$0x8] }
 0x2cc   :  { %v5006_v36 = vld [vmem:[#allocation3 + $0x1c] ss:$32 sm:$0x8]  ;;  %v5008_v26 = vld [vmem:[#allocation3 + $0x1d] ss:$32 sm:$0x8] }
 0x2cd   :  { %5654 = vst [vmem:[#allocation38_spill] sm:$0xff] %v5006_v36  ;;  %v2199_v37 = vld [vmem:[#allocation3 + $0x2] ss:$32 sm:$0x10] }
 0x2ce   :  { %5655 = vst [vmem:[#allocation39_spill] sm:$0xff] %v5008_v26  ;;  %v2215_v54 = vld [vmem:[#allocation3 + $0x3] ss:$32 sm:$0x10]  ;;  %v2200_v61 = vor.u32 %v2199_v37, %v5659_v17 }
 0x2cf   :  { %v5018_v33 = vld [vmem:[#allocation3 + $0x1e] ss:$32 sm:$0x8]  ;;  %v2162_v18 = vld [vmem:[#allocation3] ss:$32 sm:$0x10]  ;;  %v2216_v19 = vor.u32 %v2215_v54, %v5660_v7 }
 0x2d0   :  { %5658 = vst [vmem:[#allocation12_spill] sm:$0xff] %v5018_v33  ;;  %v2178_v12 = vld [vmem:[#allocation3 + $0x1] ss:$32 sm:$0x10]  ;;  %v5664_v7 = vld [vmem:[#allocation35_spill] sm:$0xff]  ;;  %v5666_v33 = vld [vmem:[#allocation9_spill] sm:$0xff] }
 0x2d1   :  { %v2283_v31 = vld [vmem:[#allocation3 + $0x4] ss:$32 sm:$0x10]  ;;  %v2299_v3 = vld [vmem:[#allocation3 + $0x5] ss:$32 sm:$0x10]  ;;  %v2179_v60 = vor.u32 %v2178_v12, %v5662_v55  ;;  %v5665_v54 = vor.u32 %v4873_v5, %v5664_v7  ;;  %v5668_v29 = vor.u32 %v5666_v33, %v5667_v28  ;;  %v5671_v12 = vor.u32 %v5669_v44, %v5670_v15 }
 0x2d2   :  { %v2345_v52 = vld [vmem:[#allocation3 + $0x6] ss:$32 sm:$0x10]  ;;  %v2361_v53 = vld [vmem:[#allocation3 + $0x7] ss:$32 sm:$0x10]  ;;  %v2284_v58 = vor.u32 %v2283_v31, %v5663_v13  ;;  %v5674_v31 = vor.u32 %v5672_v57, %v5673_v0  ;;  %v2088_v0 = vadd.f32 %v4492_v59, %v2052_v62 }
 0x2d3   :  { %v2407_v22 = vld [vmem:[#allocation3 + $0x8] ss:$32 sm:$0x10]  ;;  %v2423_v35 = vld [vmem:[#allocation3 + $0x9] ss:$32 sm:$0x10]  ;;  %v2300_v17 = vor.u32 %v2299_v3, %v5665_v54  ;;  %v5080_v55 = vor.u32 %v2361_v53, %v5671_v12 }
 0x2d4   :  { %v2469_v46 = vld [vmem:[#allocation3 + $0xa] ss:$32 sm:$0x10]  ;;  %v2485_v51 = vld [vmem:[#allocation3 + $0xb] ss:$32 sm:$0x10]  ;;  %v5085_v5 = vor.u32 %v2407_v22, %v5674_v31  ;;  %v5684_v22 = vor.u32 %v4932_v27, %v5656_v2 }
 0x2d5   :  { %v2531_v48 = vld [vmem:[#allocation3 + $0xc] ss:$32 sm:$0x10]  ;;  %v2201_v10 = vld [vmem:[#allocation3 + $0x2] ss:$32 sm:$0x20] }
 0x2d6   :  { %v2547_v43 = vld [vmem:[#allocation3 + $0xd] ss:$32 sm:$0x10]  ;;  %2151 = vst.msk [vmem:[#allocation3 + $0xe0] sm:$0xff] %vm578_vm2, %v2119_v63  ;;  %v2163_v63 = vor.u32 %v2162_v18, %v5661_v30  ;;  %v5073_v18 = vor.u32 %v2345_v52, %v5668_v29  ;;  %v5675_v13 = vld [vmem:[#allocation23_spill] sm:$0xff]  ;;  %v5676_v7 = vld [vmem:[#allocation4_spill] sm:$0xff]  ;;  %v5105_v57 = vor.u32 %v2531_v48, %v5684_v22  ;;  %v2202_v31 = vor.u32 %v2201_v10, %v2200_v61 }
 0x2d7   :  { %v2217_v24 = vld [vmem:[#allocation3 + $0x3] ss:$32 sm:$0x20]  ;;  %v2593_v47 = vld [vmem:[#allocation3 + $0xe] ss:$32 sm:$0x10]  ;;  %v5677_v33 = vor.u32 %v5675_v13, %v5676_v7 }
 0x2d8   :  { %v2609_v11 = vld [vmem:[#allocation3 + $0xf] ss:$32 sm:$0x10]  ;;  %v2655_v34 = vld [vmem:[#allocation3 + $0x10] ss:$32 sm:$0x10] }
 0x2d9   :  { %v2164_v23 = vld [vmem:[#allocation3] ss:$32 sm:$0x20]  ;;  %v2180_v37 = vld [vmem:[#allocation3 + $0x1] ss:$32 sm:$0x20]  ;;  %v5090_v52 = vor.u32 %v2423_v35, %v5677_v33  ;;  %v2218_v35 = vor.u32 %v2217_v24, %v2216_v19 }
 0x2da   :  { %v2285_v40 = vld [vmem:[#allocation3 + $0x4] ss:$32 sm:$0x20]  ;;  %v2301_v32 = vld [vmem:[#allocation3 + $0x5] ss:$32 sm:$0x20]  ;;  %v2181_v22 = vor.u32 %v2180_v37, %v2179_v60 }
 0x2db   :  { %v5075_v30 = vld [vmem:[#allocation3 + $0x6] ss:$32 sm:$0x20]  ;;  %v2203_v1 = vld [vmem:[#allocation3 + $0x2] ss:$32 sm:$0x40] }
 0x2dc   :  { %v2219_v3 = vld [vmem:[#allocation3 + $0x3] ss:$32 sm:$0x40]  ;;  %v5678_v54 = vld [vmem:[#allocation15_spill] sm:$0xff]  ;;  %v5682_v44 = vld [vmem:[#allocation5_spill] sm:$0xff] }
 0x2dd   :  { %v5679_v28 = vld [vmem:[#allocation11_spill] sm:$0xff]  ;;  %v5681_v53 = vld [vmem:[#allocation24_spill] sm:$0xff]  ;;  %v5687_v48 = vld [vmem:[#allocation6_spill] sm:$0xff] }
 0x2de   :  { %v5680_v29 = vor.u32 %v5678_v54, %v5679_v28  ;;  %v5683_v15 = vor.u32 %v5681_v53, %v5682_v44  ;;  %v2166_v13 = vld [vmem:[#allocation3] ss:$32 sm:$0x40]  ;;  %v2182_v7 = vld [vmem:[#allocation3 + $0x1] ss:$32 sm:$0x40]  ;;  %v1594_v28 = vpop.f32.mrf.mxu1 }
 0x2df   :  { %v2363_v33 = vld [vmem:[#allocation3 + $0x7] ss:$32 sm:$0x20]  ;;  %v2303_v53 = vld [vmem:[#allocation3 + $0x5] ss:$32 sm:$0x40]  ;;  %v2183_v60 = vor.u32 %v2182_v7, %v2181_v22 }
 0x2e0   :  { %v5095_v20 = vor.u32 %v2469_v46, %v5680_v29  ;;  %v5100_v12 = vor.u32 %v2485_v51, %v5683_v15  ;;  %v5685_v46 = vor.u32 %v4934_v50, %v5657_v56  ;;  %v2165_v51 = vor.u32 %v2164_v23, %v2163_v63  ;;  %v2287_v29 = vld [vmem:[#allocation3 + $0x4] ss:$32 sm:$0x40]  ;;  %v5113_v44 = vld [vmem:[#allocation3 + $0x8] ss:$32 sm:$0x20] }
 0x2e1   :  { %v5686_v27 = vld [vmem:[#allocation28_spill] sm:$0xff]  ;;  %v5689_v61 = vld [vmem:[#allocation25_spill] sm:$0xff]  ;;  %v5692_v50 = vld [vmem:[#allocation7_spill] sm:$0xff]  ;;  %v2120_v63 = vmax.f32 %v2088_v0, 0.0  ;;  %v2204_v23 = vor.u32 %v2203_v1, %v2202_v31  ;;  %v2220_v15 = vor.u32 %v2219_v3, %v2218_v35  ;;  %v2364_v31 = vor.u32 %v2363_v33, %v5080_v55 }
 0x2e2   :  { %v5111_v54 = vor.u32 %v2547_v43, %v5685_v46  ;;  %v5688_v2 = vor.u32 %v5686_v27, %v5687_v48  ;;  %v5690_v10 = vld [vmem:[#allocation16_spill] sm:$0xff]  ;;  %v5693_v56 = vor.u32 %v4961_v25, %v5692_v50  ;;  %v2286_v48 = vor.u32 %v2285_v40, %v2284_v58  ;;  %v2487_v37 = vld [vmem:[#allocation3 + $0xb] ss:$32 sm:$0x20]  ;;  %v3388_v0 = vld [vmem:[%s5447_s7 + $0xd8] sm:$0xff]  ;;  %v2017_v40 = vpop.f32.mrf.mxu3 }
 0x2e3   :  { %v5691_v24 = vor.u32 %v5689_v61, %v5690_v10  ;;  %v2349_v46 = vld [vmem:[#allocation3 + $0x6] ss:$32 sm:$0x40]  ;;  %v2365_v26 = vld [vmem:[#allocation3 + $0x7] ss:$32 sm:$0x40]  ;;  %v1804_v25 = vadd.f32 %v1803_v16, %v1594_v28  ;;  %v2410_v50 = vor.u32 %v5113_v44, %v5085_v5 }
 0x2e4   :  { %v5118_v62 = vor.u32 %v2593_v47, %v5688_v2  ;;  %v5128_v43 = vor.u32 %v2655_v34, %v5693_v56  ;;  %v2205_v36 = vld [vmem:[#allocation3 + $0x2] ss:$32 sm:$0x80]  ;;  %v2221_v27 = vld [vmem:[#allocation3 + $0x3] ss:$32 sm:$0x80]  ;;  %v2167_v47 = vor.u32 %v2166_v13, %v2165_v51  ;;  %v2302_v2 = vor.u32 %v2301_v32, %v2300_v17 }
 0x2e5   :  { %v5123_v19 = vor.u32 %v2609_v11, %v5691_v24  ;;  %v2348_v11 = vor.u32 %v5075_v30, %v5073_v18  ;;  %v2425_v61 = vld [vmem:[#allocation3 + $0x9] ss:$32 sm:$0x20]  ;;  %v5132_v10 = vld [vmem:[#allocation3 + $0xa] ss:$32 sm:$0x20]  ;;  %v2206_v34 = vor.u32 %v2205_v36, %v2204_v23  ;;  %v2222_v1 = vor.u32 %v2221_v27, %v2220_v15 }
 0x2e6   :  { %2152 = vst.msk [vmem:[#allocation3 + $0xe8] sm:$0xff] %vm578_vm2, %v2120_v63  ;;  %v2168_v3 = vld [vmem:[#allocation3] ss:$32 sm:$0x80]  ;;  %v2288_v17 = vor.u32 %v2287_v29, %v2286_v48  ;;  %v2304_v30 = vor.u32 %v2303_v53, %v2302_v2  ;;  %v2053_v36 = vadd.f32 %v2017_v40, %v1804_v25  ;;  %v2366_v15 = vor.u32 %v2365_v26, %v2364_v31  ;;  %v3393_v5 = vld [vmem:[%s5447_s7 + $0xf8] sm:$0xff]  ;;  %v1806_v26 = vpop.f32.mrf.mxu2 }
 0x2e7   :  { %v2169_v32 = vor.u32 %v2168_v3, %v2167_v47  ;;  %v2184_v58 = vld [vmem:[#allocation3 + $0x1] ss:$32 sm:$0x80]  ;;  %v2289_v18 = vld [vmem:[#allocation3 + $0x4] ss:$32 sm:$0x80]  ;;  %v2223_v28 = vmax.f32 %v2206_v34, %v2222_v1  ;;  %v2350_v29 = vor.u32 %v2349_v46, %v2348_v11  ;;  %v2426_v27 = vor.u32 %v2425_v61, %v5090_v52 }
 0x2e8   :  { %v2411_v16 = vld [vmem:[#allocation3 + $0x8] ss:$32 sm:$0x40]  ;;  %v2427_v35 = vld [vmem:[#allocation3 + $0x9] ss:$32 sm:$0x40]  ;;  %v2185_v51 = vor.u32 %v2184_v58, %v2183_v60  ;;  %v2290_v63 = vor.u32 %v2289_v18, %v2288_v17  ;;  %v2089_v55 = vadd.f32 %v4492_v59, %v2053_v36  ;;  %v2472_v47 = vor.u32 %v5132_v10, %v5095_v20 }
 0x2e9   :  { %v2671_v13 = vld [vmem:[#allocation3 + $0x11] ss:$32 sm:$0x10]  ;;  %v2305_v7 = vld [vmem:[#allocation3 + $0x5] ss:$32 sm:$0x80]  ;;  %3363 = vmatmul.msk.f32.vlgmr.msra.gmra.mxu1 %vm578_vm2, %v2223_v28  ;;  %v2488_v59 = vor.u32 %v2487_v37, %v5100_v12  ;;  %v2412_v25 = vor.u32 %v2411_v16, %v2410_v50  ;;  %v2428_v34 = vor.u32 %v2427_v35, %v2426_v27 }
 0x2ea   :  { %v2351_v24 = vld [vmem:[#allocation3 + $0x6] ss:$32 sm:$0x80]  ;;  %v5141_v56 = vld [vmem:[#allocation3 + $0xc] ss:$32 sm:$0x20]  ;;  %v2306_v23 = vor.u32 %v2305_v7, %v2304_v30  ;;  %v2186_v33 = vmax.f32 %v2169_v32, %v2185_v51  ;;  %2576 = vmatpush.msra.mxu1 %v3388_v0  ;;  %v1597_v30 = vpop.f32.mrf.mxu1 }
 0x2eb   :  { %v2367_v53 = vld [vmem:[#allocation3 + $0x7] ss:$32 sm:$0x80]  ;;  %v2473_v22 = vld [vmem:[#allocation3 + $0xa] ss:$32 sm:$0x40]  ;;  %v2352_v2 = vor.u32 %v2351_v24, %v2350_v29  ;;  %v2534_v28 = vor.u32 %v5141_v56, %v5105_v57  ;;  %v1807_v7 = vadd.f32 %v1806_v26, %v1597_v30 }
 0x2ec   :  { %v2489_v48 = vld [vmem:[#allocation3 + $0xb] ss:$32 sm:$0x40]  ;;  %v5151_v44 = vld [vmem:[#allocation3 + $0xd] ss:$32 sm:$0x20]  ;;  %v2307_v46 = vmax.f32 %v2290_v63, %v2306_v23  ;;  %v2368_v11 = vor.u32 %v2367_v53, %v2366_v15  ;;  %3364 = vmatmul.msk.f32.vlgmr.msra.gmra.mxu2 %vm578_vm2, %v2186_v33  ;;  %v2474_v35 = vor.u32 %v2473_v22, %v2472_v47  ;;  %v2020_v53 = vpop.f32.mrf.mxu3 }
 0x2ed   :  { %v3398_v52 = vld [vmem:[%s5447_s7 + $0x118] sm:$0xff]  ;;  %v3387_v20 = vld [vmem:[%s5447_s7 + $0xd0] sm:$0xff]  ;;  %v5160_v61 = vld [vmem:[#allocation3 + $0xe] ss:$32 sm:$0x20]  ;;  %v2121_v10 = vmax.f32 %v2089_v55, 0.0  ;;  %v2490_v36 = vor.u32 %v2489_v48, %v2488_v59  ;;  %2638 = vmatpush.msra.mxu2 %v3393_v5  ;;  %v2550_v33 = vor.u32 %v5151_v44, %v5111_v54  ;;  %v2054_v48 = vadd.f32 %v2020_v53, %v1807_v7 }
 0x2ee   :  { %v3392_v12 = vld [vmem:[%s5447_s7 + $0xf0] sm:$0xff]  ;;  %v3386_v3 = vld [vmem:[%s5447_s7 + $0xc8] sm:$0xff]  ;;  %v5694_v40 = vld [vmem:[#allocation32_spill] sm:$0xff]  ;;  %3369 = vmatmul.msk.f32.vlgmr.msra.gmra.mxu3 %vm578_vm2, %v2307_v46  ;;  %2577 = vmatpush.msra.mxu1 %v3387_v20  ;;  %v2369_v22 = vmax.f32 %v2352_v2, %v2368_v11  ;;  %v2596_v27 = vor.u32 %v5160_v61, %v5118_v62 }
 0x2ef   :  { %v3397_v1 = vld [vmem:[%s5447_s7 + $0x110] sm:$0xff]  ;;  %v2535_v60 = vld [vmem:[#allocation3 + $0xc] ss:$32 sm:$0x40]  ;;  %2153 = vst.msk [vmem:[#allocation3 + $0xf0] sm:$0xff] %vm578_vm2, %v2121_v10  ;;  %2700 = vmatpush.msra.mxu3 %v3398_v52  ;;  %2639 = vmatpush.msra.mxu2 %v3392_v12  ;;  %v3390_v46 = vld [vmem:[%s5447_s7 + $0xe0] sm:$0xff] }
 0x2f0   :  { %v5172_v37 = vld [vmem:[#allocation3 + $0xf] ss:$32 sm:$0x20]  ;;  %v5174_v0 = vld [vmem:[#allocation3 + $0x10] ss:$32 sm:$0x20]  ;;  %2578 = vmatpush.msra.mxu1 %v3386_v3  ;;  %v5206_v11 = vor.u32 %v2535_v60, %v2534_v28 }
 0x2f1   :  { %v5695_v32 = vld [vmem:[#allocation17_spill] sm:$0xff]  ;;  %v5181_v18 = vld [vmem:[#allocation3 + $0x11] ss:$32 sm:$0x20]  ;;  %2701 = vmatpush.msra.mxu3 %v3397_v1  ;;  %v3385_v2 = vld [vmem:[%s5447_s7 + $0xc0] sm:$0xff]  ;;  %v2612_v20 = vor.u32 %v5172_v37, %v5123_v19  ;;  %v2658_v61 = vor.u32 %v5174_v0, %v5128_v43  ;;  %3374 = vmatmul.msk.f32.vlgmr.msrb.gmra.mxu1 %vm578_vm2, %v2369_v22 }
 0x2f2   :  { %v5696_v58 = vor.u32 %v5694_v40, %v5695_v32  ;;  %v2413_v31 = vld [vmem:[#allocation3 + $0x8] ss:$32 sm:$0x80]  ;;  %v2429_v16 = vld [vmem:[#allocation3 + $0x9] ss:$32 sm:$0x80]  ;;  %2579 = vmatpush.msra.mxu1 %v3385_v2 }
 0x2f3   :  { %v2551_v51 = vld [vmem:[#allocation3 + $0xd] ss:$32 sm:$0x40]  ;;  %v2414_v24 = vor.u32 %v2413_v31, %v2412_v25  ;;  %v2475_v50 = vld [vmem:[#allocation3 + $0xa] ss:$32 sm:$0x80] }
 0x2f4   :  { %v5179_v17 = vor.u32 %v2671_v13, %v5696_v58  ;;  %v2430_v13 = vor.u32 %v2429_v16, %v2428_v34  ;;  %v3391_v63 = vld [vmem:[%s5447_s7 + $0xe8] sm:$0xff]  ;;  %v2659_v15 = vld [vmem:[#allocation3 + $0x10] ss:$32 sm:$0x40]  ;;  %v2476_v55 = vor.u32 %v2475_v50, %v2474_v35  ;;  %v3395_v54 = vld [vmem:[%s5447_s7 + $0x100] sm:$0xff]  ;;  %v2552_v1 = vor.u32 %v2551_v51, %v2550_v33 }
 0x2f5   :  { %v2597_v23 = vld [vmem:[#allocation3 + $0xe] ss:$32 sm:$0x40]  ;;  %v2613_v29 = vld [vmem:[#allocation3 + $0xf] ss:$32 sm:$0x40]  ;;  %2640 = vmatpush.msra.mxu2 %v3391_v63  ;;  %v5699_v33 = vor.u32 %v4974_v49, %v4851_v6 }
 0x2f6   :  { %v2491_v57 = vld [vmem:[#allocation3 + $0xb] ss:$32 sm:$0x80]  ;;  %v2675_v47 = vld [vmem:[#allocation3 + $0x11] ss:$32 sm:$0x40]  ;;  %v2431_v5 = vmax.f32 %v2414_v24, %v2430_v13  ;;  %v2674_v10 = vor.u32 %v5181_v18, %v5179_v17  ;;  %v5229_v40 = vor.u32 %v2597_v23, %v2596_v27  ;;  %v5231_v32 = vor.u32 %v2613_v29, %v2612_v20 }
 0x2f7   :  { %v3396_v56 = vld [vmem:[%s5447_s7 + $0x108] sm:$0xff]  ;;  %v2492_v26 = vor.u32 %v2491_v57, %v2490_v36  ;;  %v2717_v44 = vld [vmem:[#allocation3 + $0x12] ss:$32 sm:$0x10]  ;;  %v3452_v25 = vld [vmem:[%s5446_s4] ss:$0 sm:$0xff]  ;;  %2641 = vmatpush.msra.mxu2 %v3390_v46  ;;  %v2660_v17 = vor.u32 %v2659_v15, %v2658_v61  ;;  %v5703_v20 = vor.u32 %v4978_v45, %v4865_v9 }
 0x2f8   :  { %v2733_v62 = vld [vmem:[#allocation3 + $0x13] ss:$32 sm:$0x10]  ;;  %v5208_v59 = vld [vmem:[#allocation3 + $0xc] ss:$32 sm:$0x80]  ;;  %v2090_v34 = vadd.f32 %v3452_v25, %v2054_v48  ;;  %2702 = vmatpush.msra.mxu3 %v3396_v56  ;;  %3379 = vmatmul.msk.f32.vlgmr.msrb.gmra.mxu2 %vm578_vm2, %v2431_v5  ;;  %v2676_v51 = vor.u32 %v2675_v47, %v2674_v10  ;;  %v5704_v25 = vor.u32 %v4980_v42, %v4870_v38 }
 0x2f9   :  { %v5210_v52 = vld [vmem:[#allocation3 + $0xd] ss:$32 sm:$0x80]  ;;  %v2493_v12 = vmax.f32 %v2476_v55, %v2492_v26  ;;  %v5222_v3 = vld [vmem:[#allocation3 + $0xe] ss:$32 sm:$0x80]  ;;  %v2538_v36 = vor.u32 %v5208_v59, %v5206_v11  ;;  %v2734_v27 = vor.u32 %v2733_v62, %v5699_v33 }
 0x2fa   :  { %v3408_v19 = vld [vmem:[%s5447_s7 + $0x158] sm:$0xff]  ;;  %v2779_v43 = vld [vmem:[#allocation3 + $0x14] ss:$32 sm:$0x10]  ;;  %v2122_v35 = vmax.f32 %v2090_v34, 0.0  ;;  %2703 = vmatpush.msra.mxu3 %v3395_v54  ;;  %v2554_v28 = vor.u32 %v5210_v52, %v2552_v1  ;;  %v2600_v29 = vor.u32 %v5222_v3, %v5229_v40  ;;  %v5697_v22 = vld [vmem:[#allocation8_spill] sm:$0xff] }
 0x2fb   :  { %v2795_v60 = vld [vmem:[#allocation3 + $0x15] ss:$32 sm:$0x10]  ;;  %v2841_v37 = vld [vmem:[#allocation3 + $0x16] ss:$32 sm:$0x10]  ;;  %3384 = vmatmul.msk.f32.vlgmr.msrb.gmra.mxu3 %vm578_vm2, %v2493_v12  ;;  %2824 = vmatpush.msrb.mxu2 %v3408_v19  ;;  %v5698_v55 = vor.u32 %v4965_v14, %v5697_v22 }
 0x2fc   :  { %v5227_v0 = vld [vmem:[#allocation3 + $0x1f] ss:$32 sm:$0x8]  ;;  %v5233_v58 = vld [vmem:[#allocation3 + $0xf] ss:$32 sm:$0x80]  ;;  %v2796_v61 = vor.u32 %v2795_v60, %v5703_v20  ;;  %v2842_v34 = vor.u32 %v2841_v37, %v5704_v25  ;;  %v2555_v3 = vmax.f32 %v2538_v36, %v2554_v28 }
 0x2fd   :  { %v3403_v18 = vld [vmem:[%s5447_s7 + $0x138] sm:$0xff]  ;;  %v5241_v31 = vld [vmem:[#allocation3 + $0x12] ss:$32 sm:$0x20]  ;;  %v2718_v57 = vor.u32 %v2717_v44, %v5698_v55  ;;  %2154 = vst.msk [vmem:[#allocation3 + $0xf8] sm:$0xff] %vm578_vm2, %v2122_v35  ;;  %v2616_v48 = vor.u32 %v5233_v58, %v5231_v32  ;;  %v3406_v14 = vld [vmem:[%s5447_s7 + $0x148] sm:$0xff] }
 0x2fe   :  { %v3413_v30 = vld [vmem:[%s5447_s7 + $0x178] sm:$0xff]  ;;  %v5243_v16 = vld [vmem:[#allocation3 + $0x13] ss:$32 sm:$0x20]  ;;  %2762 = vmatpush.msrb.mxu1 %v3403_v18  ;;  %v3401_v6 = vld [vmem:[%s5447_s7 + $0x128] sm:$0xff] }
 0x2ff   :  { %v3407_v7 = vld [vmem:[%s5447_s7 + $0x150] sm:$0xff]  ;;  %2886 = vmatpush.msrb.mxu3 %v3413_v30  ;;  %v3411_v49 = vld [vmem:[%s5447_s7 + $0x168] sm:$0xff]  ;;  %v3405_v44 = vld [vmem:[%s5447_s7 + $0x140] sm:$0xff]  ;;  %v2720_v45 = vor.u32 %v5241_v31, %v2718_v57  ;;  %3389 = vmatmul.msk.f32.vlgmr.msra.gmra.mxu1 %vm578_vm2, %v2555_v3  ;;  %v2617_v31 = vmax.f32 %v2600_v29, %v2616_v48 }
 0x300   :  { %v3402_v24 = vld [vmem:[%s5447_s7 + $0x130] sm:$0xff]  ;;  %2825 = vmatpush.msrb.mxu2 %v3407_v7  ;;  %v5700_v62 = vld [vmem:[#allocation33_spill] sm:$0xff]  ;;  %v5705_v12 = vld [vmem:[#allocation31_spill] sm:$0xff] }
 0x301   :  { %v3412_v13 = vld [vmem:[%s5447_s7 + $0x170] sm:$0xff]  ;;  %v3104_v1 = vor.u32 %v5227_v0, %v5705_v12  ;;  %2763 = vmatpush.msrb.mxu1 %v3402_v24  ;;  %v3400_v19 = vld [vmem:[%s5447_s7 + $0x120] sm:$0xff]  ;;  %v2903_v60 = vld [vmem:[#allocation3 + $0x18] ss:$32 sm:$0x10]  ;;  %3394 = vmatmul.msk.f32.vlgmr.msra.gmra.mxu2 %vm578_vm2, %v2617_v31 }
 0x302   :  { %v2781_v50 = vld [vmem:[#allocation3 + $0x14] ss:$32 sm:$0x20]  ;;  %v5258_v63 = vld [vmem:[#allocation3 + $0x15] ss:$32 sm:$0x20]  ;;  %2887 = vmatpush.msrb.mxu3 %v3412_v13  ;;  %2826 = vmatpush.msrb.mxu2 %v3406_v14 }
 0x303   :  { %v2857_v23 = vld [vmem:[#allocation3 + $0x17] ss:$32 sm:$0x10]  ;;  %v2661_v15 = vld [vmem:[#allocation3 + $0x10] ss:$32 sm:$0x80]  ;;  %2764 = vmatpush.msrb.mxu1 %v3401_v6  ;;  %v5708_v6 = vor.u32 %v4992_v39, %v4895_v41 }
 0x304   :  { %v2677_v53 = vld [vmem:[#allocation3 + $0x11] ss:$32 sm:$0x80]  ;;  %v2721_v56 = vld [vmem:[#allocation3 + $0x12] ss:$32 sm:$0x40]  ;;  %v2662_v5 = vor.u32 %v2661_v15, %v2660_v17  ;;  %v2798_v17 = vor.u32 %v5258_v63, %v2796_v61  ;;  %2888 = vmatpush.msrb.mxu3 %v3411_v49  ;;  %2827 = vmatpush.msrb.mxu2 %v3405_v44 }
 0x305   :  { %v2737_v47 = vld [vmem:[#allocation3 + $0x13] ss:$32 sm:$0x40]  ;;  %v2678_v26 = vor.u32 %v2677_v53, %v2676_v51  ;;  %v2783_v46 = vld [vmem:[#allocation3 + $0x14] ss:$32 sm:$0x40]  ;;  %2765 = vmatpush.msrb.mxu1 %v3400_v19  ;;  %v2904_v49 = vor.u32 %v2903_v60, %v5708_v6 }
 0x306   :  { %v2843_v2 = vld [vmem:[#allocation3 + $0x16] ss:$32 sm:$0x20]  ;;  %v2859_v54 = vld [vmem:[#allocation3 + $0x17] ss:$32 sm:$0x20] }
 0x307   :  { %v5701_v11 = vld [vmem:[#allocation18_spill] sm:$0xff]  ;;  %v3410_v9 = vld [vmem:[%s5447_s7 + $0x160] sm:$0xff]  ;;  %v2679_v37 = vmax.f32 %v2662_v5, %v2678_v26  ;;  %v2919_v36 = vld [vmem:[#allocation3 + $0x19] ss:$32 sm:$0x10]  ;;  %v2844_v29 = vor.u32 %v2843_v2, %v2842_v34 }
 0x308   :  { %v5702_v59 = vor.u32 %v5700_v62, %v5701_v11  ;;  %v2799_v10 = vld [vmem:[#allocation3 + $0x15] ss:$32 sm:$0x40]  ;;  %v2845_v38 = vld [vmem:[#allocation3 + $0x16] ss:$32 sm:$0x40]  ;;  %2889 = vmatpush.msrb.mxu3 %v3410_v9 }
 0x309   :  { %v2861_v42 = vld [vmem:[#allocation3 + $0x17] ss:$32 sm:$0x40]  ;;  %v2723_v40 = vld [vmem:[#allocation3 + $0x12] ss:$32 sm:$0x80]  ;;  %3399 = vmatmul.msk.f32.vlgmr.msra.gmra.mxu3 %vm578_vm2, %v2679_v37  ;;  %v2846_v14 = vor.u32 %v2845_v38, %v2844_v29 }
 0x30a   :  { %v2780_v52 = vor.u32 %v2779_v43, %v5702_v59  ;;  %v2736_v43 = vor.u32 %v5243_v16, %v2734_v27  ;;  %v2739_v32 = vld [vmem:[#allocation3 + $0x13] ss:$32 sm:$0x80]  ;;  %v2722_v16 = vor.u32 %v2721_v56, %v2720_v45  ;;  %v3423_v51 = vld [vmem:[%s5447_s7 + $0x1b8] sm:$0xff]  ;;  %v2800_v56 = vor.u32 %v2799_v10, %v2798_v17  ;;  %v3421_v3 = vld [vmem:[%s5447_s7 + $0x1a8] sm:$0xff] }
 0x30b   :  { %v5706_v18 = vld [vmem:[#allocation22_spill] sm:$0xff]  ;;  %v3418_v7 = vld [vmem:[%s5447_s7 + $0x198] sm:$0xff]  ;;  %3010 = vmatpush.msra.mxu2 %v3423_v51  ;;  %v5712_v9 = vld [vmem:[#allocation20_spill] sm:$0xff] }
 0x30c   :  { %v2782_v58 = vor.u32 %v2781_v50, %v2780_v52  ;;  %v5707_v30 = vor.u32 %v4990_v4, %v5706_v18  ;;  %v2738_v28 = vor.u32 %v2737_v47, %v2736_v43  ;;  %v3428_v4 = vld [vmem:[%s5447_s7 + $0x1d8] sm:$0xff]  ;;  %v5319_v63 = vld [vmem:[#allocation3 + $0x14] ss:$32 sm:$0x80]  ;;  %v2724_v55 = vor.u32 %v2723_v40, %v2722_v16  ;;  %2948 = vmatpush.msra.mxu1 %v3418_v7  ;;  %v3420_v17 = vld [vmem:[%s5447_s7 + $0x1a0] sm:$0xff] }
 0x30d   :  { %v2965_v24 = vld [vmem:[#allocation3 + $0x1a] ss:$32 sm:$0x10]  ;;  %v2981_v13 = vld [vmem:[#allocation3 + $0x1b] ss:$32 sm:$0x10]  ;;  %3072 = vmatpush.msra.mxu3 %v3428_v4 }
 0x30e   :  { %v2858_v35 = vor.u32 %v2857_v23, %v5707_v30  ;;  %v5317_v50 = vor.u32 %v2783_v46, %v2782_v58  ;;  %v2801_v23 = vld [vmem:[#allocation3 + $0x15] ss:$32 sm:$0x80]  ;;  %v5321_v53 = vld [vmem:[#allocation3 + $0x18] ss:$32 sm:$0x20]  ;;  %v2740_v57 = vor.u32 %v2739_v32, %v2738_v28 }
 0x30f   :  { %v5323_v22 = vld [vmem:[#allocation3 + $0x19] ss:$32 sm:$0x20]  ;;  %v2847_v33 = vld [vmem:[#allocation3 + $0x16] ss:$32 sm:$0x80]  ;;  %v2802_v11 = vor.u32 %v2801_v23, %v2800_v56  ;;  %v2906_v18 = vor.u32 %v5321_v53, %v2904_v49 }
 0x310   :  { %v2860_v15 = vor.u32 %v2859_v54, %v2858_v35  ;;  %v2863_v27 = vld [vmem:[#allocation3 + $0x17] ss:$32 sm:$0x80]  ;;  %v5326_v47 = vld [vmem:[#allocation3 + $0x1a] ss:$32 sm:$0x20]  ;;  %v2786_v62 = vor.u32 %v5319_v63, %v5317_v50  ;;  %v2848_v41 = vor.u32 %v2847_v33, %v2846_v14  ;;  %v2741_v40 = vmax.f32 %v2724_v55, %v2740_v57 }
 0x311   :  { %v5328_v48 = vld [vmem:[#allocation3 + $0x1b] ss:$32 sm:$0x20]  ;;  %v3027_v5 = vld [vmem:[#allocation3 + $0x1c] ss:$32 sm:$0x10] }
 0x312   :  { %v3043_v26 = vld [vmem:[#allocation3 + $0x1d] ss:$32 sm:$0x10]  ;;  %v2862_v46 = vor.u32 %v2861_v42, %v2860_v15  ;;  %v3422_v2 = vld [vmem:[%s5447_s7 + $0x1b0] sm:$0xff]  ;;  %v3416_v32 = vld [vmem:[%s5447_s7 + $0x188] sm:$0xff]  ;;  %3404 = vmatmul.msk.f32.vlgmr.msrb.gmra.mxu1 %vm578_vm2, %v2741_v40  ;;  %v2803_v53 = vmax.f32 %v2786_v62, %v2802_v11 }
 0x313   :  { %v3417_v54 = vld [vmem:[%s5447_s7 + $0x190] sm:$0xff]  ;;  %v2907_v44 = vld [vmem:[#allocation3 + $0x18] ss:$32 sm:$0x40]  ;;  %3011 = vmatpush.msra.mxu2 %v3422_v2  ;;  %v3426_v58 = vld [vmem:[%s5447_s7 + $0x1c8] sm:$0xff] }
 0x314   :  { %v3427_v59 = vld [vmem:[%s5447_s7 + $0x1d0] sm:$0xff]  ;;  %v2923_v10 = vld [vmem:[#allocation3 + $0x19] ss:$32 sm:$0x40]  ;;  %v2864_v39 = vor.u32 %v2863_v27, %v2862_v46  ;;  %2949 = vmatpush.msra.mxu1 %v3417_v54  ;;  %v5717_v4 = vld [vmem:[#allocation21_spill] sm:$0xff]  ;;  %v2908_v57 = vor.u32 %v2907_v44, %v2906_v18  ;;  %3409 = vmatmul.msk.f32.vlgmr.msrb.gmra.mxu2 %vm578_vm2, %v2803_v53 }
 0x315   :  { %v5709_v52 = vld [vmem:[#allocation14_spill] sm:$0xff]  ;;  %v3029_v25 = vld [vmem:[#allocation3 + $0x1c] ss:$32 sm:$0x20]  ;;  %3073 = vmatpush.msra.mxu3 %v3427_v59  ;;  %v5720_v63 = vld [vmem:[#allocation29_spill] sm:$0xff]  ;;  %3012 = vmatpush.msra.mxu2 %v3421_v3 }
 0x316   :  { %v5710_v20 = vor.u32 %v4994_v21, %v5709_v52  ;;  %v3045_v34 = vld [vmem:[#allocation3 + $0x1d] ss:$32 sm:$0x20]  ;;  %v5711_v19 = vld [vmem:[#allocation34_spill] sm:$0xff]  ;;  %v3425_v55 = vld [vmem:[%s5447_s7 + $0x1c0] sm:$0xff]  ;;  %v2865_v27 = vmax.f32 %v2848_v41, %v2864_v39  ;;  %2950 = vmatpush.msra.mxu1 %v3416_v32 }
 0x317   :  { %v5713_v45 = vor.u32 %v5711_v19, %v5712_v9  ;;  %v2969_v38 = vld [vmem:[#allocation3 + $0x1a] ss:$32 sm:$0x40]  ;;  %v2985_v37 = vld [vmem:[#allocation3 + $0x1b] ss:$32 sm:$0x40]  ;;  %3074 = vmatpush.msra.mxu3 %v3426_v58  ;;  %3013 = vmatpush.msra.mxu2 %v3420_v17 }
 0x318   :  { %v2920_v61 = vor.u32 %v2919_v36, %v5710_v20  ;;  %v5714_v42 = vld [vmem:[#allocation27_spill] sm:$0xff]  ;;  %v5716_v7 = vld [vmem:[#allocation38_spill] sm:$0xff]  ;;  %3414 = vmatmul.msk.f32.vlgmr.msrb.gmra.mxu3 %vm578_vm2, %v2865_v27  ;;  %v5722_v11 = vld [vmem:[#allocation12_spill] sm:$0xff] }
 0x319   :  { %v2966_v43 = vor.u32 %v2965_v24, %v5713_v45  ;;  %v5715_v60 = vor.u32 %v5004_v8, %v5714_v42  ;;  %v3031_v30 = vld [vmem:[#allocation3 + $0x1c] ss:$32 sm:$0x40]  ;;  %v3047_v35 = vld [vmem:[#allocation3 + $0x1d] ss:$32 sm:$0x40]  ;;  %v5718_v24 = vor.u32 %v5716_v7, %v5717_v4  ;;  %3075 = vmatpush.msra.mxu3 %v3425_v55 }
 0x31a   :  { %v2922_v8 = vor.u32 %v5323_v22, %v2920_v61  ;;  %v3089_v36 = vld [vmem:[#allocation3 + $0x1e] ss:$32 sm:$0x10]  ;;  %v2909_v31 = vld [vmem:[#allocation3 + $0x18] ss:$32 sm:$0x80] }
 0x31b   :  { %v2982_v21 = vor.u32 %v2981_v13, %v5715_v60  ;;  %v2925_v16 = vld [vmem:[#allocation3 + $0x19] ss:$32 sm:$0x80]  ;;  %v2968_v28 = vor.u32 %v5326_v47, %v2966_v43  ;;  %v3028_v13 = vor.u32 %v3027_v5, %v5718_v24  ;;  %v3105_v15 = vld [vmem:[#allocation3 + $0x1f] ss:$32 sm:$0x10]  ;;  %v2910_v14 = vor.u32 %v2909_v31, %v2908_v57 }
 0x31c   :  { %v5719_v50 = vld [vmem:[#allocation39_spill] sm:$0xff]  ;;  %v3415_v22 = vld [vmem:[%s5447_s7 + $0x180] sm:$0xff]  ;;  %v2924_v56 = vor.u32 %v2923_v10, %v2922_v8  ;;  %v5723_v59 = vld [vmem:[#allocation30_spill] sm:$0xff]  ;;  %v3106_v39 = vor.u32 %v3105_v15, %v3104_v1 }
 0x31d   :  { %v2984_v51 = vor.u32 %v5328_v48, %v2982_v21  ;;  %v5721_v23 = vor.u32 %v5719_v50, %v5720_v63  ;;  %v3433_v33 = vld [vmem:[%s5447_s7 + $0x1f8] sm:$0xff]  ;;  %v3030_v5 = vor.u32 %v3029_v25, %v3028_v13  ;;  %v2970_v2 = vor.u32 %v2969_v38, %v2968_v28  ;;  %2951 = vmatpush.msra.mxu1 %v3415_v22  ;;  %v3432_v41 = vld [vmem:[%s5447_s7 + $0x1f0] sm:$0xff]  ;;  %v3431_v38 = vld [vmem:[%s5447_s7 + $0x1e8] sm:$0xff] }
 0x31e   :  { %v2971_v47 = vld [vmem:[#allocation3 + $0x1a] ss:$32 sm:$0x80]  ;;  %v2987_v48 = vld [vmem:[#allocation3 + $0x1b] ss:$32 sm:$0x80]  ;;  %v2926_v46 = vor.u32 %v2925_v16, %v2924_v56  ;;  %v5724_v52 = vor.u32 %v5722_v11, %v5723_v59 }
 0x31f   :  { %v3044_v29 = vor.u32 %v3043_v26, %v5721_v23  ;;  %v2986_v54 = vor.u32 %v2985_v37, %v2984_v51  ;;  %v3033_v6 = vld [vmem:[#allocation3 + $0x1c] ss:$32 sm:$0x80]  ;;  %v3049_v49 = vld [vmem:[#allocation3 + $0x1d] ss:$32 sm:$0x80]  ;;  %v3032_v44 = vor.u32 %v3031_v30, %v3030_v5  ;;  %v2972_v25 = vor.u32 %v2971_v47, %v2970_v2  ;;  %3134 = vmatpush.msrb.mxu1 %v3433_v33 }
 0x320   :  { %v3090_v20 = vor.u32 %v3089_v36, %v5724_v52  ;;  %v3091_v61 = vld [vmem:[#allocation3 + $0x1e] ss:$32 sm:$0x20]  ;;  %v3107_v10 = vld [vmem:[#allocation3 + $0x1f] ss:$32 sm:$0x20]  ;;  %v2927_v43 = vmax.f32 %v2910_v14, %v2926_v46 }
 0x321   :  { %v3046_v26 = vor.u32 %v3045_v34, %v3044_v29  ;;  %v2988_v34 = vor.u32 %v2987_v48, %v2986_v54  ;;  %v3034_v3 = vor.u32 %v3033_v6, %v3032_v44  ;;  %v3093_v9 = vld [vmem:[#allocation3 + $0x1e] ss:$32 sm:$0x40]  ;;  %v3109_v45 = vld [vmem:[#allocation3 + $0x1f] ss:$32 sm:$0x40]  ;;  %v3108_v60 = vor.u32 %v3107_v10, %v3106_v39  ;;  %3135 = vmatpush.msrb.mxu1 %v3432_v41 }
 0x322   :  { %v3092_v42 = vor.u32 %v3091_v61, %v3090_v20  ;;  %v3095_v21 = vld [vmem:[#allocation3 + $0x1e] ss:$32 sm:$0x80]  ;;  %v3111_v37 = vld [vmem:[#allocation3 + $0x1f] ss:$32 sm:$0x80]  ;;  %3419 = vmatmul.msk.f32.vlgmr.msra.gmra.mxu1 %vm578_vm2, %v2927_v43 }
 0x323   :  { %v3048_v62 = vor.u32 %v3047_v35, %v3046_v26  ;;  %v2989_v40 = vmax.f32 %v2972_v25, %v2988_v34  ;;  %v3430_v0 = vld [vmem:[%s5447_s7 + $0x1e0] sm:$0xff]  ;;  %v3110_v1 = vor.u32 %v3109_v45, %v3108_v60  ;;  %3136 = vmatpush.msrb.mxu1 %v3431_v38  ;;  %v3156_v30 = vld [vmem:[%s5450_s9 + $0x38] sm:$0xff]  ;;  %v3155_v35 = vld [vmem:[%s5450_s9 + $0x30] sm:$0xff] }
 0x324   :  { %v3094_v12 = vor.u32 %v3093_v9, %v3092_v42  ;;  %3173 = vmatpush.msrb.mxu2 %v3156_v30  ;;  %v3154_v7 = vld [vmem:[%s5450_s9 + $0x28] sm:$0xff]  ;;  %v3153_v23 = vld [vmem:[%s5450_s9 + $0x20] sm:$0xff]  ;;  %v3152_v29 = vld [vmem:[%s5450_s9 + $0x18] sm:$0xff] }
 0x325   :  { %v3050_v19 = vor.u32 %v3049_v49, %v3048_v62  ;;  %3424 = vmatmul.msk.f32.vlgmr.msra.gmra.mxu2 %vm578_vm2, %v2989_v40  ;;  %v3112_v17 = vor.u32 %v3111_v37, %v3110_v1  ;;  %3137 = vmatpush.msrb.mxu1 %v3430_v0  ;;  %v3151_v53 = vld [vmem:[%s5450_s9 + $0x10] sm:$0xff]  ;;  %v3150_v22 = vld [vmem:[%s5450_s9 + $0x8] sm:$0xff]  ;;  %v3149_v57 = vld [vmem:[%s5450_s9] sm:$0xff] }
 0x326   :  { %v3096_v58 = vor.u32 %v3095_v21, %v3094_v12  ;;  %3174 = vmatpush.msrb.mxu2 %v3155_v35  ;;  %v3448_v59 = vld [vmem:[%s5448_s8] ss:$0 sm:$0xff] }
 0x327   :  { %v3051_v32 = vmax.f32 %v3034_v3, %v3050_v19  ;;  %v3449_v25 = vld [vmem:[%s5449_s10] ss:$0 sm:$0xff] }
 0x328   :  { %v3113_v18 = vmax.f32 %v3096_v58, %v3112_v17  ;;  %3175 = vmatpush.msrb.mxu2 %v3154_v7 }
 0x329   :  { %3429 = vmatmul.msk.f32.vlgmr.msra.gmra.mxu3 %vm578_vm2, %v3051_v32 }
 0x32a   :  { %3434 = vmatmul.msk.f32.vlgmr.msrb.gmra.mxu1 %vm578_vm2, %v3113_v18  ;;  %3176 = vmatpush.msrb.mxu2 %v3153_v23 }
 0x32c   :  { %3177 = vmatpush.msrb.mxu2 %v3152_v29 }
 0x32e   :  { %3178 = vmatpush.msrb.mxu2 %v3151_v53 }
 0x330   :  { %3179 = vmatpush.msrb.mxu2 %v3150_v22 }
 0x332   :  { %3180 = vmatpush.msrb.mxu2 %v3149_v57 }
 0x366   :  { %v2249_v8 = vpop.f32.mrf.mxu1 }
 0x36e   :  { %v2395_v31 = vpop.f32.mrf.mxu1 }
 0x36f   :  { %v2272_v36 = vpop.f32.mrf.mxu2 }
 0x370   :  { %v2273_v16 = vadd.f32 %v2272_v36, %v2249_v8 }
 0x371   :  { %v2333_v28 = vpop.f32.mrf.mxu3 }
 0x372   :  { %v2336_v51 = vadd.f32 %v2333_v28, %v2273_v16 }
 0x374   :  { %v2398_v4 = vadd.f32 %v2395_v31, %v2336_v51 }
 0x37b   :  { %v2457_v24 = vpop.f32.mrf.mxu2 }
 0x37c   :  { %v2581_v13 = vpop.f32.mrf.mxu1  ;;  %v2460_v50 = vadd.f32 %v2457_v24, %v2398_v4 }
 0x37e   :  { %v2519_v63 = vpop.f32.mrf.mxu3 }
 0x37f   :  { %v2522_v15 = vadd.f32 %v2519_v63, %v2460_v50 }
 0x381   :  { %v2584_v55 = vadd.f32 %v2581_v13, %v2522_v15 }
 0x384   :  { %v2643_v56 = vpop.f32.mrf.mxu2 }
 0x385   :  { %v2646_v27 = vadd.f32 %v2643_v56, %v2584_v55 }
 0x38c   :  { %v2705_v47 = vpop.f32.mrf.mxu3 }
 0x38d   :  { %v2708_v48 = vadd.f32 %v2705_v47, %v2646_v27 }
 0x38f   :  { %v2767_v33 = vpop.f32.mrf.mxu1 }
 0x390   :  { %v2770_v5 = vadd.f32 %v2767_v33, %v2708_v48 }
 0x397   :  { %v2829_v26 = vpop.f32.mrf.mxu2 }
 0x398   :  { %v2832_v14 = vadd.f32 %v2829_v26, %v2770_v5 }
 0x39b   :  { %v2891_v46 = vpop.f32.mrf.mxu3 }
 0x39c   :  { %v2894_v54 = vadd.f32 %v2891_v46, %v2832_v14 }
 0x39f   :  { %v2953_v2 = vpop.f32.mrf.mxu1 }
 0x3a0   :  { %v2956_v6 = vadd.f32 %v2953_v2, %v2894_v54 }
 0x3a7   :  { %v3139_v52 = vpop.f32.mrf.mxu1 }
 0x3a8   :  { %v3015_v49 = vpop.f32.mrf.mxu2 }
 0x3a9   :  { %v3018_v44 = vadd.f32 %v3015_v49, %v2956_v6 }
 0x3ac   :  { %v3077_v62 = vpop.f32.mrf.mxu3 }
 0x3ad   :  { %v3080_v11 = vadd.f32 %v3077_v62, %v3018_v44 }
 0x3af   :  { %v3142_v20 = vadd.f32 %v3139_v52, %v3080_v11 }
 0x3b1   :  { %v3147_v61 = vadd.f32 %v3448_v59, %v3142_v20 }
 0x3b3   :  { %v3148_v10 = vmax.f32 %v3147_v61, 0.0 }
 0x3b5   :  { %3435 = vmatmul.msk.f32.vlgmr.msrb.gmra.mxu2 %vm3161_vm5, %v3148_v10 }
 0x438   :  { %v3182_v34 = vpop.f32.mrf.mxu2 }
 0x439   :  { %v3183_v41 = vadd.f32 %v3449_v25, %v3182_v34 }
 0x43b   :  { %3185 = vst [vmem:[%s5451_s11] sm:$0xff] %v3183_v41 }

</bundles_post_ra>
